<compile_context>
chip_gen: v6e
topology: v6e:2x2x1
jax: 0.10.0
libtpu: 0.0.40
codegen_flags: <defaults>
</compile_context>

<pallas_src>
import functools

import numpy as np

import jax
import jax.numpy as jnp
from jax.experimental import pallas as pl


LANE = 128   # TPU lane width: the HBM-visible [V|A] output is padded to this.


def _round_up(n, m):
    return ((n + m - 1) // m) * m


def _full_spec(shape):
    return pl.BlockSpec(shape, lambda: (0,) * len(shape))


# ----------------------------------------------------------------------------
# Fused Pallas kernel: conv1 GEMM -> conv2 -> conv3 -> fc1 -> fc2 -> [V | A]
# ----------------------------------------------------------------------------
def _qnet_fused_kernel(p_ref, w1_ref, b1_ref,
                       s2_ref, w2_ref, b2_ref,
                       s3_ref, w3_ref, b3_ref,
                       sf_ref, wf1_ref, bf1_ref,
                       wf2_ref, bf2_ref, wh_ref, bh_ref,
                       o_ref):
    dot = functools.partial(jnp.dot, preferred_element_type=jnp.float32)

    def taps(x, sel_ref, w_ref, cin):
        # Conv (or flatten) as  sum_t  S_t @ (x @ W_t): the constant 0/1
        # selection matmul performs the strided-window spatial gather on the
        # MXU, so no strided / reshaped VMEM access is needed in-kernel.
        acc = dot(sel_ref[0], dot(x, w_ref[0:cin, :]))
        for t in range(1, sel_ref.shape[0]):
            acc = acc + dot(sel_ref[t], dot(x, w_ref[t * cin:(t + 1) * cin, :]))
        return acc

    c1 = w1_ref.shape[1]          # conv1 out channels (32)
    c2 = w2_ref.shape[1]          # conv2 out channels (64)
    c3 = w3_ref.shape[1]          # conv3 out channels (64)

    # conv1: patches were im2col'd in the wrapper -> one GEMM.
    h = jnp.maximum(dot(p_ref[...], w1_ref[...]) + b1_ref[...], 0.0)
    # conv2 / conv3: per-tap selection-matmul accumulation.
    h = jnp.maximum(taps(h, s2_ref, w2_ref, c1) + b2_ref[...], 0.0)
    h = jnp.maximum(taps(h, s3_ref, w3_ref, c2) + b3_ref[...], 0.0)
    # NCHW .view() flatten folded into fc1's tap loop (identity when conv3's
    # spatial output is 1x1, which is the common Atari-style geometry).
    tf, bo, m3 = sf_ref.shape
    if tf == 1 and bo == m3:
        h = dot(h, wf1_ref[...])
    else:
        h = taps(h, sf_ref, wf1_ref, c3)
    h = jnp.maximum(h + bf1_ref[...], 0.0)                              # fc1
    h = jnp.maximum(dot(h, wf2_ref[...]) + bf2_ref[...], 0.0)           # fc2
    o_ref[...] = (dot(h, wh_ref[...]) + bh_ref[...]).astype(o_ref.dtype)  # [V|A]


# ----------------------------------------------------------------------------
# XLA-side glue: one NCHW->NHWC transpose + conv1 im2col (channel concat only)
# ----------------------------------------------------------------------------
def _im2col_nhwc(x, k, s):
    """x: (B, H, W, C) -> patches (B*Ho*Wo, k*k*C), column order (kh, kw, c)."""
    b, h, w, c = x.shape
    ho = (h - k) // s + 1
    wo = (w - k) // s + 1
    cols = [x[:, kh:kh + s * ho:s, kw:kw + s * wo:s, :]
            for kh in range(k) for kw in range(k)]
    p = jnp.concatenate(cols, axis=-1)            # (B, Ho, Wo, k*k*C)
    return p.reshape(b * ho * wo, k * k * c)


# ----------------------------------------------------------------------------
# One-time parameter preparation (call OUTSIDE the jitted forward)
# ----------------------------------------------------------------------------
def conv_output_hw(h, w):
    h1, w1 = (h - 8) // 4 + 1, (w - 8) // 4 + 1
    h2, w2 = (h1 - 4) // 2 + 1, (w1 - 4) // 2 + 1
    h3, w3 = h2 - 3 + 1, w2 - 3 + 1
    return (h1, w1), (h2, w2), (h3, w3)


def _conv_weight_matrix(w):
    """Torch conv weight (Cout, Cin, k, k) -> (k*k*Cin, Cout), rows (kh,kw,cin)."""
    cout, cin, k, _ = w.shape
    return jnp.transpose(w, (2, 3, 1, 0)).reshape(k * k * cin, cout)


def _bias_row(b):
    return b.reshape(1, b.shape[0])


def _tap_selection(batch, hi, wi, ho, wo, k, s):
    """0/1 matrices S[t]: (S[t] @ x_rows) gathers, for conv tap t, the input
    pixel row needed by each output pixel row.  Rows/cols are (b, h, w)-major
    (channels stay on the lane axis)."""
    sel = np.zeros((k * k, batch * ho * wo, batch * hi * wi), np.float32)
    for kh in range(k):
        for kw in range(k):
            t = kh * k + kw
            for b in range(batch):
                for oh in range(ho):
                    for ow in range(wo):
                        m = (b * ho + oh) * wo + ow
                        n = (b * hi + s * oh + kh) * wi + (s * ow + kw)
                        sel[t, m, n] = 1.0
    return jnp.asarray(sel)


def _flatten_selection(batch, hw):
    """S[p] maps conv3-output row (b, p) -> batch row b (folds the NCHW
    .view() flatten into fc1's per-spatial-position tap loop)."""
    sel = np.zeros((hw, batch, batch * hw), np.float32)
    for p in range(hw):
        for b in range(batch):
            sel[p, b, b * hw + p] = 1.0
    return jnp.asarray(sel)


def prepare_params(params, input_shape, batch_size):
    """Permute weights to GEMM layout, build the constant selection matrices,
    lane-pad the merged [V|A] head.  Runs ONCE; the result is specific to
    (input_shape, batch_size), matching the module's fixed env / batch_size."""
    _, h, w = input_shape
    (h1, w1), (h2, w2), (h3, w3) = conv_output_hw(h, w)
    c3 = params["conv3_w"].shape[0]
    d_fc1 = params["fc1_w"].shape[0]
    n_actions = params["A_w"].shape[0]
    assert params["fc1_w"].shape[1] == c3 * h3 * w3

    pp = {}
    pp["c1_w"] = _conv_weight_matrix(params["conv1_w"])
    pp["c1_b"] = _bias_row(params["conv1_b"])
    pp["c2_w"] = _conv_weight_matrix(params["conv2_w"])
    pp["c2_b"] = _bias_row(params["conv2_b"])
    pp["c3_w"] = _conv_weight_matrix(params["conv3_w"])
    pp["c3_b"] = _bias_row(params["conv3_b"])
    pp["sel2"] = _tap_selection(batch_size, h1, w1, h2, w2, 4, 2)
    pp["sel3"] = _tap_selection(batch_size, h2, w2, h3, w3, 3, 1)
    pp["sel_f"] = _flatten_selection(batch_size, h3 * w3)

    # fc1 consumes torch's NCHW .view() flatten of conv3; reorder its columns
    # to (spatial p, channel c) so the flatten folds into the same selection
    # tap loop used by the convs (identity when h3*w3 == 1).
    wf1 = params["fc1_w"].reshape(d_fc1, c3, h3 * w3)
    pp["fc1_w"] = jnp.transpose(wf1, (2, 1, 0)).reshape(h3 * w3 * c3, d_fc1)
    pp["fc1_b"] = _bias_row(params["fc1_b"])
    pp["fc2_w"] = params["fc2_w"].T
    pp["fc2_b"] = _bias_row(params["fc2_b"])

    # Merged lane-dense head: columns [V, A_0..A_{n-1}, 0 ... 0] (width 128).
    n_head = _round_up(1 + n_actions, LANE)
    wh = jnp.concatenate([params["V_w"], params["A_w"]], axis=0).T
    pp["head_w"] = jnp.pad(wh, ((0, 0), (0, n_head - (1 + n_actions))))
    bh = jnp.concatenate([params["V_b"], params["A_b"]], axis=0)
    pp["head_b"] = _bias_row(jnp.pad(bh, (0, n_head - (1 + n_actions))))
    return pp


# ----------------------------------------------------------------------------
# QLearner forward
# ----------------------------------------------------------------------------
def qlearner_forward(prep, state, *, n_actions):
    """state: (B, C, H, W) f32 -> (V: (B, 1), A: (B, n_actions))."""
    b = state.shape[0]
    x = jnp.transpose(state, (0, 2, 3, 1)).astype(jnp.float32)   # NCHW->NHWC
    patches = _im2col_nhwc(x, 8, 4)                              # conv1 im2col
    assert patches.shape[0] == prep["sel2"].shape[2], (
        "prepare_params() was built for a different batch size / input shape")

    args = (patches,
            prep["c1_w"], prep["c1_b"],
            prep["sel2"], prep["c2_w"], prep["c2_b"],
            prep["sel3"], prep["c3_w"], prep["c3_b"],
            prep["sel_f"], prep["fc1_w"], prep["fc1_b"],
            prep["fc2_w"], prep["fc2_b"],
            prep["head_w"], prep["head_b"])
    n_head = prep["head_w"].shape[1]
    va = pl.pallas_call(
        _qnet_fused_kernel,
        out_shape=jax.ShapeDtypeStruct((b, n_head), jnp.float32),
        in_specs=[_full_spec(a.shape) for a in args],
        out_specs=_full_spec((b, n_head)),
    )(*args)
    return va[:, :1], va[:, 1:1 + n_actions]


# ----------------------------------------------------------------------------
# Param init (matches nn.Conv2d / nn.Linear default uniform init ranges)
# ----------------------------------------------------------------------------
def init_params(key, in_channels, n_actions, fc_input_dims):
    ks = jax.random.split(key, 14)

    def u(k, shape, fan_in):
        bound = 1.0 / jnp.sqrt(jnp.float32(fan_in))
        return jax.random.uniform(k, shape, jnp.float32, -bound, bound)

    p = {}
    p["conv1_w"] = u(ks[0], (32, in_channels, 8, 8), in_channels * 64)
    p["conv1_b"] = u(ks[1], (32,), in_channels * 64)
    p["conv2_w"] = u(ks[2], (64, 32, 4, 4), 32 * 16)
    p["conv2_b"] = u(ks[3], (64,), 32 * 16)
    p["conv3_w"] = u(ks[4], (64, 64, 3, 3), 64 * 9)
    p["conv3_b"] = u(ks[5], (64,), 64 * 9)
    p["fc1_w"]   = u(ks[6], (512, fc_input_dims), fc_input_dims)
    p["fc1_b"]   = u(ks[7], (512,), fc_input_dims)
    p["fc2_w"]   = u(ks[8], (128, 512), 512)
    p["fc2_b"]   = u(ks[9], (128,), 512)
    p["V_w"]     = u(ks[10], (1, 128), 128)
    p["V_b"]     = u(ks[11], (1,), 128)
    p["A_w"]     = u(ks[12], (n_actions, 128), 128)
    p["A_b"]     = u(ks[13], (n_actions,), 128)
    return p


# Pure-JAX reference (same math, no Pallas) for a parity check.
def _ref_forward(params, state):
    def conv(x, w, b, s):
        y = jax.lax.conv_general_dilated(
            x, w, window_strides=(s, s), padding="VALID",
            dimension_numbers=("NCHW", "OIHW", "NCHW"))
        return jnp.maximum(y + b[None, :, None, None], 0.0)
    x = conv(state, params["conv1_w"], params["conv1_b"], 4)
    x = conv(x, params["conv2_w"], params["conv2_b"], 2)
    x = conv(x, params["conv3_w"], params["conv3_b"], 1)
    f = x.reshape(x.shape[0], -1)
    f = jnp.maximum(f @ params["fc1_w"].T + params["fc1_b"], 0.0)
    f = jnp.maximum(f @ params["fc2_w"].T + params["fc2_b"], 0.0)
    return f @ params["V_w"].T + params["V_b"], f @ params["A_w"].T + params["A_b"]


if __name__ == "__main__":
    # Small "environment": observation space (4, 36, 36), 6 actions, batch 2.
    B, C, H, W = 2, 4, 36, 36
    n_actions = 6
    (_, _), (_, _), (H3, W3) = conv_output_hw(H, W)     # 36 -> 8 -> 3 -> 1
    fc_input_dims = 64 * H3 * W3

    key = jax.random.PRNGKey(0)
    k_params, k_state = jax.random.split(key)
    params = init_params(k_params, C, n_actions, fc_input_dims)
    state = jax.random.uniform(k_state, (B, C, H, W), jnp.float32)

    # One-time prep, OUTSIDE the jitted hot path.
    prep = prepare_params(params, (C, H, W), B)

    fwd = jax.jit(functools.partial(qlearner_forward, n_actions=n_actions))
    V, A = fwd(prep, state)
    V = jax.block_until_ready(V)
    A = jax.block_until_ready(A)

    Vr, Ar = _ref_forward(params, state)
    assert V.shape == (B, 1) and A.shape == (B, n_actions)
    assert jnp.allclose(V, Vr, rtol=1e-4, atol=1e-4)
    assert jnp.allclose(A, Ar, rtol=1e-4, atol=1e-4)

    print("KERNEL_OK")
</pallas_src>

<mosaic_0001>
module attributes {stable_mosaic.version = 11 : i64} {
  func.func @_qnet_fused_kernel(%arg0: memref<128x256xf32, #tpu.memory_space<vmem>>, %arg1: memref<256x32xf32, #tpu.memory_space<vmem>>, %arg2: memref<1x32xf32, #tpu.memory_space<vmem>>, %arg3: memref<16x18x128xf32, #tpu.memory_space<vmem>>, %arg4: memref<512x64xf32, #tpu.memory_space<vmem>>, %arg5: memref<1x64xf32, #tpu.memory_space<vmem>>, %arg6: memref<9x2x18xf32, #tpu.memory_space<vmem>>, %arg7: memref<576x64xf32, #tpu.memory_space<vmem>>, %arg8: memref<1x64xf32, #tpu.memory_space<vmem>>, %arg9: memref<1x2x2xf32, #tpu.memory_space<vmem>>, %arg10: memref<64x512xf32, #tpu.memory_space<vmem>>, %arg11: memref<1x512xf32, #tpu.memory_space<vmem>>, %arg12: memref<512x128xf32, #tpu.memory_space<vmem>>, %arg13: memref<1x128xf32, #tpu.memory_space<vmem>>, %arg14: memref<128x128xf32, #tpu.memory_space<vmem>>, %arg15: memref<1x128xf32, #tpu.memory_space<vmem>>, %arg16: memref<2x128xf32, #tpu.memory_space<vmem>>) attributes {dimension_semantics = [], scalar_prefetch = 0 : i64, scratch_operands = 0 : i64, tpu.core_type = #tpu.core_type<tc>} {
    %c0 = arith.constant 0 : index
    %c0_0 = arith.constant 0 : index
    %0 = vector.load %arg0[%c0, %c0_0] : memref<128x256xf32, #tpu.memory_space<vmem>>, vector<128x256xf32>
    %c0_1 = arith.constant 0 : index
    %c0_2 = arith.constant 0 : index
    %1 = vector.load %arg1[%c0_1, %c0_2] : memref<256x32xf32, #tpu.memory_space<vmem>>, vector<256x32xf32>
    %cst = arith.constant dense<0.000000e+00> : vector<128x32xf32>
    %2 = tpu.matmul %0, %1, %cst {dimension_numbers = #tpu.dot_dimension_numbers<[1], [0], [0], [1], [0, 0, 1, 1], [], []>} : vector<128x256xf32>, vector<256x32xf32>, vector<128x32xf32> -> vector<128x32xf32>
    %c0_3 = arith.constant 0 : index
    %c0_4 = arith.constant 0 : index
    %3 = vector.load %arg2[%c0_3, %c0_4] : memref<1x32xf32, #tpu.memory_space<vmem>>, vector<1x32xf32>
    %4 = vector.broadcast %3 : vector<1x32xf32> to vector<128x32xf32>
    %5 = arith.addf %2, %4 : vector<128x32xf32>
    %cst_5 = arith.constant 0.000000e+00 : f32
    %6 = vector.broadcast %cst_5 : f32 to vector<128x32xf32>
    %7 = arith.maximumf %5, %6 : vector<128x32xf32>
    %c0_6 = arith.constant 0 : index
    %c0_7 = arith.constant 0 : index
    %c0_8 = arith.constant 0 : index
    %8 = vector.load %arg3[%c0_6, %c0_7, %c0_8] : memref<16x18x128xf32, #tpu.memory_space<vmem>>, vector<1x18x128xf32>
    %9 = vector.shape_cast %8 : vector<1x18x128xf32> to vector<18x128xf32>
    %c0_9 = arith.constant 0 : index
    %c0_10 = arith.constant 0 : index
    %10 = vector.load %arg4[%c0_9, %c0_10] : memref<512x64xf32, #tpu.memory_space<vmem>>, vector<32x64xf32>
    %cst_11 = arith.constant dense<0.000000e+00> : vector<128x64xf32>
    %11 = tpu.matmul %7, %10, %cst_11 {dimension_numbers = #tpu.dot_dimension_numbers<[1], [0], [0], [1], [0, 0, 1, 1], [], []>} : vector<128x32xf32>, vector<32x64xf32>, vector<128x64xf32> -> vector<128x64xf32>
    %cst_12 = arith.constant dense<0.000000e+00> : vector<18x64xf32>
    %12 = tpu.matmul %9, %11, %cst_12 {dimension_numbers = #tpu.dot_dimension_numbers<[1], [0], [0], [1], [0, 0, 1, 1], [], []>} : vector<18x128xf32>, vector<128x64xf32>, vector<18x64xf32> -> vector<18x64xf32>
    %c1 = arith.constant 1 : index
    %c0_13 = arith.constant 0 : index
    %c0_14 = arith.constant 0 : index
    %13 = vector.load %arg3[%c1, %c0_13, %c0_14] : memref<16x18x128xf32, #tpu.memory_space<vmem>>, vector<1x18x128xf32>
    %14 = vector.shape_cast %13 : vector<1x18x128xf32> to vector<18x128xf32>
    %c32 = arith.constant 32 : index
    %c0_15 = arith.constant 0 : index
    %15 = vector.load %arg4[%c32, %c0_15] : memref<512x64xf32, #tpu.memory_space<vmem>>, vector<32x64xf32>
    %cst_16 = arith.constant dense<0.000000e+00> : vector<128x64xf32>
    %16 = tpu.matmul %7, %15, %cst_16 {dimension_numbers = #tpu.dot_dimension_numbers<[1], [0], [0], [1], [0, 0, 1, 1], [], []>} : vector<128x32xf32>, vector<32x64xf32>, vector<128x64xf32> -> vector<128x64xf32>
    %cst_17 = arith.constant dense<0.000000e+00> : vector<18x64xf32>
    %17 = tpu.matmul %14, %16, %cst_17 {dimension_numbers = #tpu.dot_dimension_numbers<[1], [0], [0], [1], [0, 0, 1, 1], [], []>} : vector<18x128xf32>, vector<128x64xf32>, vector<18x64xf32> -> vector<18x64xf32>
    %18 = arith.addf %12, %17 : vector<18x64xf32>
    %c2 = arith.constant 2 : index
    %c0_18 = arith.constant 0 : index
    %c0_19 = arith.constant 0 : index
    %19 = vector.load %arg3[%c2, %c0_18, %c0_19] : memref<16x18x128xf32, #tpu.memory_space<vmem>>, vector<1x18x128xf32>
    %20 = vector.shape_cast %19 : vector<1x18x128xf32> to vector<18x128xf32>
    %c64 = arith.constant 64 : index
    %c0_20 = arith.constant 0 : index
    %21 = vector.load %arg4[%c64, %c0_20] : memref<512x64xf32, #tpu.memory_space<vmem>>, vector<32x64xf32>
    %cst_21 = arith.constant dense<0.000000e+00> : vector<128x64xf32>
    %22 = tpu.matmul %7, %21, %cst_21 {dimension_numbers = #tpu.dot_dimension_numbers<[1], [0], [0], [1], [0, 0, 1, 1], [], []>} : vector<128x32xf32>, vector<32x64xf32>, vector<128x64xf32> -> vector<128x64xf32>
    %cst_22 = arith.constant dense<0.000000e+00> : vector<18x64xf32>
    %23 = tpu.matmul %20, %22, %cst_22 {dimension_numbers = #tpu.dot_dimension_numbers<[1], [0], [0], [1], [0, 0, 1, 1], [], []>} : vector<18x128xf32>, vector<128x64xf32>, vector<18x64xf32> -> vector<18x64xf32>
    %24 = arith.addf %18, %23 : vector<18x64xf32>
    %c3 = arith.constant 3 : index
    %c0_23 = arith.constant 0 : index
    %c0_24 = arith.constant 0 : index
    %25 = vector.load %arg3[%c3, %c0_23, %c0_24] : memref<16x18x128xf32, #tpu.memory_space<vmem>>, vector<1x18x128xf32>
    %26 = vector.shape_cast %25 : vector<1x18x128xf32> to vector<18x128xf32>
    %c96 = arith.constant 96 : index
    %c0_25 = arith.constant 0 : index
    %27 = vector.load %arg4[%c96, %c0_25] : memref<512x64xf32, #tpu.memory_space<vmem>>, vector<32x64xf32>
    %cst_26 = arith.constant dense<0.000000e+00> : vector<128x64xf32>
    %28 = tpu.matmul %7, %27, %cst_26 {dimension_numbers = #tpu.dot_dimension_numbers<[1], [0], [0], [1], [0, 0, 1, 1], [], []>} : vector<128x32xf32>, vector<32x64xf32>, vector<128x64xf32> -> vector<128x64xf32>
    %cst_27 = arith.constant dense<0.000000e+00> : vector<18x64xf32>
    %29 = tpu.matmul %26, %28, %cst_27 {dimension_numbers = #tpu.dot_dimension_numbers<[1], [0], [0], [1], [0, 0, 1, 1], [], []>} : vector<18x128xf32>, vector<128x64xf32>, vector<18x64xf32> -> vector<18x64xf32>
    %30 = arith.addf %24, %29 : vector<18x64xf32>
    %c4 = arith.constant 4 : index
    %c0_28 = arith.constant 0 : index
    %c0_29 = arith.constant 0 : index
    %31 = vector.load %arg3[%c4, %c0_28, %c0_29] : memref<16x18x128xf32, #tpu.memory_space<vmem>>, vector<1x18x128xf32>
    %32 = vector.shape_cast %31 : vector<1x18x128xf32> to vector<18x128xf32>
    %c128 = arith.constant 128 : index
    %c0_30 = arith.constant 0 : index
    %33 = vector.load %arg4[%c128, %c0_30] : memref<512x64xf32, #tpu.memory_space<vmem>>, vector<32x64xf32>
    %cst_31 = arith.constant dense<0.000000e+00> : vector<128x64xf32>
    %34 = tpu.matmul %7, %33, %cst_31 {dimension_numbers = #tpu.dot_dimension_numbers<[1], [0], [0], [1], [0, 0, 1, 1], [], []>} : vector<128x32xf32>, vector<32x64xf32>, vector<128x64xf32> -> vector<128x64xf32>
    %cst_32 = arith.constant dense<0.000000e+00> : vector<18x64xf32>
    %35 = tpu.matmul %32, %34, %cst_32 {dimension_numbers = #tpu.dot_dimension_numbers<[1], [0], [0], [1], [0, 0, 1, 1], [], []>} : vector<18x128xf32>, vector<128x64xf32>, vector<18x64xf32> -> vector<18x64xf32>
    %36 = arith.addf %30, %35 : vector<18x64xf32>
    %c5 = arith.constant 5 : index
    %c0_33 = arith.constant 0 : index
    %c0_34 = arith.constant 0 : index
    %37 = vector.load %arg3[%c5, %c0_33, %c0_34] : memref<16x18x128xf32, #tpu.memory_space<vmem>>, vector<1x18x128xf32>
    %38 = vector.shape_cast %37 : vector<1x18x128xf32> to vector<18x128xf32>
    %c160 = arith.constant 160 : index
    %c0_35 = arith.constant 0 : index
    %39 = vector.load %arg4[%c160, %c0_35] : memref<512x64xf32, #tpu.memory_space<vmem>>, vector<32x64xf32>
    %cst_36 = arith.constant dense<0.000000e+00> : vector<128x64xf32>
    %40 = tpu.matmul %7, %39, %cst_36 {dimension_numbers = #tpu.dot_dimension_numbers<[1], [0], [0], [1], [0, 0, 1, 1], [], []>} : vector<128x32xf32>, vector<32x64xf32>, vector<128x64xf32> -> vector<128x64xf32>
    %cst_37 = arith.constant dense<0.000000e+00> : vector<18x64xf32>
    %41 = tpu.matmul %38, %40, %cst_37 {dimension_numbers = #tpu.dot_dimension_numbers<[1], [0], [0], [1], [0, 0, 1, 1], [], []>} : vector<18x128xf32>, vector<128x64xf32>, vector<18x64xf32> -> vector<18x64xf32>
    %42 = arith.addf %36, %41 : vector<18x64xf32>
    %c6 = arith.constant 6 : index
    %c0_38 = arith.constant 0 : index
    %c0_39 = arith.constant 0 : index
    %43 = vector.load %arg3[%c6, %c0_38, %c0_39] : memref<16x18x128xf32, #tpu.memory_space<vmem>>, vector<1x18x128xf32>
    %44 = vector.shape_cast %43 : vector<1x18x128xf32> to vector<18x128xf32>
    %c192 = arith.constant 192 : index
    %c0_40 = arith.constant 0 : index
    %45 = vector.load %arg4[%c192, %c0_40] : memref<512x64xf32, #tpu.memory_space<vmem>>, vector<32x64xf32>
    %cst_41 = arith.constant dense<0.000000e+00> : vector<128x64xf32>
    %46 = tpu.matmul %7, %45, %cst_41 {dimension_numbers = #tpu.dot_dimension_numbers<[1], [0], [0], [1], [0, 0, 1, 1], [], []>} : vector<128x32xf32>, vector<32x64xf32>, vector<128x64xf32> -> vector<128x64xf32>
    %cst_42 = arith.constant dense<0.000000e+00> : vector<18x64xf32>
    %47 = tpu.matmul %44, %46, %cst_42 {dimension_numbers = #tpu.dot_dimension_numbers<[1], [0], [0], [1], [0, 0, 1, 1], [], []>} : vector<18x128xf32>, vector<128x64xf32>, vector<18x64xf32> -> vector<18x64xf32>
    %48 = arith.addf %42, %47 : vector<18x64xf32>
    %c7 = arith.constant 7 : index
    %c0_43 = arith.constant 0 : index
    %c0_44 = arith.constant 0 : index
    %49 = vector.load %arg3[%c7, %c0_43, %c0_44] : memref<16x18x128xf32, #tpu.memory_space<vmem>>, vector<1x18x128xf32>
    %50 = vector.shape_cast %49 : vector<1x18x128xf32> to vector<18x128xf32>
    %c224 = arith.constant 224 : index
    %c0_45 = arith.constant 0 : index
    %51 = vector.load %arg4[%c224, %c0_45] : memref<512x64xf32, #tpu.memory_space<vmem>>, vector<32x64xf32>
    %cst_46 = arith.constant dense<0.000000e+00> : vector<128x64xf32>
    %52 = tpu.matmul %7, %51, %cst_46 {dimension_numbers = #tpu.dot_dimension_numbers<[1], [0], [0], [1], [0, 0, 1, 1], [], []>} : vector<128x32xf32>, vector<32x64xf32>, vector<128x64xf32> -> vector<128x64xf32>
    %cst_47 = arith.constant dense<0.000000e+00> : vector<18x64xf32>
    %53 = tpu.matmul %50, %52, %cst_47 {dimension_numbers = #tpu.dot_dimension_numbers<[1], [0], [0], [1], [0, 0, 1, 1], [], []>} : vector<18x128xf32>, vector<128x64xf32>, vector<18x64xf32> -> vector<18x64xf32>
    %54 = arith.addf %48, %53 : vector<18x64xf32>
    %c8 = arith.constant 8 : index
    %c0_48 = arith.constant 0 : index
    %c0_49 = arith.constant 0 : index
    %55 = vector.load %arg3[%c8, %c0_48, %c0_49] : memref<16x18x128xf32, #tpu.memory_space<vmem>>, vector<1x18x128xf32>
    %56 = vector.shape_cast %55 : vector<1x18x128xf32> to vector<18x128xf32>
    %c256 = arith.constant 256 : index
    %c0_50 = arith.constant 0 : index
    %57 = vector.load %arg4[%c256, %c0_50] : memref<512x64xf32, #tpu.memory_space<vmem>>, vector<32x64xf32>
    %cst_51 = arith.constant dense<0.000000e+00> : vector<128x64xf32>
    %58 = tpu.matmul %7, %57, %cst_51 {dimension_numbers = #tpu.dot_dimension_numbers<[1], [0], [0], [1], [0, 0, 1, 1], [], []>} : vector<128x32xf32>, vector<32x64xf32>, vector<128x64xf32> -> vector<128x64xf32>
    %cst_52 = arith.constant dense<0.000000e+00> : vector<18x64xf32>
    %59 = tpu.matmul %56, %58, %cst_52 {dimension_numbers = #tpu.dot_dimension_numbers<[1], [0], [0], [1], [0, 0, 1, 1], [], []>} : vector<18x128xf32>, vector<128x64xf32>, vector<18x64xf32> -> vector<18x64xf32>
    %60 = arith.addf %54, %59 : vector<18x64xf32>
    %c9 = arith.constant 9 : index
    %c0_53 = arith.constant 0 : index
    %c0_54 = arith.constant 0 : index
    %61 = vector.load %arg3[%c9, %c0_53, %c0_54] : memref<16x18x128xf32, #tpu.memory_space<vmem>>, vector<1x18x128xf32>
    %62 = vector.shape_cast %61 : vector<1x18x128xf32> to vector<18x128xf32>
    %c288 = arith.constant 288 : index
    %c0_55 = arith.constant 0 : index
    %63 = vector.load %arg4[%c288, %c0_55] : memref<512x64xf32, #tpu.memory_space<vmem>>, vector<32x64xf32>
    %cst_56 = arith.constant dense<0.000000e+00> : vector<128x64xf32>
    %64 = tpu.matmul %7, %63, %cst_56 {dimension_numbers = #tpu.dot_dimension_numbers<[1], [0], [0], [1], [0, 0, 1, 1], [], []>} : vector<128x32xf32>, vector<32x64xf32>, vector<128x64xf32> -> vector<128x64xf32>
    %cst_57 = arith.constant dense<0.000000e+00> : vector<18x64xf32>
    %65 = tpu.matmul %62, %64, %cst_57 {dimension_numbers = #tpu.dot_dimension_numbers<[1], [0], [0], [1], [0, 0, 1, 1], [], []>} : vector<18x128xf32>, vector<128x64xf32>, vector<18x64xf32> -> vector<18x64xf32>
    %66 = arith.addf %60, %65 : vector<18x64xf32>
    %c10 = arith.constant 10 : index
    %c0_58 = arith.constant 0 : index
    %c0_59 = arith.constant 0 : index
    %67 = vector.load %arg3[%c10, %c0_58, %c0_59] : memref<16x18x128xf32, #tpu.memory_space<vmem>>, vector<1x18x128xf32>
    %68 = vector.shape_cast %67 : vector<1x18x128xf32> to vector<18x128xf32>
    %c320 = arith.constant 320 : index
    %c0_60 = arith.constant 0 : index
    %69 = vector.load %arg4[%c320, %c0_60] : memref<512x64xf32, #tpu.memory_space<vmem>>, vector<32x64xf32>
    %cst_61 = arith.constant dense<0.000000e+00> : vector<128x64xf32>
    %70 = tpu.matmul %7, %69, %cst_61 {dimension_numbers = #tpu.dot_dimension_numbers<[1], [0], [0], [1], [0, 0, 1, 1], [], []>} : vector<128x32xf32>, vector<32x64xf32>, vector<128x64xf32> -> vector<128x64xf32>
    %cst_62 = arith.constant dense<0.000000e+00> : vector<18x64xf32>
    %71 = tpu.matmul %68, %70, %cst_62 {dimension_numbers = #tpu.dot_dimension_numbers<[1], [0], [0], [1], [0, 0, 1, 1], [], []>} : vector<18x128xf32>, vector<128x64xf32>, vector<18x64xf32> -> vector<18x64xf32>
    %72 = arith.addf %66, %71 : vector<18x64xf32>
    %c11 = arith.constant 11 : index
    %c0_63 = arith.constant 0 : index
    %c0_64 = arith.constant 0 : index
    %73 = vector.load %arg3[%c11, %c0_63, %c0_64] : memref<16x18x128xf32, #tpu.memory_space<vmem>>, vector<1x18x128xf32>
    %74 = vector.shape_cast %73 : vector<1x18x128xf32> to vector<18x128xf32>
    %c352 = arith.constant 352 : index
    %c0_65 = arith.constant 0 : index
    %75 = vector.load %arg4[%c352, %c0_65] : memref<512x64xf32, #tpu.memory_space<vmem>>, vector<32x64xf32>
    %cst_66 = arith.constant dense<0.000000e+00> : vector<128x64xf32>
    %76 = tpu.matmul %7, %75, %cst_66 {dimension_numbers = #tpu.dot_dimension_numbers<[1], [0], [0], [1], [0, 0, 1, 1], [], []>} : vector<128x32xf32>, vector<32x64xf32>, vector<128x64xf32> -> vector<128x64xf32>
    %cst_67 = arith.constant dense<0.000000e+00> : vector<18x64xf32>
    %77 = tpu.matmul %74, %76, %cst_67 {dimension_numbers = #tpu.dot_dimension_numbers<[1], [0], [0], [1], [0, 0, 1, 1], [], []>} : vector<18x128xf32>, vector<128x64xf32>, vector<18x64xf32> -> vector<18x64xf32>
    %78 = arith.addf %72, %77 : vector<18x64xf32>
    %c12 = arith.constant 12 : index
    %c0_68 = arith.constant 0 : index
    %c0_69 = arith.constant 0 : index
    %79 = vector.load %arg3[%c12, %c0_68, %c0_69] : memref<16x18x128xf32, #tpu.memory_space<vmem>>, vector<1x18x128xf32>
    %80 = vector.shape_cast %79 : vector<1x18x128xf32> to vector<18x128xf32>
    %c384 = arith.constant 384 : index
    %c0_70 = arith.constant 0 : index
    %81 = vector.load %arg4[%c384, %c0_70] : memref<512x64xf32, #tpu.memory_space<vmem>>, vector<32x64xf32>
    %cst_71 = arith.constant dense<0.000000e+00> : vector<128x64xf32>
    %82 = tpu.matmul %7, %81, %cst_71 {dimension_numbers = #tpu.dot_dimension_numbers<[1], [0], [0], [1], [0, 0, 1, 1], [], []>} : vector<128x32xf32>, vector<32x64xf32>, vector<128x64xf32> -> vector<128x64xf32>
    %cst_72 = arith.constant dense<0.000000e+00> : vector<18x64xf32>
    %83 = tpu.matmul %80, %82, %cst_72 {dimension_numbers = #tpu.dot_dimension_numbers<[1], [0], [0], [1], [0, 0, 1, 1], [], []>} : vector<18x128xf32>, vector<128x64xf32>, vector<18x64xf32> -> vector<18x64xf32>
    %84 = arith.addf %78, %83 : vector<18x64xf32>
    %c13 = arith.constant 13 : index
    %c0_73 = arith.constant 0 : index
    %c0_74 = arith.constant 0 : index
    %85 = vector.load %arg3[%c13, %c0_73, %c0_74] : memref<16x18x128xf32, #tpu.memory_space<vmem>>, vector<1x18x128xf32>
    %86 = vector.shape_cast %85 : vector<1x18x128xf32> to vector<18x128xf32>
    %c416 = arith.constant 416 : index
    %c0_75 = arith.constant 0 : index
    %87 = vector.load %arg4[%c416, %c0_75] : memref<512x64xf32, #tpu.memory_space<vmem>>, vector<32x64xf32>
    %cst_76 = arith.constant dense<0.000000e+00> : vector<128x64xf32>
    %88 = tpu.matmul %7, %87, %cst_76 {dimension_numbers = #tpu.dot_dimension_numbers<[1], [0], [0], [1], [0, 0, 1, 1], [], []>} : vector<128x32xf32>, vector<32x64xf32>, vector<128x64xf32> -> vector<128x64xf32>
    %cst_77 = arith.constant dense<0.000000e+00> : vector<18x64xf32>
    %89 = tpu.matmul %86, %88, %cst_77 {dimension_numbers = #tpu.dot_dimension_numbers<[1], [0], [0], [1], [0, 0, 1, 1], [], []>} : vector<18x128xf32>, vector<128x64xf32>, vector<18x64xf32> -> vector<18x64xf32>
    %90 = arith.addf %84, %89 : vector<18x64xf32>
    %c14 = arith.constant 14 : index
    %c0_78 = arith.constant 0 : index
    %c0_79 = arith.constant 0 : index
    %91 = vector.load %arg3[%c14, %c0_78, %c0_79] : memref<16x18x128xf32, #tpu.memory_space<vmem>>, vector<1x18x128xf32>
    %92 = vector.shape_cast %91 : vector<1x18x128xf32> to vector<18x128xf32>
    %c448 = arith.constant 448 : index
    %c0_80 = arith.constant 0 : index
    %93 = vector.load %arg4[%c448, %c0_80] : memref<512x64xf32, #tpu.memory_space<vmem>>, vector<32x64xf32>
    %cst_81 = arith.constant dense<0.000000e+00> : vector<128x64xf32>
    %94 = tpu.matmul %7, %93, %cst_81 {dimension_numbers = #tpu.dot_dimension_numbers<[1], [0], [0], [1], [0, 0, 1, 1], [], []>} : vector<128x32xf32>, vector<32x64xf32>, vector<128x64xf32> -> vector<128x64xf32>
    %cst_82 = arith.constant dense<0.000000e+00> : vector<18x64xf32>
    %95 = tpu.matmul %92, %94, %cst_82 {dimension_numbers = #tpu.dot_dimension_numbers<[1], [0], [0], [1], [0, 0, 1, 1], [], []>} : vector<18x128xf32>, vector<128x64xf32>, vector<18x64xf32> -> vector<18x64xf32>
    %96 = arith.addf %90, %95 : vector<18x64xf32>
    %c15 = arith.constant 15 : index
    %c0_83 = arith.constant 0 : index
    %c0_84 = arith.constant 0 : index
    %97 = vector.load %arg3[%c15, %c0_83, %c0_84] : memref<16x18x128xf32, #tpu.memory_space<vmem>>, vector<1x18x128xf32>
    %98 = vector.shape_cast %97 : vector<1x18x128xf32> to vector<18x128xf32>
    %c480 = arith.constant 480 : index
    %c0_85 = arith.constant 0 : index
    %99 = vector.load %arg4[%c480, %c0_85] : memref<512x64xf32, #tpu.memory_space<vmem>>, vector<32x64xf32>
    %cst_86 = arith.constant dense<0.000000e+00> : vector<128x64xf32>
    %100 = tpu.matmul %7, %99, %cst_86 {dimension_numbers = #tpu.dot_dimension_numbers<[1], [0], [0], [1], [0, 0, 1, 1], [], []>} : vector<128x32xf32>, vector<32x64xf32>, vector<128x64xf32> -> vector<128x64xf32>
    %cst_87 = arith.constant dense<0.000000e+00> : vector<18x64xf32>
    %101 = tpu.matmul %98, %100, %cst_87 {dimension_numbers = #tpu.dot_dimension_numbers<[1], [0], [0], [1], [0, 0, 1, 1], [], []>} : vector<18x128xf32>, vector<128x64xf32>, vector<18x64xf32> -> vector<18x64xf32>
    %102 = arith.addf %96, %101 : vector<18x64xf32>
    %c0_88 = arith.constant 0 : index
    %c0_89 = arith.constant 0 : index
    %103 = vector.load %arg5[%c0_88, %c0_89] : memref<1x64xf32, #tpu.memory_space<vmem>>, vector<1x64xf32>
    %104 = vector.broadcast %103 : vector<1x64xf32> to vector<18x64xf32>
    %105 = arith.addf %102, %104 : vector<18x64xf32>
    %cst_90 = arith.constant 0.000000e+00 : f32
    %106 = vector.broadcast %cst_90 : f32 to vector<18x64xf32>
    %107 = arith.maximumf %105, %106 : vector<18x64xf32>
    %c0_91 = arith.constant 0 : index
    %c0_92 = arith.constant 0 : index
    %c0_93 = arith.constant 0 : index
    %108 = vector.load %arg6[%c0_91, %c0_92, %c0_93] : memref<9x2x18xf32, #tpu.memory_space<vmem>>, vector<1x2x18xf32>
    %109 = vector.shape_cast %108 : vector<1x2x18xf32> to vector<2x18xf32>
    %c0_94 = arith.constant 0 : index
    %c0_95 = arith.constant 0 : index
    %110 = vector.load %arg7[%c0_94, %c0_95] : memref<576x64xf32, #tpu.memory_space<vmem>>, vector<64x64xf32>
    %cst_96 = arith.constant dense<0.000000e+00> : vector<18x64xf32>
    %111 = tpu.matmul %107, %110, %cst_96 {dimension_numbers = #tpu.dot_dimension_numbers<[1], [0], [0], [1], [0, 0, 1, 1], [], []>} : vector<18x64xf32>, vector<64x64xf32>, vector<18x64xf32> -> vector<18x64xf32>
    %cst_97 = arith.constant dense<0.000000e+00> : vector<2x64xf32>
    %112 = tpu.matmul %109, %111, %cst_97 {dimension_numbers = #tpu.dot_dimension_numbers<[1], [0], [0], [1], [0, 0, 1, 1], [], []>} : vector<2x18xf32>, vector<18x64xf32>, vector<2x64xf32> -> vector<2x64xf32>
    %c1_98 = arith.constant 1 : index
    %c0_99 = arith.constant 0 : index
    %c0_100 = arith.constant 0 : index
    %113 = vector.load %arg6[%c1_98, %c0_99, %c0_100] : memref<9x2x18xf32, #tpu.memory_space<vmem>>, vector<1x2x18xf32>
    %114 = vector.shape_cast %113 : vector<1x2x18xf32> to vector<2x18xf32>
    %c64_101 = arith.constant 64 : index
    %c0_102 = arith.constant 0 : index
    %115 = vector.load %arg7[%c64_101, %c0_102] : memref<576x64xf32, #tpu.memory_space<vmem>>, vector<64x64xf32>
    %cst_103 = arith.constant dense<0.000000e+00> : vector<18x64xf32>
    %116 = tpu.matmul %107, %115, %cst_103 {dimension_numbers = #tpu.dot_dimension_numbers<[1], [0], [0], [1], [0, 0, 1, 1], [], []>} : vector<18x64xf32>, vector<64x64xf32>, vector<18x64xf32> -> vector<18x64xf32>
    %cst_104 = arith.constant dense<0.000000e+00> : vector<2x64xf32>
    %117 = tpu.matmul %114, %116, %cst_104 {dimension_numbers = #tpu.dot_dimension_numbers<[1], [0], [0], [1], [0, 0, 1, 1], [], []>} : vector<2x18xf32>, vector<18x64xf32>, vector<2x64xf32> -> vector<2x64xf32>
    %118 = arith.addf %112, %117 : vector<2x64xf32>
    %c2_105 = arith.constant 2 : index
    %c0_106 = arith.constant 0 : index
    %c0_107 = arith.constant 0 : index
    %119 = vector.load %arg6[%c2_105, %c0_106, %c0_107] : memref<9x2x18xf32, #tpu.memory_space<vmem>>, vector<1x2x18xf32>
    %120 = vector.shape_cast %119 : vector<1x2x18xf32> to vector<2x18xf32>
    %c128_108 = arith.constant 128 : index
    %c0_109 = arith.constant 0 : index
    %121 = vector.load %arg7[%c128_108, %c0_109] : memref<576x64xf32, #tpu.memory_space<vmem>>, vector<64x64xf32>
    %cst_110 = arith.constant dense<0.000000e+00> : vector<18x64xf32>
    %122 = tpu.matmul %107, %121, %cst_110 {dimension_numbers = #tpu.dot_dimension_numbers<[1], [0], [0], [1], [0, 0, 1, 1], [], []>} : vector<18x64xf32>, vector<64x64xf32>, vector<18x64xf32> -> vector<18x64xf32>
    %cst_111 = arith.constant dense<0.000000e+00> : vector<2x64xf32>
    %123 = tpu.matmul %120, %122, %cst_111 {dimension_numbers = #tpu.dot_dimension_numbers<[1], [0], [0], [1], [0, 0, 1, 1], [], []>} : vector<2x18xf32>, vector<18x64xf32>, vector<2x64xf32> -> vector<2x64xf32>
    %124 = arith.addf %118, %123 : vector<2x64xf32>
    %c3_112 = arith.constant 3 : index
    %c0_113 = arith.constant 0 : index
    %c0_114 = arith.constant 0 : index
    %125 = vector.load %arg6[%c3_112, %c0_113, %c0_114] : memref<9x2x18xf32, #tpu.memory_space<vmem>>, vector<1x2x18xf32>
    %126 = vector.shape_cast %125 : vector<1x2x18xf32> to vector<2x18xf32>
    %c192_115 = arith.constant 192 : index
    %c0_116 = arith.constant 0 : index
    %127 = vector.load %arg7[%c192_115, %c0_116] : memref<576x64xf32, #tpu.memory_space<vmem>>, vector<64x64xf32>
    %cst_117 = arith.constant dense<0.000000e+00> : vector<18x64xf32>
    %128 = tpu.matmul %107, %127, %cst_117 {dimension_numbers = #tpu.dot_dimension_numbers<[1], [0], [0], [1], [0, 0, 1, 1], [], []>} : vector<18x64xf32>, vector<64x64xf32>, vector<18x64xf32> -> vector<18x64xf32>
    %cst_118 = arith.constant dense<0.000000e+00> : vector<2x64xf32>
    %129 = tpu.matmul %126, %128, %cst_118 {dimension_numbers = #tpu.dot_dimension_numbers<[1], [0], [0], [1], [0, 0, 1, 1], [], []>} : vector<2x18xf32>, vector<18x64xf32>, vector<2x64xf32> -> vector<2x64xf32>
    %130 = arith.addf %124, %129 : vector<2x64xf32>
    %c4_119 = arith.constant 4 : index
    %c0_120 = arith.constant 0 : index
    %c0_121 = arith.constant 0 : index
    %131 = vector.load %arg6[%c4_119, %c0_120, %c0_121] : memref<9x2x18xf32, #tpu.memory_space<vmem>>, vector<1x2x18xf32>
    %132 = vector.shape_cast %131 : vector<1x2x18xf32> to vector<2x18xf32>
    %c256_122 = arith.constant 256 : index
    %c0_123 = arith.constant 0 : index
    %133 = vector.load %arg7[%c256_122, %c0_123] : memref<576x64xf32, #tpu.memory_space<vmem>>, vector<64x64xf32>
    %cst_124 = arith.constant dense<0.000000e+00> : vector<18x64xf32>
    %134 = tpu.matmul %107, %133, %cst_124 {dimension_numbers = #tpu.dot_dimension_numbers<[1], [0], [0], [1], [0, 0, 1, 1], [], []>} : vector<18x64xf32>, vector<64x64xf32>, vector<18x64xf32> -> vector<18x64xf32>
    %cst_125 = arith.constant dense<0.000000e+00> : vector<2x64xf32>
    %135 = tpu.matmul %132, %134, %cst_125 {dimension_numbers = #tpu.dot_dimension_numbers<[1], [0], [0], [1], [0, 0, 1, 1], [], []>} : vector<2x18xf32>, vector<18x64xf32>, vector<2x64xf32> -> vector<2x64xf32>
    %136 = arith.addf %130, %135 : vector<2x64xf32>
    %c5_126 = arith.constant 5 : index
    %c0_127 = arith.constant 0 : index
    %c0_128 = arith.constant 0 : index
    %137 = vector.load %arg6[%c5_126, %c0_127, %c0_128] : memref<9x2x18xf32, #tpu.memory_space<vmem>>, vector<1x2x18xf32>
    %138 = vector.shape_cast %137 : vector<1x2x18xf32> to vector<2x18xf32>
    %c320_129 = arith.constant 320 : index
    %c0_130 = arith.constant 0 : index
    %139 = vector.load %arg7[%c320_129, %c0_130] : memref<576x64xf32, #tpu.memory_space<vmem>>, vector<64x64xf32>
    %cst_131 = arith.constant dense<0.000000e+00> : vector<18x64xf32>
    %140 = tpu.matmul %107, %139, %cst_131 {dimension_numbers = #tpu.dot_dimension_numbers<[1], [0], [0], [1], [0, 0, 1, 1], [], []>} : vector<18x64xf32>, vector<64x64xf32>, vector<18x64xf32> -> vector<18x64xf32>
    %cst_132 = arith.constant dense<0.000000e+00> : vector<2x64xf32>
    %141 = tpu.matmul %138, %140, %cst_132 {dimension_numbers = #tpu.dot_dimension_numbers<[1], [0], [0], [1], [0, 0, 1, 1], [], []>} : vector<2x18xf32>, vector<18x64xf32>, vector<2x64xf32> -> vector<2x64xf32>
    %142 = arith.addf %136, %141 : vector<2x64xf32>
    %c6_133 = arith.constant 6 : index
    %c0_134 = arith.constant 0 : index
    %c0_135 = arith.constant 0 : index
    %143 = vector.load %arg6[%c6_133, %c0_134, %c0_135] : memref<9x2x18xf32, #tpu.memory_space<vmem>>, vector<1x2x18xf32>
    %144 = vector.shape_cast %143 : vector<1x2x18xf32> to vector<2x18xf32>
    %c384_136 = arith.constant 384 : index
    %c0_137 = arith.constant 0 : index
    %145 = vector.load %arg7[%c384_136, %c0_137] : memref<576x64xf32, #tpu.memory_space<vmem>>, vector<64x64xf32>
    %cst_138 = arith.constant dense<0.000000e+00> : vector<18x64xf32>
    %146 = tpu.matmul %107, %145, %cst_138 {dimension_numbers = #tpu.dot_dimension_numbers<[1], [0], [0], [1], [0, 0, 1, 1], [], []>} : vector<18x64xf32>, vector<64x64xf32>, vector<18x64xf32> -> vector<18x64xf32>
    %cst_139 = arith.constant dense<0.000000e+00> : vector<2x64xf32>
    %147 = tpu.matmul %144, %146, %cst_139 {dimension_numbers = #tpu.dot_dimension_numbers<[1], [0], [0], [1], [0, 0, 1, 1], [], []>} : vector<2x18xf32>, vector<18x64xf32>, vector<2x64xf32> -> vector<2x64xf32>
    %148 = arith.addf %142, %147 : vector<2x64xf32>
    %c7_140 = arith.constant 7 : index
    %c0_141 = arith.constant 0 : index
    %c0_142 = arith.constant 0 : index
    %149 = vector.load %arg6[%c7_140, %c0_141, %c0_142] : memref<9x2x18xf32, #tpu.memory_space<vmem>>, vector<1x2x18xf32>
    %150 = vector.shape_cast %149 : vector<1x2x18xf32> to vector<2x18xf32>
    %c448_143 = arith.constant 448 : index
    %c0_144 = arith.constant 0 : index
    %151 = vector.load %arg7[%c448_143, %c0_144] : memref<576x64xf32, #tpu.memory_space<vmem>>, vector<64x64xf32>
    %cst_145 = arith.constant dense<0.000000e+00> : vector<18x64xf32>
    %152 = tpu.matmul %107, %151, %cst_145 {dimension_numbers = #tpu.dot_dimension_numbers<[1], [0], [0], [1], [0, 0, 1, 1], [], []>} : vector<18x64xf32>, vector<64x64xf32>, vector<18x64xf32> -> vector<18x64xf32>
    %cst_146 = arith.constant dense<0.000000e+00> : vector<2x64xf32>
    %153 = tpu.matmul %150, %152, %cst_146 {dimension_numbers = #tpu.dot_dimension_numbers<[1], [0], [0], [1], [0, 0, 1, 1], [], []>} : vector<2x18xf32>, vector<18x64xf32>, vector<2x64xf32> -> vector<2x64xf32>
    %154 = arith.addf %148, %153 : vector<2x64xf32>
    %c8_147 = arith.constant 8 : index
    %c0_148 = arith.constant 0 : index
    %c0_149 = arith.constant 0 : index
    %155 = vector.load %arg6[%c8_147, %c0_148, %c0_149] : memref<9x2x18xf32, #tpu.memory_space<vmem>>, vector<1x2x18xf32>
    %156 = vector.shape_cast %155 : vector<1x2x18xf32> to vector<2x18xf32>
    %c512 = arith.constant 512 : index
    %c0_150 = arith.constant 0 : index
    %157 = vector.load %arg7[%c512, %c0_150] : memref<576x64xf32, #tpu.memory_space<vmem>>, vector<64x64xf32>
    %cst_151 = arith.constant dense<0.000000e+00> : vector<18x64xf32>
    %158 = tpu.matmul %107, %157, %cst_151 {dimension_numbers = #tpu.dot_dimension_numbers<[1], [0], [0], [1], [0, 0, 1, 1], [], []>} : vector<18x64xf32>, vector<64x64xf32>, vector<18x64xf32> -> vector<18x64xf32>
    %cst_152 = arith.constant dense<0.000000e+00> : vector<2x64xf32>
    %159 = tpu.matmul %156, %158, %cst_152 {dimension_numbers = #tpu.dot_dimension_numbers<[1], [0], [0], [1], [0, 0, 1, 1], [], []>} : vector<2x18xf32>, vector<18x64xf32>, vector<2x64xf32> -> vector<2x64xf32>
    %160 = arith.addf %154, %159 : vector<2x64xf32>
    %c0_153 = arith.constant 0 : index
    %c0_154 = arith.constant 0 : index
    %161 = vector.load %arg8[%c0_153, %c0_154] : memref<1x64xf32, #tpu.memory_space<vmem>>, vector<1x64xf32>
    %162 = vector.broadcast %161 : vector<1x64xf32> to vector<2x64xf32>
    %163 = arith.addf %160, %162 : vector<2x64xf32>
    %cst_155 = arith.constant 0.000000e+00 : f32
    %164 = vector.broadcast %cst_155 : f32 to vector<2x64xf32>
    %165 = arith.maximumf %163, %164 : vector<2x64xf32>
    %c0_156 = arith.constant 0 : index
    %c0_157 = arith.constant 0 : index
    %166 = vector.load %arg10[%c0_156, %c0_157] : memref<64x512xf32, #tpu.memory_space<vmem>>, vector<64x512xf32>
    %cst_158 = arith.constant dense<0.000000e+00> : vector<2x512xf32>
    %167 = tpu.matmul %165, %166, %cst_158 {dimension_numbers = #tpu.dot_dimension_numbers<[1], [0], [0], [1], [0, 0, 1, 1], [], []>} : vector<2x64xf32>, vector<64x512xf32>, vector<2x512xf32> -> vector<2x512xf32>
    %c0_159 = arith.constant 0 : index
    %c0_160 = arith.constant 0 : index
    %168 = vector.load %arg11[%c0_159, %c0_160] : memref<1x512xf32, #tpu.memory_space<vmem>>, vector<1x512xf32>
    %169 = vector.broadcast %168 : vector<1x512xf32> to vector<2x512xf32>
    %170 = arith.addf %167, %169 : vector<2x512xf32>
    %cst_161 = arith.constant 0.000000e+00 : f32
    %171 = vector.broadcast %cst_161 : f32 to vector<2x512xf32>
    %172 = arith.maximumf %170, %171 : vector<2x512xf32>
    %c0_162 = arith.constant 0 : index
    %c0_163 = arith.constant 0 : index
    %173 = vector.load %arg12[%c0_162, %c0_163] : memref<512x128xf32, #tpu.memory_space<vmem>>, vector<512x128xf32>
    %cst_164 = arith.constant dense<0.000000e+00> : vector<2x128xf32>
    %174 = tpu.matmul %172, %173, %cst_164 {dimension_numbers = #tpu.dot_dimension_numbers<[1], [0], [0], [1], [0, 0, 1, 1], [], []>} : vector<2x512xf32>, vector<512x128xf32>, vector<2x128xf32> -> vector<2x128xf32>
    %c0_165 = arith.constant 0 : index
    %c0_166 = arith.constant 0 : index
    %175 = vector.load %arg13[%c0_165, %c0_166] : memref<1x128xf32, #tpu.memory_space<vmem>>, vector<1x128xf32>
    %176 = vector.broadcast %175 : vector<1x128xf32> to vector<2x128xf32>
    %177 = arith.addf %174, %176 : vector<2x128xf32>
    %cst_167 = arith.constant 0.000000e+00 : f32
    %178 = vector.broadcast %cst_167 : f32 to vector<2x128xf32>
    %179 = arith.maximumf %177, %178 : vector<2x128xf32>
    %c0_168 = arith.constant 0 : index
    %c0_169 = arith.constant 0 : index
    %180 = vector.load %arg14[%c0_168, %c0_169] : memref<128x128xf32, #tpu.memory_space<vmem>>, vector<128x128xf32>
    %cst_170 = arith.constant dense<0.000000e+00> : vector<2x128xf32>
    %181 = tpu.matmul %179, %180, %cst_170 {dimension_numbers = #tpu.dot_dimension_numbers<[1], [0], [0], [1], [0, 0, 1, 1], [], []>} : vector<2x128xf32>, vector<128x128xf32>, vector<2x128xf32> -> vector<2x128xf32>
    %c0_171 = arith.constant 0 : index
    %c0_172 = arith.constant 0 : index
    %182 = vector.load %arg15[%c0_171, %c0_172] : memref<1x128xf32, #tpu.memory_space<vmem>>, vector<1x128xf32>
    %183 = vector.broadcast %182 : vector<1x128xf32> to vector<2x128xf32>
    %184 = arith.addf %181, %183 : vector<2x128xf32>
    %c0_173 = arith.constant 0 : index
    %c0_174 = arith.constant 0 : index
    %185 = vector.load %arg16[%c0_173, %c0_174] : memref<2x128xf32, #tpu.memory_space<vmem>>, vector<2x128xf32>
    tpu.vector_store %arg16[%c0_173, %c0_174], %184 {strides = array<i32>} : memref<2x128xf32, #tpu.memory_space<vmem>>, vector<2x128xf32>,
    return
  }
}

</mosaic_0001>

<bundles_post_ra>
// kernel: qlearner_forward.1
= control target key start
LH: loop header
LB: loop body
LE: loop exit
PB: predicated region body
PF: predicated region fallthrough
CT: control target
= control target key end

     0   :  { %vm292_vm0 = vcmask 261120   ;;  %vm8949_vm1 = vmmov 0   ;;  %vm4125_vm2 = vcmask 523264   ;;  %vm4309_vm3 = vcmask 1041408   ;;  %s11639_s1 = inlined_call_operand.vmem [shape: f32[256,32], index: 1, kind: input, shape index: {}]   ;;  %s11640_s9 = inlined_call_operand.vmem [shape: f32[1,2,2], index: 9, kind: input, shape index: {}]   ;;  %s11641_s0 = inlined_call_operand.vmem [shape: f32[128,256], index: 0, kind: input, shape index: {}]   ;;  %s11642_s4 = inlined_call_operand.vmem [shape: f32[512,64], index: 4, kind: input, shape index: {}]   ;;  %s11643_s2 = inlined_call_operand.vmem [shape: f32[1,32], index: 2, kind: input, shape index: {}]   ;;  %s11644_s3 = inlined_call_operand.vmem [shape: f32[16,18,128], index: 3, kind: input, shape index: {}]   ;;  %s11645_s7 = inlined_call_operand.vmem [shape: f32[576,64], index: 7, kind: input, shape index: {}]   ;;  %s11646_s5 = inlined_call_operand.vmem [shape: f32[1,64], index: 5, kind: input, shape index: {}]   ;;  %s11647_s6 = inlined_call_operand.vmem [shape: f32[9,2,18], index: 6, kind: input, shape index: {}]   ;;  %s11648_s10 = inlined_call_operand.vmem [shape: f32[64,512], index: 10, kind: input, shape index: {}]   ;;  %s11649_s12 = inlined_call_operand.vmem [shape: f32[512,128], index: 12, kind: input, shape index: {}]   ;;  %s11650_s8 = inlined_call_operand.vmem [shape: f32[1,64], index: 8, kind: input, shape index: {}]   ;;  %s11651_s11 = inlined_call_operand.vmem [shape: f32[1,512], index: 11, kind: input, shape index: {}]   ;;  %s11652_s14 = inlined_call_operand.vmem [shape: f32[128,128], index: 14, kind: input, shape index: {}]   ;;  %s11653_s13 = inlined_call_operand.vmem [shape: f32[1,128], index: 13, kind: input, shape index: {}]   ;;  %s11654_s15 = inlined_call_operand.vmem [shape: f32[1,128], index: 15, kind: input, shape index: {}]   ;;  %s11655_s16 = inlined_call_operand.vmem [shape: f32[2,128], index: 16, kind: output, shape index: {}]  }
   0x1   :  { %11657 = sst [smem:[#allocation2_spill]] %s11639_s1  ;;  %v54_v13 = vld [vmem:[%s11641_s0 + $0x8] sm:$0xff]  ;;  %v53_v33 = vld [vmem:[%s11641_s0] sm:$0xff]  ;;  %v56_v34 = vld [vmem:[%s11641_s0 + $0x18] sm:$0xff]  ;;  %vm4305_vm4 = vcmask 146432  }
   0x2   :  { %s11658_s21 = sld [smem:[#allocation2_spill]]  ;;  %188 = vmatprep.mubr.f32.mxu0 %v54_v13  ;;  %v55_v35 = vld [vmem:[%s11641_s0 + $0x10] sm:$0xff]  ;;  %v58_v36 = vld [vmem:[%s11641_s0 + $0x28] sm:$0xff]  ;;  %v57_v37 = vld [vmem:[%s11641_s0 + $0x20] sm:$0xff] }
   0x3   :  { %v60_v38 = vld [vmem:[%s11641_s0 + $0x38] sm:$0xff]  ;;  %v59_v39 = vld [vmem:[%s11641_s0 + $0x30] sm:$0xff]  ;;  %v62_v40 = vld [vmem:[%s11641_s0 + $0x48] sm:$0xff] }
   0x4   :  { %v61_v41 = vld [vmem:[%s11641_s0 + $0x40] sm:$0xff]  ;;  %v64_v42 = vld [vmem:[%s11641_s0 + $0x58] sm:$0xff]  ;;  %v63_v43 = vld [vmem:[%s11641_s0 + $0x50] sm:$0xff] }
   0x5   :  { %v66_v44 = vld [vmem:[%s11641_s0 + $0x68] sm:$0xff]  ;;  %v65_v45 = vld [vmem:[%s11641_s0 + $0x60] sm:$0xff]  ;;  %v68_v46 = vld [vmem:[%s11641_s0 + $0x78] sm:$0xff] }
   0x6   :  { %v67_v47 = vld [vmem:[%s11641_s0 + $0x70] sm:$0xff]  ;;  %v70_v48 = vld [vmem:[%s11641_s0 + $0x88] sm:$0xff]  ;;  %v69_v49 = vld [vmem:[%s11641_s0 + $0x80] sm:$0xff] }
   0x7   :  { %v72_v50 = vld [vmem:[%s11641_s0 + $0x98] sm:$0xff]  ;;  %v71_v51 = vld [vmem:[%s11641_s0 + $0x90] sm:$0xff]  ;;  %v74_v52 = vld [vmem:[%s11641_s0 + $0xa8] sm:$0xff] }
   0x8   :  { %v116_v0 = vld [vmem:[%s11658_s21 + $0xf8] sm:$0xff]  ;;  %v115_v2 = vld [vmem:[%s11658_s21 + $0xf0] sm:$0xff]  ;;  %v114_v4 = vld [vmem:[%s11658_s21 + $0xe8] sm:$0xff] }
   0x9   :  { %v100_v1 = vld [vmem:[%s11658_s21 + $0x78] sm:$0xff]  ;;  %6511 = vmatprep.subr.mxu0 %v116_v0  ;;  %v99_v3 = vld [vmem:[%s11658_s21 + $0x70] sm:$0xff]  ;;  %v98_v5 = vld [vmem:[%s11658_s21 + $0x68] sm:$0xff] }
   0xa   :  { %6512 = vmatpush3.msra.mxu0 %v100_v1  ;;  %v113_v6 = vld [vmem:[%s11658_s21 + $0xe0] sm:$0xff]  ;;  %v112_v8 = vld [vmem:[%s11658_s21 + $0xd8] sm:$0xff]  ;;  %v111_v10 = vld [vmem:[%s11658_s21 + $0xd0] sm:$0xff] }
   0xb   :  { %6513 = vmatprep.subr.mxu0 %v115_v2  ;;  %v97_v7 = vld [vmem:[%s11658_s21 + $0x60] sm:$0xff]  ;;  %v96_v9 = vld [vmem:[%s11658_s21 + $0x58] sm:$0xff]  ;;  %v95_v11 = vld [vmem:[%s11658_s21 + $0x50] sm:$0xff] }
   0xc   :  { %6514 = vmatpush3.msra.mxu0 %v99_v3  ;;  %v110_v12 = vld [vmem:[%s11658_s21 + $0xc8] sm:$0xff]  ;;  %v109_v15 = vld [vmem:[%s11658_s21 + $0xc0] sm:$0xff]  ;;  %v108_v17 = vld [vmem:[%s11658_s21 + $0xb8] sm:$0xff] }
   0xd   :  { %6515 = vmatprep.subr.mxu0 %v114_v4  ;;  %v94_v14 = vld [vmem:[%s11658_s21 + $0x48] sm:$0xff]  ;;  %v93_v16 = vld [vmem:[%s11658_s21 + $0x40] sm:$0xff]  ;;  %v92_v18 = vld [vmem:[%s11658_s21 + $0x38] sm:$0xff] }
   0xe   :  { %6516 = vmatpush3.msra.mxu0 %v98_v5  ;;  %v107_v19 = vld [vmem:[%s11658_s21 + $0xb0] sm:$0xff]  ;;  %v106_v21 = vld [vmem:[%s11658_s21 + $0xa8] sm:$0xff]  ;;  %v105_v23 = vld [vmem:[%s11658_s21 + $0xa0] sm:$0xff] }
   0xf   :  { %6517 = vmatprep.subr.mxu0 %v113_v6  ;;  %v91_v20 = vld [vmem:[%s11658_s21 + $0x30] sm:$0xff]  ;;  %v90_v22 = vld [vmem:[%s11658_s21 + $0x28] sm:$0xff]  ;;  %v89_v24 = vld [vmem:[%s11658_s21 + $0x20] sm:$0xff] }
  0x10   :  { %6518 = vmatpush3.msra.mxu0 %v97_v7  ;;  %v104_v25 = vld [vmem:[%s11658_s21 + $0x98] sm:$0xff]  ;;  %v103_v27 = vld [vmem:[%s11658_s21 + $0x90] sm:$0xff]  ;;  %v102_v29 = vld [vmem:[%s11658_s21 + $0x88] sm:$0xff] }
  0x11   :  { %6519 = vmatprep.subr.mxu0 %v112_v8  ;;  %v88_v26 = vld [vmem:[%s11658_s21 + $0x18] sm:$0xff]  ;;  %v87_v28 = vld [vmem:[%s11658_s21 + $0x10] sm:$0xff]  ;;  %v86_v30 = vld [vmem:[%s11658_s21 + $0x8] sm:$0xff] }
  0x12   :  { %6520 = vmatpush3.msra.mxu0 %v96_v9  ;;  %v101_v31 = vld [vmem:[%s11658_s21 + $0x80] sm:$0xff]  ;;  %v76_v54 = vld [vmem:[%s11641_s0 + $0xb8] sm:$0xff]  ;;  %v75_v55 = vld [vmem:[%s11641_s0 + $0xb0] sm:$0xff] }
  0x13   :  { %6521 = vmatprep.subr.mxu0 %v111_v10  ;;  %v85_v32 = vld [vmem:[%s11658_s21] sm:$0xff]  ;;  %v78_v56 = vld [vmem:[%s11641_s0 + $0xc8] sm:$0xff]  ;;  %v80_v58 = vld [vmem:[%s11641_s0 + $0xd8] sm:$0xff] }
  0x14   :  { %6522 = vmatpush3.msra.mxu0 %v95_v11  ;;  %v73_v53 = vld [vmem:[%s11641_s0 + $0xa0] sm:$0xff]  ;;  %v79_v59 = vld [vmem:[%s11641_s0 + $0xd0] sm:$0xff]  ;;  %v82_v60 = vld [vmem:[%s11641_s0 + $0xe8] sm:$0xff] }
  0x15   :  { %6523 = vmatprep.subr.mxu0 %v110_v12  ;;  %v77_v57 = vld [vmem:[%s11641_s0 + $0xc0] sm:$0xff]  ;;  %v84_v62 = vld [vmem:[%s11641_s0 + $0xf8] sm:$0xff]  ;;  %v83_v63 = vld [vmem:[%s11641_s0 + $0xf0] sm:$0xff] }
  0x16   :  { %6524 = vmatpush3.msra.mxu0 %v94_v14  ;;  %v81_v61 = vld [vmem:[%s11641_s0 + $0xe0] sm:$0xff]  ;;  %v291_v0 = vld [vmem:[%s11642_s4 + $0x18] sm:$0xff]  ;;  %v290_v1 = vld [vmem:[%s11642_s4 + $0x10] sm:$0xff] }
  0x17   :  { %6525 = vmatprep.subr.mxu0 %v109_v15  ;;  %7437 = vmatprep.subr.mxu1 %v291_v0  ;;  %v289_v2 = vld [vmem:[%s11642_s4 + $0x8] sm:$0xff]  ;;  %v288_v3 = vld [vmem:[%s11642_s4] sm:$0xff]  ;;  %v493_v4 = vld [vmem:[%s11642_s4 + $0x38] sm:$0xff] }
  0x18   :  { %6526 = vmatpush3.msra.mxu0 %v93_v16  ;;  %7438 = vmatpush3.msra.mxu1 %v291_v0  ;;  %v9245_v6 = vld [vmem:[%s11643_s2] ss:$0 sm:$0xff] }
  0x19   :  { %6527 = vmatprep.subr.mxu0 %v108_v17  ;;  %7439 = vmatprep.subr.mxu1 %v290_v1 }
  0x1a   :  { %6528 = vmatpush3.msra.mxu0 %v92_v18  ;;  %7440 = vmatpush3.msra.mxu1 %v290_v1 }
  0x1b   :  { %6529 = vmatprep.subr.mxu0 %v107_v19  ;;  %7441 = vmatprep.subr.mxu1 %v289_v2 }
  0x1c   :  { %6530 = vmatpush3.msra.mxu0 %v91_v20  ;;  %7442 = vmatpush3.msra.mxu1 %v289_v2  ;;  %v492_v20 = vld [vmem:[%s11642_s4 + $0x30] sm:$0xff] }
  0x1d   :  { %6531 = vmatprep.subr.mxu0 %v106_v21  ;;  %7443 = vmatprep.subr.mxu1 %v288_v3 }
  0x1e   :  { %6532 = vmatpush3.msra.mxu0 %v90_v22  ;;  %7444 = vmatpush3.msra.mxu1 %v288_v3 }
  0x1f   :  { %6533 = vmatprep.subr.mxu0 %v105_v23  ;;  %7469 = vmatprep.subr.mxu1 %v493_v4  ;;  %v491_v23 = vld [vmem:[%s11642_s4 + $0x28] sm:$0xff] }
  0x20   :  { %6534 = vmatpush3.msra.mxu0 %v89_v24 }
  0x21   :  { %6535 = vmatprep.subr.mxu0 %v104_v25 }
  0x22   :  { %6536 = vmatpush3.msra.mxu0 %v88_v26 }
  0x23   :  { %6537 = vmatprep.subr.mxu0 %v103_v27  ;;  %v490_v27 = vld [vmem:[%s11642_s4 + $0x20] sm:$0xff] }
  0x24   :  { %6538 = vmatpush3.msra.mxu0 %v87_v28 }
  0x25   :  { %6539 = vmatprep.subr.mxu0 %v102_v29 }
  0x26   :  { %6540 = vmatpush3.msra.mxu0 %v86_v30 }
  0x27   :  { %6541 = vmatprep.subr.mxu0 %v101_v31 }
  0x28   :  { %6542 = vmatpush3.msra.mxu0 %v85_v32 }
  0x29   :  { %189 = vmatmul.mubr.f32.vlgmr.msra.gmra.mxu0 %v53_v33 }
  0x2a   :  { %193 = vmatprep.mubr.f32.mxu0 %v56_v34 }
  0x2d   :  { %194 = vmatmul.mubr.f32.gmra.mxu0 %v55_v35 }
  0x2e   :  { %198 = vmatprep.mubr.f32.mxu0 %v58_v36 }
  0x31   :  { %199 = vmatmul.mubr.f32.gmra.mxu0 %v57_v37 }
  0x32   :  { %203 = vmatprep.mubr.f32.mxu0 %v60_v38 }
  0x35   :  { %204 = vmatmul.mubr.f32.gmra.mxu0 %v59_v39 }
  0x36   :  { %208 = vmatprep.mubr.f32.mxu0 %v62_v40 }
  0x39   :  { %209 = vmatmul.mubr.f32.gmra.mxu0 %v61_v41 }
  0x3a   :  { %213 = vmatprep.mubr.f32.mxu0 %v64_v42 }
  0x3d   :  { %214 = vmatmul.mubr.f32.gmra.mxu0 %v63_v43 }
  0x3e   :  { %218 = vmatprep.mubr.f32.mxu0 %v66_v44 }
  0x41   :  { %219 = vmatmul.mubr.f32.gmra.mxu0 %v65_v45 }
  0x42   :  { %223 = vmatprep.mubr.f32.mxu0 %v68_v46 }
  0x45   :  { %224 = vmatmul.mubr.f32.gmra.mxu0 %v67_v47 }
  0x46   :  { %228 = vmatprep.mubr.f32.mxu0 %v70_v48 }
  0x49   :  { %229 = vmatmul.mubr.f32.gmra.mxu0 %v69_v49 }
  0x4a   :  { %233 = vmatprep.mubr.f32.mxu0 %v72_v50 }
  0x4d   :  { %234 = vmatmul.mubr.f32.gmra.mxu0 %v71_v51 }
  0x4e   :  { %238 = vmatprep.mubr.f32.mxu0 %v74_v52 }
  0x51   :  { %239 = vmatmul.mubr.f32.gmra.mxu0 %v73_v53 }
  0x52   :  { %243 = vmatprep.mubr.f32.mxu0 %v76_v54 }
  0x55   :  { %244 = vmatmul.mubr.f32.gmra.mxu0 %v75_v55 }
  0x56   :  { %248 = vmatprep.mubr.f32.mxu0 %v78_v56 }
  0x59   :  { %249 = vmatmul.mubr.f32.gmra.mxu0 %v77_v57 }
  0x5a   :  { %253 = vmatprep.mubr.f32.mxu0 %v80_v58 }
  0x5d   :  { %254 = vmatmul.mubr.f32.gmra.mxu0 %v79_v59 }
  0x5e   :  { %258 = vmatprep.mubr.f32.mxu0 %v82_v60 }
  0x61   :  { %259 = vmatmul.mubr.f32.gmra.mxu0 %v81_v61 }
  0x62   :  { %263 = vmatprep.mubr.f32.mxu0 %v84_v62 }
  0x65   :  { %264 = vmatmul.mubr.f32.gmra.mxu0 %v83_v63 }
  0xe9   :  { %v6543_v5 = vpop.f32.mrf.mxu0 }
  0xeb   :  { %v6544_v7 = vpop.f32.mrf.mxu0 }
  0xec   :  { %v6545_v8 = vadd.f32 %v6544_v7, %v6543_v5 }
  0xed   :  { %v6546_v9 = vpop.f32.mrf.mxu0 }
  0xee   :  { %v191_v10 = vadd.f32 %v6545_v8, %v9245_v6 }
  0xef   :  { %v6547_v11 = vpop.f32.mrf.mxu0 }
  0xf0   :  { %v9248_v12 = vmax.f32 %v191_v10, 0.0  ;;  %v6548_v13 = vadd.f32 %v6547_v11, %v6546_v9 }
  0xf1   :  { %v6549_v14 = vpop.f32.mrf.mxu0 }
  0xf2   :  { %v196_v15 = vadd.f32 %v6548_v13, %v9245_v6  ;;  %7445 = vmatprep.mubr.msk.f32.mxu1 %vm292_vm0, %v9248_v12 }
  0xf3   :  { %v6550_v16 = vpop.f32.mrf.mxu0 }
  0xf4   :  { %v9253_v17 = vmax.f32 %v196_v15, 0.0  ;;  %v6551_v18 = vadd.f32 %v6550_v16, %v6549_v14 }
  0xf5   :  { %v6552_v19 = vpop.f32.mrf.mxu0 }
  0xf6   :  { %v201_v21 = vadd.f32 %v6551_v18, %v9245_v6  ;;  %7446 = vmatmul.mubr.msk.f32.vlgmr.msra.gmra.mxu1 %vm292_vm0, %v9253_v17 }
  0xf7   :  { %v6553_v22 = vpop.f32.mrf.mxu0  ;;  %7470 = vmatpush3.msra.mxu1 %v493_v4 }
  0xf8   :  { %v9264_v24 = vmax.f32 %v201_v21, 0.0  ;;  %v6554_v25 = vadd.f32 %v6553_v22, %v6552_v19  ;;  %7471 = vmatprep.subr.mxu1 %v492_v20 }
  0xf9   :  { %v6555_v26 = vpop.f32.mrf.mxu0  ;;  %7472 = vmatpush3.msra.mxu1 %v492_v20 }
  0xfa   :  { %v206_v28 = vadd.f32 %v6554_v25, %v9245_v6  ;;  %7448 = vmatprep.mubr.msk.f32.mxu1 %vm292_vm0, %v9264_v24  ;;  %7473 = vmatprep.subr.mxu1 %v491_v23 }
  0xfb   :  { %v6556_v29 = vpop.f32.mrf.mxu0  ;;  %7474 = vmatpush3.msra.mxu1 %v491_v23 }
  0xfc   :  { %v9272_v30 = vmax.f32 %v206_v28, 0.0  ;;  %v6557_v31 = vadd.f32 %v6556_v29, %v6555_v26  ;;  %7475 = vmatprep.subr.mxu1 %v490_v27 }
  0xfd   :  { %v6558_v32 = vpop.f32.mrf.mxu0  ;;  %7476 = vmatpush3.msra.mxu1 %v490_v27 }
  0xfe   :  { %v211_v33 = vadd.f32 %v6557_v31, %v9245_v6  ;;  %7449 = vmatmul.mubr.msk.f32.gmra.mxu1 %vm292_vm0, %v9272_v30 }
  0xff   :  { %v6559_v34 = vpop.f32.mrf.mxu0 }
 0x100   :  { %v9277_v35 = vmax.f32 %v211_v33, 0.0  ;;  %v6560_v36 = vadd.f32 %v6559_v34, %v6558_v32 }
 0x101   :  { %v6561_v37 = vpop.f32.mrf.mxu0 }
 0x102   :  { %v216_v38 = vadd.f32 %v6560_v36, %v9245_v6  ;;  %7451 = vmatprep.mubr.msk.f32.mxu1 %vm292_vm0, %v9277_v35 }
 0x103   :  { %v6562_v39 = vpop.f32.mrf.mxu0 }
 0x104   :  { %v9282_v40 = vmax.f32 %v216_v38, 0.0  ;;  %v6563_v41 = vadd.f32 %v6562_v39, %v6561_v37 }
 0x105   :  { %v6564_v42 = vpop.f32.mrf.mxu0 }
 0x106   :  { %v221_v43 = vadd.f32 %v6563_v41, %v9245_v6  ;;  %7452 = vmatmul.mubr.msk.f32.gmra.mxu1 %vm292_vm0, %v9282_v40 }
 0x107   :  { %v6565_v44 = vpop.f32.mrf.mxu0 }
 0x108   :  { %v9287_v45 = vmax.f32 %v221_v43, 0.0  ;;  %v6566_v46 = vadd.f32 %v6565_v44, %v6564_v42 }
 0x109   :  { %v6567_v47 = vpop.f32.mrf.mxu0 }
 0x10a   :  { %v226_v48 = vadd.f32 %v6566_v46, %v9245_v6  ;;  %7454 = vmatprep.mubr.msk.f32.mxu1 %vm292_vm0, %v9287_v45 }
 0x10b   :  { %v6568_v49 = vpop.f32.mrf.mxu0 }
 0x10c   :  { %v9292_v50 = vmax.f32 %v226_v48, 0.0  ;;  %v6569_v51 = vadd.f32 %v6568_v49, %v6567_v47 }
 0x10d   :  { %v6570_v52 = vpop.f32.mrf.mxu0 }
 0x10e   :  { %v231_v53 = vadd.f32 %v6569_v51, %v9245_v6  ;;  %7455 = vmatmul.mubr.msk.f32.gmra.mxu1 %vm292_vm0, %v9292_v50 }
 0x10f   :  { %v6571_v54 = vpop.f32.mrf.mxu0 }
 0x110   :  { %v9297_v55 = vmax.f32 %v231_v53, 0.0  ;;  %v6572_v56 = vadd.f32 %v6571_v54, %v6570_v52 }
 0x111   :  { %v6573_v57 = vpop.f32.mrf.mxu0 }
 0x112   :  { %v236_v58 = vadd.f32 %v6572_v56, %v9245_v6  ;;  %7457 = vmatprep.mubr.msk.f32.mxu1 %vm292_vm0, %v9297_v55 }
 0x113   :  { %v6574_v59 = vpop.f32.mrf.mxu0 }
 0x114   :  { %v9302_v60 = vmax.f32 %v236_v58, 0.0  ;;  %v6575_v61 = vadd.f32 %v6574_v59, %v6573_v57 }
 0x115   :  { %v6576_v62 = vpop.f32.mrf.mxu0 }
 0x116   :  { %v241_v63 = vadd.f32 %v6575_v61, %v9245_v6  ;;  %7458 = vmatmul.mubr.msk.f32.gmra.mxu1 %vm292_vm0, %v9302_v60 }
 0x117   :  { %v6577_v0 = vpop.f32.mrf.mxu0 }
 0x118   :  { %v9307_v1 = vmax.f32 %v241_v63, 0.0  ;;  %v6578_v2 = vadd.f32 %v6577_v0, %v6576_v62 }
 0x119   :  { %v6579_v3 = vpop.f32.mrf.mxu0 }
 0x11a   :  { %v246_v4 = vadd.f32 %v6578_v2, %v9245_v6  ;;  %7460 = vmatprep.mubr.msk.f32.mxu1 %vm292_vm0, %v9307_v1  ;;  %v285_v2 = vld [vmem:[%s11644_s3] sm:$0xff] }
 0x11b   :  { %v6580_v5 = vpop.f32.mrf.mxu0 }
 0x11c   :  { %v9312_v7 = vmax.f32 %v246_v4, 0.0  ;;  %v6581_v8 = vadd.f32 %v6580_v5, %v6579_v3  ;;  %v1042_v3 = vld [vmem:[%s11642_s4 + $0x78] sm:$0xff] }
 0x11d   :  { %v6582_v9 = vpop.f32.mrf.mxu0 }
 0x11e   :  { %v251_v10 = vadd.f32 %v6581_v8, %v9245_v6  ;;  %7461 = vmatmul.mubr.msk.f32.gmra.mxu1 %vm292_vm0, %v9312_v7  ;;  %v1041_v8 = vld [vmem:[%s11642_s4 + $0x70] sm:$0xff] }
 0x11f   :  { %v6583_v11 = vpop.f32.mrf.mxu0 }
 0x120   :  { %v9317_v13 = vmax.f32 %v251_v10, 0.0  ;;  %v6584_v14 = vadd.f32 %v6583_v11, %v6582_v9  ;;  %v286_v9 = vld [vmem:[%s11644_s3 + $0x8] sm:$0xff] }
 0x121   :  { %v6585_v15 = vpop.f32.mrf.mxu0  ;;  %v1040_v11 = vld [vmem:[%s11642_s4 + $0x68] sm:$0xff] }
 0x122   :  { %v256_v16 = vadd.f32 %v6584_v14, %v9245_v6  ;;  %7463 = vmatprep.mubr.msk.f32.mxu1 %vm292_vm0, %v9317_v13  ;;  %v287_v14 = vld [vmem:[%s11644_s3 + $0x10] sm:$0x3] }
 0x123   :  { %v6586_v18 = vpop.f32.mrf.mxu0 }
 0x124   :  { %v9322_v19 = vmax.f32 %v256_v16, 0.0  ;;  %v6587_v20 = vadd.f32 %v6586_v18, %v6585_v15  ;;  %v1039_v15 = vld [vmem:[%s11642_s4 + $0x60] sm:$0xff]  ;;  %v6167_v16 = vld [vmem:[%s11644_s3 + $0x18] sm:$0xff] }
 0x125   :  { %v6588_v21 = vpop.f32.mrf.mxu0  ;;  %v806_v18 = vld [vmem:[%s11642_s4 + $0x58] sm:$0xff] }
 0x126   :  { %v261_v22 = vadd.f32 %v6587_v20, %v9245_v6  ;;  %7464 = vmatmul.mubr.msk.f32.gmra.mxu1 %vm292_vm0, %v9322_v19  ;;  %v805_v20 = vld [vmem:[%s11642_s4 + $0x50] sm:$0xff] }
 0x127   :  { %v6589_v23 = vpop.f32.mrf.mxu0 }
 0x128   :  { %v9327_v25 = vmax.f32 %v261_v22, 0.0  ;;  %v6590_v26 = vadd.f32 %v6589_v23, %v6588_v21  ;;  %v6168_v21 = vld [vmem:[%s11644_s3 + $0x20] sm:$0xff]  ;;  %v804_v22 = vld [vmem:[%s11642_s4 + $0x48] sm:$0xff] }
 0x129   :  { %v6169_v23 = vld [vmem:[%s11644_s3 + $0x28] sm:$0x3] }
 0x12a   :  { %v266_v27 = vadd.f32 %v6590_v26, %v9245_v6  ;;  %7466 = vmatprep.mubr.msk.f32.mxu1 %vm292_vm0, %v9327_v25  ;;  %v8948_v6 = vmov 0.0   ;;  %v803_v26 = vld [vmem:[%s11642_s4 + $0x40] sm:$0xff] }
 0x12b   :  { %7542 = vmatprep.subr.mxu0 %v8948_v6  ;;  %7501 = vmatprep.subr.mxu1 %v8948_v6 }
 0x12c   :  { %v9332_v28 = vmax.f32 %v266_v27, 0.0  ;;  %7574 = vmatprep.mubr.msk.f32.mxu0 %vm8949_vm1, %v8948_v6 }
 0x12e   :  { %7467 = vmatmul.mubr.msk.f32.gmra.mxu1 %vm292_vm0, %v9332_v28 }
 0x12f   :  { %7477 = vmatprep.mubr.msk.f32.mxu1 %vm292_vm0, %v9248_v12 }
 0x132   :  { %7478 = vmatmul.mubr.msk.f32.vlgmr.msra.gmra.mxu1 %vm292_vm0, %v9253_v17 }
 0x133   :  { %7480 = vmatprep.mubr.msk.f32.mxu1 %vm292_vm0, %v9264_v24 }
 0x136   :  { %7481 = vmatmul.mubr.msk.f32.gmra.mxu1 %vm292_vm0, %v9272_v30 }
 0x137   :  { %7483 = vmatprep.mubr.msk.f32.mxu1 %vm292_vm0, %v9277_v35 }
 0x13a   :  { %7484 = vmatmul.mubr.msk.f32.gmra.mxu1 %vm292_vm0, %v9282_v40 }
 0x13b   :  { %7486 = vmatprep.mubr.msk.f32.mxu1 %vm292_vm0, %v9287_v45 }
 0x13e   :  { %7487 = vmatmul.mubr.msk.f32.gmra.mxu1 %vm292_vm0, %v9292_v50 }
 0x13f   :  { %7489 = vmatprep.mubr.msk.f32.mxu1 %vm292_vm0, %v9297_v55 }
 0x142   :  { %7490 = vmatmul.mubr.msk.f32.gmra.mxu1 %vm292_vm0, %v9302_v60 }
 0x143   :  { %7492 = vmatprep.mubr.msk.f32.mxu1 %vm292_vm0, %v9307_v1 }
 0x146   :  { %7493 = vmatmul.mubr.msk.f32.gmra.mxu1 %vm292_vm0, %v9312_v7 }
 0x147   :  { %7495 = vmatprep.mubr.msk.f32.mxu1 %vm292_vm0, %v9317_v13 }
 0x14a   :  { %7496 = vmatmul.mubr.msk.f32.gmra.mxu1 %vm292_vm0, %v9322_v19 }
 0x14b   :  { %7498 = vmatprep.mubr.msk.f32.mxu1 %vm292_vm0, %v9327_v25 }
 0x14e   :  { %7499 = vmatmul.mubr.msk.f32.gmra.mxu1 %vm292_vm0, %v9332_v28 }
 0x14f   :  { %7533 = vmatprep.mubr.msk.f32.mxu1 %vm8949_vm1, %v8948_v6 }
 0x1b6   :  { %v7447_v29 = vpop.f32.mrf.mxu1 }
 0x1b8   :  { %v407_v31 = vpop.f32.mrf.mxu1 }
 0x1be   :  { %v7450_v32 = vpop.f32.mrf.mxu1 }
 0x1c0   :  { %v417_v33 = vpop.f32.mrf.mxu1 }
 0x1c6   :  { %v7453_v34 = vpop.f32.mrf.mxu1 }
 0x1c8   :  { %v427_v36 = vpop.f32.mrf.mxu1 }
 0x1ce   :  { %v7456_v37 = vpop.f32.mrf.mxu1 }
 0x1d0   :  { %v437_v38 = vpop.f32.mrf.mxu1 }
 0x1d6   :  { %v7459_v39 = vpop.f32.mrf.mxu1 }
 0x1d8   :  { %v447_v41 = vpop.f32.mrf.mxu1 }
 0x1de   :  { %v7462_v42 = vpop.f32.mrf.mxu1 }
 0x1e0   :  { %v457_v43 = vpop.f32.mrf.mxu1 }
 0x1e6   :  { %v7465_v44 = vpop.f32.mrf.mxu1 }
 0x1e8   :  { %v467_v46 = vpop.f32.mrf.mxu1 }
 0x1ee   :  { %v7468_v47 = vpop.f32.mrf.mxu1 }
 0x1ef   :  { %7543 = vmatpush3.msra.mxu0 %v7468_v47 }
 0x1f0   :  { %v477_v48 = vpop.f32.mrf.mxu1  ;;  %7544 = vmatprep.subr.mxu0 %v8948_v6 }
 0x1f1   :  { %7545 = vmatpush3.msra.mxu0 %v477_v48 }
 0x1f2   :  { %v9375_v49 = vpop.f32.mrf.mxu1  ;;  %7546 = vmatprep.subr.mxu0 %v8948_v6 }
 0x1f3   :  { %7547 = vmatpush3.msra.mxu0 %v7465_v44 }
 0x1f4   :  { %v9378_v51 = vpop.f32.mrf.mxu1  ;;  %7548 = vmatprep.subr.mxu0 %v8948_v6 }
 0x1f5   :  { %7549 = vmatpush3.msra.mxu0 %v467_v46 }
 0x1f6   :  { %v9381_v52 = vpop.f32.mrf.mxu1  ;;  %7550 = vmatprep.subr.mxu0 %v8948_v6 }
 0x1f7   :  { %7551 = vmatpush3.msra.mxu0 %v7462_v42 }
 0x1f8   :  { %v9384_v53 = vpop.f32.mrf.mxu1  ;;  %7552 = vmatprep.subr.mxu0 %v8948_v6 }
 0x1f9   :  { %7553 = vmatpush3.msra.mxu0 %v457_v43 }
 0x1fa   :  { %v9387_v54 = vpop.f32.mrf.mxu1  ;;  %7554 = vmatprep.subr.mxu0 %v8948_v6 }
 0x1fb   :  { %7555 = vmatpush3.msra.mxu0 %v7459_v39 }
 0x1fc   :  { %v9390_v56 = vpop.f32.mrf.mxu1  ;;  %7556 = vmatprep.subr.mxu0 %v8948_v6 }
 0x1fd   :  { %7557 = vmatpush3.msra.mxu0 %v447_v41 }
 0x1fe   :  { %v9393_v57 = vpop.f32.mrf.mxu1  ;;  %7558 = vmatprep.subr.mxu0 %v8948_v6 }
 0x1ff   :  { %7559 = vmatpush3.msra.mxu0 %v7456_v37 }
 0x200   :  { %v9396_v58 = vpop.f32.mrf.mxu1  ;;  %7560 = vmatprep.subr.mxu0 %v8948_v6 }
 0x201   :  { %7561 = vmatpush3.msra.mxu0 %v437_v38 }
 0x202   :  { %v7491_v59 = vpop.f32.mrf.mxu1  ;;  %7562 = vmatprep.subr.mxu0 %v8948_v6 }
 0x203   :  { %7563 = vmatpush3.msra.mxu0 %v7453_v34 }
 0x204   :  { %v600_v61 = vpop.f32.mrf.mxu1  ;;  %7564 = vmatprep.subr.mxu0 %v8948_v6 }
 0x205   :  { %7565 = vmatpush3.msra.mxu0 %v427_v36 }
 0x206   :  { %v7494_v62 = vpop.f32.mrf.mxu1  ;;  %7566 = vmatprep.subr.mxu0 %v8948_v6 }
 0x207   :  { %7567 = vmatpush3.msra.mxu0 %v7450_v32 }
 0x208   :  { %v610_v63 = vpop.f32.mrf.mxu1  ;;  %7568 = vmatprep.subr.mxu0 %v8948_v6 }
 0x209   :  { %7569 = vmatpush3.msra.mxu0 %v417_v33 }
 0x20a   :  { %v7497_v0 = vpop.f32.mrf.mxu1  ;;  %7570 = vmatprep.subr.mxu0 %v8948_v6 }
 0x20b   :  { %7571 = vmatpush3.msra.mxu0 %v7447_v29 }
 0x20c   :  { %v620_v4 = vpop.f32.mrf.mxu1  ;;  %7572 = vmatprep.subr.mxu0 %v8948_v6 }
 0x20d   :  { %7573 = vmatpush3.msra.mxu0 %v407_v31 }
 0x20e   :  { %v7500_v5 = vpop.f32.mrf.mxu1  ;;  %7575 = vmatmul.mubr.f32.vlgmr.msra.gmra.mxu0 %v285_v2  ;;  %7656 = vmatprep.subr.mxu0 %v1042_v3 }
 0x20f   :  { %7502 = vmatpush3.msra.mxu1 %v7500_v5  ;;  %7577 = vmatprep.mubr.msk.f32.mxu0 %vm8949_vm1, %v8948_v6 }
 0x210   :  { %v630_v10 = vpop.f32.mrf.mxu1  ;;  %7503 = vmatprep.subr.mxu1 %v8948_v6  ;;  %7657 = vmatpush3.msra.mxu0 %v1042_v3 }
 0x211   :  { %7504 = vmatpush3.msra.mxu1 %v630_v10  ;;  %7658 = vmatprep.subr.mxu0 %v1041_v8 }
 0x212   :  { %7505 = vmatprep.subr.mxu1 %v8948_v6  ;;  %7578 = vmatmul.mubr.f32.gmra.mxu0 %v286_v9 }
 0x213   :  { %7506 = vmatpush3.msra.mxu1 %v7497_v0  ;;  %7580 = vmatprep.mubr.msk.f32.mxu0 %vm8949_vm1, %v8948_v6 }
 0x214   :  { %7507 = vmatprep.subr.mxu1 %v8948_v6  ;;  %7659 = vmatpush3.msra.mxu0 %v1041_v8 }
 0x215   :  { %7508 = vmatpush3.msra.mxu1 %v620_v4  ;;  %7660 = vmatprep.subr.mxu0 %v1040_v11 }
 0x216   :  { %7509 = vmatprep.subr.mxu1 %v8948_v6  ;;  %7581 = vmatmul.mubr.f32.gmra.mxu0 %v287_v14 }
 0x217   :  { %7510 = vmatpush3.msra.mxu1 %v7494_v62  ;;  %7661 = vmatpush3.msra.mxu0 %v1040_v11 }
 0x218   :  { %7664 = vmatprep.mubr.msk.f32.mxu0 %vm292_vm0, %v9248_v12  ;;  %7511 = vmatprep.subr.mxu1 %v8948_v6 }
 0x219   :  { %7662 = vmatprep.subr.mxu0 %v1039_v15  ;;  %7512 = vmatpush3.msra.mxu1 %v610_v63 }
 0x21a   :  { %7663 = vmatpush3.msra.mxu0 %v1039_v15  ;;  %7513 = vmatprep.subr.mxu1 %v8948_v6 }
 0x21b   :  { %7665 = vmatmul.mubr.msk.f32.vlgmr.msra.gmra.mxu0 %vm292_vm0, %v9253_v17  ;;  %7514 = vmatpush3.msra.mxu1 %v7491_v59 }
 0x21c   :  { %7667 = vmatprep.mubr.msk.f32.mxu0 %vm292_vm0, %v9264_v24  ;;  %7515 = vmatprep.subr.mxu1 %v8948_v6 }
 0x21d   :  { %7516 = vmatpush3.msra.mxu1 %v600_v61  ;;  %7688 = vmatprep.subr.mxu0 %v8948_v6 }
 0x21e   :  { %7517 = vmatprep.subr.mxu1 %v8948_v6 }
 0x21f   :  { %7668 = vmatmul.mubr.msk.f32.gmra.mxu0 %vm292_vm0, %v9272_v30  ;;  %7518 = vmatpush3.msra.mxu1 %v9393_v57 }
 0x220   :  { %7670 = vmatprep.mubr.msk.f32.mxu0 %vm292_vm0, %v9277_v35  ;;  %7519 = vmatprep.subr.mxu1 %v8948_v6 }
 0x221   :  { %7520 = vmatpush3.msra.mxu1 %v9396_v58 }
 0x222   :  { %7521 = vmatprep.subr.mxu1 %v8948_v6 }
 0x223   :  { %7671 = vmatmul.mubr.msk.f32.gmra.mxu0 %vm292_vm0, %v9282_v40  ;;  %7522 = vmatpush3.msra.mxu1 %v9387_v54 }
 0x224   :  { %7673 = vmatprep.mubr.msk.f32.mxu0 %vm292_vm0, %v9287_v45  ;;  %7523 = vmatprep.subr.mxu1 %v8948_v6 }
 0x225   :  { %7524 = vmatpush3.msra.mxu1 %v9390_v56 }
 0x226   :  { %7525 = vmatprep.subr.mxu1 %v8948_v6 }
 0x227   :  { %7674 = vmatmul.mubr.msk.f32.gmra.mxu0 %vm292_vm0, %v9292_v50  ;;  %7526 = vmatpush3.msra.mxu1 %v9381_v52 }
 0x228   :  { %7676 = vmatprep.mubr.msk.f32.mxu0 %vm292_vm0, %v9297_v55  ;;  %7527 = vmatprep.subr.mxu1 %v8948_v6 }
 0x229   :  { %7528 = vmatpush3.msra.mxu1 %v9384_v53 }
 0x22a   :  { %7529 = vmatprep.subr.mxu1 %v8948_v6 }
 0x22b   :  { %7677 = vmatmul.mubr.msk.f32.gmra.mxu0 %vm292_vm0, %v9302_v60  ;;  %7530 = vmatpush3.msra.mxu1 %v9375_v49 }
 0x22c   :  { %7679 = vmatprep.mubr.msk.f32.mxu0 %vm292_vm0, %v9307_v1  ;;  %7531 = vmatprep.subr.mxu1 %v8948_v6 }
 0x22d   :  { %7532 = vmatpush3.msra.mxu1 %v9378_v51 }
 0x22e   :  { %7534 = vmatmul.mubr.f32.vlgmr.msra.gmra.mxu1 %v6167_v16  ;;  %7583 = vmatprep.subr.mxu1 %v806_v18 }
 0x22f   :  { %7680 = vmatmul.mubr.msk.f32.gmra.mxu0 %vm292_vm0, %v9312_v7  ;;  %7536 = vmatprep.mubr.msk.f32.mxu1 %vm8949_vm1, %v8948_v6 }
 0x230   :  { %7682 = vmatprep.mubr.msk.f32.mxu0 %vm292_vm0, %v9317_v13  ;;  %7584 = vmatpush3.msra.mxu1 %v806_v18 }
 0x231   :  { %7585 = vmatprep.subr.mxu1 %v805_v20 }
 0x232   :  { %7537 = vmatmul.mubr.f32.gmra.mxu1 %v6168_v21 }
 0x233   :  { %7683 = vmatmul.mubr.msk.f32.gmra.mxu0 %vm292_vm0, %v9322_v19  ;;  %7539 = vmatprep.mubr.msk.f32.mxu1 %vm8949_vm1, %v8948_v6 }
 0x234   :  { %7685 = vmatprep.mubr.msk.f32.mxu0 %vm292_vm0, %v9327_v25  ;;  %7586 = vmatpush3.msra.mxu1 %v805_v20 }
 0x235   :  { %7587 = vmatprep.subr.mxu1 %v804_v22 }
 0x236   :  { %7540 = vmatmul.mubr.f32.gmra.mxu1 %v6169_v23  ;;  %v6205_v23 = vld [vmem:[%s11644_s3 + $0x48] sm:$0xff] }
 0x237   :  { %7686 = vmatmul.mubr.msk.f32.gmra.mxu0 %vm292_vm0, %v9332_v28  ;;  %7588 = vmatpush3.msra.mxu1 %v804_v22 }
 0x238   :  { %7591 = vmatprep.mubr.msk.f32.mxu1 %vm292_vm0, %v9248_v12  ;;  %7589 = vmatprep.subr.mxu1 %v803_v26 }
 0x239   :  { %7590 = vmatpush3.msra.mxu1 %v803_v26  ;;  %7720 = vmatprep.mubr.msk.f32.mxu0 %vm8949_vm1, %v8948_v6 }
 0x23a   :  { %7592 = vmatmul.mubr.msk.f32.vlgmr.msra.gmra.mxu1 %vm292_vm0, %v9253_v17  ;;  %7615 = vmatprep.subr.mxu1 %v8948_v6 }
 0x23b   :  { %7594 = vmatprep.mubr.msk.f32.mxu1 %vm292_vm0, %v9264_v24 }
 0x23e   :  { %7595 = vmatmul.mubr.msk.f32.gmra.mxu1 %vm292_vm0, %v9272_v30 }
 0x23f   :  { %7597 = vmatprep.mubr.msk.f32.mxu1 %vm292_vm0, %v9277_v35 }
 0x242   :  { %7598 = vmatmul.mubr.msk.f32.gmra.mxu1 %vm292_vm0, %v9282_v40 }
 0x243   :  { %7600 = vmatprep.mubr.msk.f32.mxu1 %vm292_vm0, %v9287_v45 }
 0x246   :  { %7601 = vmatmul.mubr.msk.f32.gmra.mxu1 %vm292_vm0, %v9292_v50 }
 0x247   :  { %7603 = vmatprep.mubr.msk.f32.mxu1 %vm292_vm0, %v9297_v55 }
 0x24a   :  { %7604 = vmatmul.mubr.msk.f32.gmra.mxu1 %vm292_vm0, %v9302_v60 }
 0x24b   :  { %7606 = vmatprep.mubr.msk.f32.mxu1 %vm292_vm0, %v9307_v1 }
 0x24e   :  { %7607 = vmatmul.mubr.msk.f32.gmra.mxu1 %vm292_vm0, %v9312_v7 }
 0x24f   :  { %7609 = vmatprep.mubr.msk.f32.mxu1 %vm292_vm0, %v9317_v13 }
 0x252   :  { %7610 = vmatmul.mubr.msk.f32.gmra.mxu1 %vm292_vm0, %v9322_v19 }
 0x253   :  { %7612 = vmatprep.mubr.msk.f32.mxu1 %vm292_vm0, %v9327_v25 }
 0x256   :  { %7613 = vmatmul.mubr.msk.f32.gmra.mxu1 %vm292_vm0, %v9332_v28 }
 0x257   :  { %7647 = vmatprep.mubr.msk.f32.mxu1 %vm8949_vm1, %v8948_v6 }
 0x2ce   :  { %v785_v27 = vpop.f32.mrf.mxu0 }
 0x2d0   :  { %v7576_v29 = vpop.f32.mrf.mxu0 }
 0x2d2   :  { %v790_v31 = vpop.f32.mrf.mxu0 }
 0x2d4   :  { %v7579_v32 = vpop.f32.mrf.mxu0 }
 0x2d5   :  { %v1513_v32 = vld [vmem:[%s11642_s4 + $0xb0] sm:$0xff] }
 0x2d6   :  { %v795_v33 = vpop.f32.mrf.mxu0 }
 0x2d8   :  { %v7582_v34 = vpop.f32.mrf.mxu0 }
 0x2d9   :  { %v1512_v34 = vld [vmem:[%s11642_s4 + $0xa8] sm:$0xff] }
 0x2db   :  { %v9548_v36 = vpop.f32.mrf.mxu0 }
 0x2dd   :  { %v9550_v37 = vpop.f32.mrf.mxu0 }
 0x2df   :  { %v7669_v38 = vpop.f32.mrf.mxu0 }
 0x2e1   :  { %v1119_v39 = vpop.f32.mrf.mxu0 }
 0x2e3   :  { %v7672_v41 = vpop.f32.mrf.mxu0 }
 0x2e5   :  { %v1129_v42 = vpop.f32.mrf.mxu0 }
 0x2e7   :  { %v7675_v43 = vpop.f32.mrf.mxu0 }
 0x2e9   :  { %v1139_v44 = vpop.f32.mrf.mxu0 }
 0x2eb   :  { %v7678_v46 = vpop.f32.mrf.mxu0 }
 0x2ed   :  { %v1149_v47 = vpop.f32.mrf.mxu0 }
 0x2ee   :  { %v705_v48 = vpop.f32.mrf.mxu1 }
 0x2ef   :  { %v9552_v49 = vadd.f32 %v785_v27, %v705_v48  ;;  %v7681_v51 = vpop.f32.mrf.mxu0  ;;  %v1514_v27 = vld [vmem:[%s11642_s4 + $0xb8] sm:$0xff] }
 0x2f0   :  { %v7535_v52 = vpop.f32.mrf.mxu1 }
 0x2f1   :  { %v1159_v53 = vpop.f32.mrf.mxu0 }
 0x2f2   :  { %v710_v54 = vpop.f32.mrf.mxu1 }
 0x2f3   :  { %v9554_v56 = vadd.f32 %v790_v31, %v710_v54  ;;  %v7684_v57 = vpop.f32.mrf.mxu0  ;;  %v6206_v31 = vld [vmem:[%s11644_s3 + $0x50] sm:$0xff] }
 0x2f4   :  { %v7538_v58 = vpop.f32.mrf.mxu1 }
 0x2f5   :  { %v1169_v59 = vpop.f32.mrf.mxu0 }
 0x2f6   :  { %v715_v61 = vpop.f32.mrf.mxu1 }
 0x2f7   :  { %v9556_v62 = vadd.f32 %v795_v33, %v715_v61  ;;  %v7687_v63 = vpop.f32.mrf.mxu0  ;;  %v6207_v33 = vld [vmem:[%s11644_s3 + $0x58] sm:$0x3] }
 0x2f8   :  { %7689 = vmatpush3.msra.mxu0 %v7687_v63  ;;  %v7541_v0 = vpop.f32.mrf.mxu1 }
 0x2f9   :  { %v1179_v2 = vpop.f32.mrf.mxu0  ;;  %7690 = vmatprep.subr.mxu0 %v8948_v6 }
 0x2fa   :  { %7691 = vmatpush3.msra.mxu0 %v1179_v2  ;;  %v9559_v3 = vpop.f32.mrf.mxu1 }
 0x2fb   :  { %7692 = vmatprep.subr.mxu0 %v8948_v6 }
 0x2fc   :  { %7693 = vmatpush3.msra.mxu0 %v7684_v57  ;;  %v9562_v4 = vpop.f32.mrf.mxu1 }
 0x2fd   :  { %7694 = vmatprep.subr.mxu0 %v8948_v6 }
 0x2fe   :  { %7695 = vmatpush3.msra.mxu0 %v1169_v59  ;;  %v9565_v5 = vpop.f32.mrf.mxu1 }
 0x2ff   :  { %7696 = vmatprep.subr.mxu0 %v8948_v6 }
 0x300   :  { %7697 = vmatpush3.msra.mxu0 %v7681_v51  ;;  %v9568_v8 = vpop.f32.mrf.mxu1 }
 0x301   :  { %7698 = vmatprep.subr.mxu0 %v8948_v6 }
 0x302   :  { %7699 = vmatpush3.msra.mxu0 %v1159_v53  ;;  %v9571_v9 = vpop.f32.mrf.mxu1 }
 0x303   :  { %7700 = vmatprep.subr.mxu0 %v8948_v6 }
 0x304   :  { %7701 = vmatpush3.msra.mxu0 %v7678_v46  ;;  %v9574_v10 = vpop.f32.mrf.mxu1 }
 0x305   :  { %7702 = vmatprep.subr.mxu0 %v8948_v6 }
 0x306   :  { %7703 = vmatpush3.msra.mxu0 %v1149_v47  ;;  %v9577_v11 = vpop.f32.mrf.mxu1 }
 0x307   :  { %7704 = vmatprep.subr.mxu0 %v8948_v6 }
 0x308   :  { %7705 = vmatpush3.msra.mxu0 %v7675_v43  ;;  %v9580_v14 = vpop.f32.mrf.mxu1  ;;  %v6188_v43 = vld [vmem:[%s11644_s3 + $0x40] sm:$0x3] }
 0x309   :  { %7706 = vmatprep.subr.mxu0 %v8948_v6 }
 0x30a   :  { %7707 = vmatpush3.msra.mxu0 %v1139_v44  ;;  %v7605_v15 = vpop.f32.mrf.mxu1  ;;  %v1275_v44 = vld [vmem:[%s11642_s4 + $0x80] sm:$0xff] }
 0x30b   :  { %7708 = vmatprep.subr.mxu0 %v8948_v6 }
 0x30c   :  { %7709 = vmatpush3.msra.mxu0 %v7672_v41  ;;  %v913_v16 = vpop.f32.mrf.mxu1  ;;  %v6187_v41 = vld [vmem:[%s11644_s3 + $0x38] sm:$0xff] }
 0x30d   :  { %7710 = vmatprep.subr.mxu0 %v8948_v6 }
 0x30e   :  { %7711 = vmatpush3.msra.mxu0 %v1129_v42  ;;  %v7608_v18 = vpop.f32.mrf.mxu1  ;;  %v1276_v42 = vld [vmem:[%s11642_s4 + $0x88] sm:$0xff] }
 0x30f   :  { %7712 = vmatprep.subr.mxu0 %v8948_v6 }
 0x310   :  { %7713 = vmatpush3.msra.mxu0 %v7669_v38  ;;  %v923_v20 = vpop.f32.mrf.mxu1  ;;  %v1278_v38 = vld [vmem:[%s11642_s4 + $0x98] sm:$0xff] }
 0x311   :  { %7714 = vmatprep.subr.mxu0 %v8948_v6 }
 0x312   :  { %7715 = vmatpush3.msra.mxu0 %v1119_v39  ;;  %v7611_v21 = vpop.f32.mrf.mxu1  ;;  %v1277_v39 = vld [vmem:[%s11642_s4 + $0x90] sm:$0xff] }
 0x313   :  { %7716 = vmatprep.subr.mxu0 %v8948_v6 }
 0x314   :  { %7717 = vmatpush3.msra.mxu0 %v9548_v36  ;;  %v933_v22 = vpop.f32.mrf.mxu1  ;;  %v1511_v36 = vld [vmem:[%s11642_s4 + $0xa0] sm:$0xff] }
 0x315   :  { %7718 = vmatprep.subr.mxu0 %v8948_v6 }
 0x316   :  { %7719 = vmatpush3.msra.mxu0 %v9550_v37  ;;  %v7614_v26 = vpop.f32.mrf.mxu1  ;;  %v6186_v37 = vld [vmem:[%s11644_s3 + $0x30] sm:$0xff] }
 0x317   :  { %7721 = vmatmul.mubr.f32.vlgmr.msra.gmra.mxu0 %v6205_v23  ;;  %7616 = vmatpush3.msra.mxu1 %v7614_v26 }
 0x318   :  { %v943_v29 = vpop.f32.mrf.mxu1  ;;  %7617 = vmatprep.subr.mxu1 %v8948_v6  ;;  %7723 = vmatprep.mubr.msk.f32.mxu0 %vm8949_vm1, %v8948_v6 }
 0x319   :  { %7618 = vmatpush3.msra.mxu1 %v943_v29  ;;  %7802 = vmatprep.subr.mxu0 %v1514_v27 }
 0x31a   :  { %7619 = vmatprep.subr.mxu1 %v8948_v6  ;;  %7803 = vmatpush3.msra.mxu0 %v1514_v27 }
 0x31b   :  { %7724 = vmatmul.mubr.f32.gmra.mxu0 %v6206_v31  ;;  %7620 = vmatpush3.msra.mxu1 %v7611_v21 }
 0x31c   :  { %7621 = vmatprep.subr.mxu1 %v8948_v6  ;;  %7804 = vmatprep.subr.mxu0 %v1513_v32 }
 0x31d   :  { %7622 = vmatpush3.msra.mxu1 %v933_v22  ;;  %7726 = vmatprep.mubr.msk.f32.mxu0 %vm8949_vm1, %v8948_v6 }
 0x31e   :  { %7805 = vmatpush3.msra.mxu0 %v1513_v32  ;;  %7623 = vmatprep.subr.mxu1 %v8948_v6 }
 0x31f   :  { %7727 = vmatmul.mubr.f32.gmra.mxu0 %v6207_v33  ;;  %7806 = vmatprep.subr.mxu0 %v1512_v34 }
 0x320   :  { %7624 = vmatpush3.msra.mxu1 %v7608_v18  ;;  %7807 = vmatpush3.msra.mxu0 %v1512_v34 }
 0x321   :  { %7810 = vmatprep.mubr.msk.f32.mxu0 %vm292_vm0, %v9248_v12  ;;  %7625 = vmatprep.subr.mxu1 %v8948_v6 }
 0x322   :  { %7808 = vmatprep.subr.mxu0 %v1511_v36  ;;  %7626 = vmatpush3.msra.mxu1 %v923_v20 }
 0x323   :  { %7809 = vmatpush3.msra.mxu0 %v1511_v36  ;;  %7627 = vmatprep.subr.mxu1 %v8948_v6 }
 0x324   :  { %7811 = vmatmul.mubr.msk.f32.vlgmr.msra.gmra.mxu0 %vm292_vm0, %v9253_v17  ;;  %7628 = vmatpush3.msra.mxu1 %v7605_v15 }
 0x325   :  { %7813 = vmatprep.mubr.msk.f32.mxu0 %vm292_vm0, %v9264_v24  ;;  %7629 = vmatprep.subr.mxu1 %v8948_v6 }
 0x326   :  { %7630 = vmatpush3.msra.mxu1 %v913_v16  ;;  %7834 = vmatprep.subr.mxu0 %v8948_v6 }
 0x327   :  { %7631 = vmatprep.subr.mxu1 %v8948_v6 }
 0x328   :  { %7814 = vmatmul.mubr.msk.f32.gmra.mxu0 %vm292_vm0, %v9272_v30  ;;  %7632 = vmatpush3.msra.mxu1 %v9577_v11 }
 0x329   :  { %7816 = vmatprep.mubr.msk.f32.mxu0 %vm292_vm0, %v9277_v35  ;;  %7633 = vmatprep.subr.mxu1 %v8948_v6 }
 0x32a   :  { %7634 = vmatpush3.msra.mxu1 %v9580_v14 }
 0x32b   :  { %7635 = vmatprep.subr.mxu1 %v8948_v6 }
 0x32c   :  { %7817 = vmatmul.mubr.msk.f32.gmra.mxu0 %vm292_vm0, %v9282_v40  ;;  %7636 = vmatpush3.msra.mxu1 %v9571_v9 }
 0x32d   :  { %7819 = vmatprep.mubr.msk.f32.mxu0 %vm292_vm0, %v9287_v45  ;;  %7637 = vmatprep.subr.mxu1 %v8948_v6 }
 0x32e   :  { %7638 = vmatpush3.msra.mxu1 %v9574_v10 }
 0x32f   :  { %7639 = vmatprep.subr.mxu1 %v8948_v6 }
 0x330   :  { %7820 = vmatmul.mubr.msk.f32.gmra.mxu0 %vm292_vm0, %v9292_v50  ;;  %7640 = vmatpush3.msra.mxu1 %v9565_v5 }
 0x331   :  { %7822 = vmatprep.mubr.msk.f32.mxu0 %vm292_vm0, %v9297_v55  ;;  %7641 = vmatprep.subr.mxu1 %v8948_v6 }
 0x332   :  { %7642 = vmatpush3.msra.mxu1 %v9568_v8 }
 0x333   :  { %7643 = vmatprep.subr.mxu1 %v8948_v6 }
 0x334   :  { %7823 = vmatmul.mubr.msk.f32.gmra.mxu0 %vm292_vm0, %v9302_v60  ;;  %7644 = vmatpush3.msra.mxu1 %v9559_v3 }
 0x335   :  { %7825 = vmatprep.mubr.msk.f32.mxu0 %vm292_vm0, %v9307_v1  ;;  %7645 = vmatprep.subr.mxu1 %v8948_v6 }
 0x336   :  { %7646 = vmatpush3.msra.mxu1 %v9562_v4 }
 0x337   :  { %7648 = vmatmul.mubr.f32.vlgmr.msra.gmra.mxu1 %v6186_v37  ;;  %7729 = vmatprep.subr.mxu1 %v1278_v38 }
 0x338   :  { %7826 = vmatmul.mubr.msk.f32.gmra.mxu0 %vm292_vm0, %v9312_v7  ;;  %7650 = vmatprep.mubr.msk.f32.mxu1 %vm8949_vm1, %v8948_v6 }
 0x339   :  { %7828 = vmatprep.mubr.msk.f32.mxu0 %vm292_vm0, %v9317_v13  ;;  %7730 = vmatpush3.msra.mxu1 %v1278_v38 }
 0x33a   :  { %7731 = vmatprep.subr.mxu1 %v1277_v39 }
 0x33b   :  { %7651 = vmatmul.mubr.f32.gmra.mxu1 %v6187_v41 }
 0x33c   :  { %7829 = vmatmul.mubr.msk.f32.gmra.mxu0 %vm292_vm0, %v9322_v19  ;;  %7653 = vmatprep.mubr.msk.f32.mxu1 %vm8949_vm1, %v8948_v6 }
 0x33d   :  { %7831 = vmatprep.mubr.msk.f32.mxu0 %vm292_vm0, %v9327_v25  ;;  %7732 = vmatpush3.msra.mxu1 %v1277_v39 }
 0x33e   :  { %7733 = vmatprep.subr.mxu1 %v1276_v42 }
 0x33f   :  { %7654 = vmatmul.mubr.f32.gmra.mxu1 %v6188_v43 }
 0x340   :  { %7832 = vmatmul.mubr.msk.f32.gmra.mxu0 %vm292_vm0, %v9332_v28  ;;  %7734 = vmatpush3.msra.mxu1 %v1276_v42 }
 0x341   :  { %7737 = vmatprep.mubr.msk.f32.mxu1 %vm292_vm0, %v9248_v12  ;;  %7735 = vmatprep.subr.mxu1 %v1275_v44 }
 0x342   :  { %7736 = vmatpush3.msra.mxu1 %v1275_v44  ;;  %7866 = vmatprep.mubr.msk.f32.mxu0 %vm8949_vm1, %v8948_v6 }
 0x343   :  { %7738 = vmatmul.mubr.msk.f32.vlgmr.msra.gmra.mxu1 %vm292_vm0, %v9253_v17  ;;  %7761 = vmatprep.subr.mxu1 %v8948_v6 }
 0x344   :  { %7740 = vmatprep.mubr.msk.f32.mxu1 %vm292_vm0, %v9264_v24 }
 0x347   :  { %7741 = vmatmul.mubr.msk.f32.gmra.mxu1 %vm292_vm0, %v9272_v30 }
 0x348   :  { %7743 = vmatprep.mubr.msk.f32.mxu1 %vm292_vm0, %v9277_v35 }
 0x34b   :  { %7744 = vmatmul.mubr.msk.f32.gmra.mxu1 %vm292_vm0, %v9282_v40 }
 0x34c   :  { %7746 = vmatprep.mubr.msk.f32.mxu1 %vm292_vm0, %v9287_v45 }
 0x34f   :  { %7747 = vmatmul.mubr.msk.f32.gmra.mxu1 %vm292_vm0, %v9292_v50 }
 0x350   :  { %7749 = vmatprep.mubr.msk.f32.mxu1 %vm292_vm0, %v9297_v55 }
 0x353   :  { %7750 = vmatmul.mubr.msk.f32.gmra.mxu1 %vm292_vm0, %v9302_v60 }
 0x354   :  { %7752 = vmatprep.mubr.msk.f32.mxu1 %vm292_vm0, %v9307_v1 }
 0x357   :  { %7753 = vmatmul.mubr.msk.f32.gmra.mxu1 %vm292_vm0, %v9312_v7 }
 0x358   :  { %7755 = vmatprep.mubr.msk.f32.mxu1 %vm292_vm0, %v9317_v13 }
 0x35b   :  { %7756 = vmatmul.mubr.msk.f32.gmra.mxu1 %vm292_vm0, %v9322_v19 }
 0x35c   :  { %7758 = vmatprep.mubr.msk.f32.mxu1 %vm292_vm0, %v9327_v25 }
 0x35f   :  { %7759 = vmatmul.mubr.msk.f32.gmra.mxu1 %vm292_vm0, %v9332_v28 }
 0x360   :  { %7793 = vmatprep.mubr.msk.f32.mxu1 %vm8949_vm1, %v8948_v6 }
 0x3d7   :  { %v1254_v46 = vpop.f32.mrf.mxu0 }
 0x3d9   :  { %v7722_v47 = vpop.f32.mrf.mxu0 }
 0x3da   :  { %v6243_v47 = vld [vmem:[%s11644_s3 + $0x78] sm:$0xff] }
 0x3db   :  { %v1259_v48 = vpop.f32.mrf.mxu0 }
 0x3dd   :  { %v7725_v51 = vpop.f32.mrf.mxu0 }
 0x3de   :  { %v1986_v51 = vld [vmem:[%s11642_s4 + $0xf8] sm:$0xff] }
 0x3df   :  { %v1264_v52 = vpop.f32.mrf.mxu0 }
 0x3e1   :  { %v7728_v53 = vpop.f32.mrf.mxu0 }
 0x3e2   :  { %v6244_v53 = vld [vmem:[%s11644_s3 + $0x80] sm:$0xff] }
 0x3e4   :  { %v9734_v54 = vpop.f32.mrf.mxu0 }
 0x3e6   :  { %v9736_v57 = vpop.f32.mrf.mxu0 }
 0x3e8   :  { %v7815_v58 = vpop.f32.mrf.mxu0 }
 0x3ea   :  { %v1591_v59 = vpop.f32.mrf.mxu0 }
 0x3ec   :  { %v7818_v61 = vpop.f32.mrf.mxu0 }
 0x3ee   :  { %v1601_v63 = vpop.f32.mrf.mxu0 }
 0x3f0   :  { %v7821_v0 = vpop.f32.mrf.mxu0 }
 0x3f2   :  { %v1611_v2 = vpop.f32.mrf.mxu0 }
 0x3f4   :  { %v7824_v3 = vpop.f32.mrf.mxu0 }
 0x3f6   :  { %v1621_v4 = vpop.f32.mrf.mxu0 }
 0x3f7   :  { %v1018_v5 = vpop.f32.mrf.mxu1 }
 0x3f8   :  { %v1032_v8 = vadd.f32 %v1018_v5, %v9552_v49  ;;  %v7827_v9 = vpop.f32.mrf.mxu0  ;;  %v1747_v5 = vld [vmem:[%s11642_s4 + $0xc0] sm:$0xff] }
 0x3f9   :  { %v7649_v10 = vpop.f32.mrf.mxu1 }
 0x3fa   :  { %v1631_v11 = vpop.f32.mrf.mxu0  ;;  %v9739_v14 = vadd.f32 %v1254_v46, %v1032_v8 }
 0x3fb   :  { %v1023_v15 = vpop.f32.mrf.mxu1 }
 0x3fc   :  { %v1033_v16 = vadd.f32 %v1023_v15, %v9554_v56  ;;  %v7830_v18 = vpop.f32.mrf.mxu0 }
 0x3fd   :  { %v7652_v20 = vpop.f32.mrf.mxu1 }
 0x3fe   :  { %v1641_v21 = vpop.f32.mrf.mxu0  ;;  %v9742_v22 = vadd.f32 %v1259_v48, %v1033_v16 }
 0x3ff   :  { %v1028_v23 = vpop.f32.mrf.mxu1 }
 0x400   :  { %v1034_v26 = vadd.f32 %v1028_v23, %v9556_v62  ;;  %v7833_v27 = vpop.f32.mrf.mxu0 }
 0x401   :  { %7835 = vmatpush3.msra.mxu0 %v7833_v27  ;;  %v7655_v29 = vpop.f32.mrf.mxu1 }
 0x402   :  { %v1651_v49 = vpop.f32.mrf.mxu0  ;;  %7836 = vmatprep.subr.mxu0 %v8948_v6  ;;  %v9746_v31 = vadd.f32 %v1264_v52, %v1034_v26 }
 0x403   :  { %7837 = vmatpush3.msra.mxu0 %v1651_v49  ;;  %v9748_v32 = vpop.f32.mrf.mxu1 }
 0x404   :  { %7838 = vmatprep.subr.mxu0 %v8948_v6 }
 0x405   :  { %7839 = vmatpush3.msra.mxu0 %v7830_v18  ;;  %v9751_v56 = vpop.f32.mrf.mxu1 }
 0x406   :  { %7840 = vmatprep.subr.mxu0 %v8948_v6 }
 0x407   :  { %7841 = vmatpush3.msra.mxu0 %v1641_v21  ;;  %v9754_v62 = vpop.f32.mrf.mxu1 }
 0x408   :  { %7842 = vmatprep.subr.mxu0 %v8948_v6 }
 0x409   :  { %7843 = vmatpush3.msra.mxu0 %v7827_v9  ;;  %v9757_v33 = vpop.f32.mrf.mxu1 }
 0x40a   :  { %7844 = vmatprep.subr.mxu0 %v8948_v6 }
 0x40b   :  { %7845 = vmatpush3.msra.mxu0 %v1631_v11  ;;  %v9760_v34 = vpop.f32.mrf.mxu1 }
 0x40c   :  { %7846 = vmatprep.subr.mxu0 %v8948_v6 }
 0x40d   :  { %7847 = vmatpush3.msra.mxu0 %v7824_v3  ;;  %v9763_v36 = vpop.f32.mrf.mxu1  ;;  %v1748_v3 = vld [vmem:[%s11642_s4 + $0xc8] sm:$0xff] }
 0x40e   :  { %7848 = vmatprep.subr.mxu0 %v8948_v6 }
 0x40f   :  { %7849 = vmatpush3.msra.mxu0 %v1621_v4  ;;  %v9766_v37 = vpop.f32.mrf.mxu1  ;;  %v6226_v4 = vld [vmem:[%s11644_s3 + $0x70] sm:$0x3] }
 0x410   :  { %7850 = vmatprep.subr.mxu0 %v8948_v6 }
 0x411   :  { %7851 = vmatpush3.msra.mxu0 %v7821_v0  ;;  %v9769_v38 = vpop.f32.mrf.mxu1  ;;  %v1749_v0 = vld [vmem:[%s11642_s4 + $0xd0] sm:$0xff] }
 0x412   :  { %7852 = vmatprep.subr.mxu0 %v8948_v6 }
 0x413   :  { %7853 = vmatpush3.msra.mxu0 %v1611_v2  ;;  %v7751_v39 = vpop.f32.mrf.mxu1  ;;  %v6225_v2 = vld [vmem:[%s11644_s3 + $0x68] sm:$0xff] }
 0x414   :  { %7854 = vmatprep.subr.mxu0 %v8948_v6 }
 0x415   :  { %7855 = vmatpush3.msra.mxu0 %v7818_v61  ;;  %v1385_v41 = vpop.f32.mrf.mxu1  ;;  %v6224_v61 = vld [vmem:[%s11644_s3 + $0x60] sm:$0xff] }
 0x416   :  { %7856 = vmatprep.subr.mxu0 %v8948_v6 }
 0x417   :  { %7857 = vmatpush3.msra.mxu0 %v1601_v63  ;;  %v7754_v42 = vpop.f32.mrf.mxu1  ;;  %v1750_v63 = vld [vmem:[%s11642_s4 + $0xd8] sm:$0xff] }
 0x418   :  { %7858 = vmatprep.subr.mxu0 %v8948_v6 }
 0x419   :  { %7859 = vmatpush3.msra.mxu0 %v7815_v58  ;;  %v1395_v43 = vpop.f32.mrf.mxu1  ;;  %v1984_v58 = vld [vmem:[%s11642_s4 + $0xe8] sm:$0xff] }
 0x41a   :  { %7860 = vmatprep.subr.mxu0 %v8948_v6 }
 0x41b   :  { %7861 = vmatpush3.msra.mxu0 %v1591_v59  ;;  %v7757_v44 = vpop.f32.mrf.mxu1  ;;  %v1983_v59 = vld [vmem:[%s11642_s4 + $0xe0] sm:$0xff] }
 0x41c   :  { %7862 = vmatprep.subr.mxu0 %v8948_v6 }
 0x41d   :  { %7863 = vmatpush3.msra.mxu0 %v9734_v54  ;;  %v1405_v46 = vpop.f32.mrf.mxu1  ;;  %v1985_v54 = vld [vmem:[%s11642_s4 + $0xf0] sm:$0xff] }
 0x41e   :  { %7864 = vmatprep.subr.mxu0 %v8948_v6 }
 0x41f   :  { %7865 = vmatpush3.msra.mxu0 %v9736_v57  ;;  %v7760_v48 = vpop.f32.mrf.mxu1  ;;  %v6245_v57 = vld [vmem:[%s11644_s3 + $0x88] sm:$0x3] }
 0x420   :  { %7867 = vmatmul.mubr.f32.vlgmr.msra.gmra.mxu0 %v6243_v47  ;;  %7762 = vmatpush3.msra.mxu1 %v7760_v48 }
 0x421   :  { %v1415_v52 = vpop.f32.mrf.mxu1  ;;  %7763 = vmatprep.subr.mxu1 %v8948_v6  ;;  %7869 = vmatprep.mubr.msk.f32.mxu0 %vm8949_vm1, %v8948_v6 }
 0x422   :  { %7764 = vmatpush3.msra.mxu1 %v1415_v52  ;;  %7948 = vmatprep.subr.mxu0 %v1986_v51 }
 0x423   :  { %7765 = vmatprep.subr.mxu1 %v8948_v6  ;;  %7949 = vmatpush3.msra.mxu0 %v1986_v51 }
 0x424   :  { %7870 = vmatmul.mubr.f32.gmra.mxu0 %v6244_v53  ;;  %7766 = vmatpush3.msra.mxu1 %v7757_v44 }
 0x425   :  { %7767 = vmatprep.subr.mxu1 %v8948_v6  ;;  %7950 = vmatprep.subr.mxu0 %v1985_v54 }
 0x426   :  { %7768 = vmatpush3.msra.mxu1 %v1405_v46  ;;  %7872 = vmatprep.mubr.msk.f32.mxu0 %vm8949_vm1, %v8948_v6 }
 0x427   :  { %7951 = vmatpush3.msra.mxu0 %v1985_v54  ;;  %7769 = vmatprep.subr.mxu1 %v8948_v6 }
 0x428   :  { %7873 = vmatmul.mubr.f32.gmra.mxu0 %v6245_v57  ;;  %7952 = vmatprep.subr.mxu0 %v1984_v58 }
 0x429   :  { %7770 = vmatpush3.msra.mxu1 %v7754_v42  ;;  %7953 = vmatpush3.msra.mxu0 %v1984_v58 }
 0x42a   :  { %7956 = vmatprep.mubr.msk.f32.mxu0 %vm292_vm0, %v9248_v12  ;;  %7771 = vmatprep.subr.mxu1 %v8948_v6 }
 0x42b   :  { %7954 = vmatprep.subr.mxu0 %v1983_v59  ;;  %7772 = vmatpush3.msra.mxu1 %v1395_v43 }
 0x42c   :  { %7955 = vmatpush3.msra.mxu0 %v1983_v59  ;;  %7773 = vmatprep.subr.mxu1 %v8948_v6 }
 0x42d   :  { %7957 = vmatmul.mubr.msk.f32.vlgmr.msra.gmra.mxu0 %vm292_vm0, %v9253_v17  ;;  %7774 = vmatpush3.msra.mxu1 %v7751_v39 }
 0x42e   :  { %7959 = vmatprep.mubr.msk.f32.mxu0 %vm292_vm0, %v9264_v24  ;;  %7775 = vmatprep.subr.mxu1 %v8948_v6 }
 0x42f   :  { %7776 = vmatpush3.msra.mxu1 %v1385_v41  ;;  %7980 = vmatprep.subr.mxu0 %v8948_v6 }
 0x430   :  { %7777 = vmatprep.subr.mxu1 %v8948_v6 }
 0x431   :  { %7960 = vmatmul.mubr.msk.f32.gmra.mxu0 %vm292_vm0, %v9272_v30  ;;  %7778 = vmatpush3.msra.mxu1 %v9766_v37 }
 0x432   :  { %7962 = vmatprep.mubr.msk.f32.mxu0 %vm292_vm0, %v9277_v35  ;;  %7779 = vmatprep.subr.mxu1 %v8948_v6 }
 0x433   :  { %7780 = vmatpush3.msra.mxu1 %v9769_v38 }
 0x434   :  { %7781 = vmatprep.subr.mxu1 %v8948_v6 }
 0x435   :  { %7963 = vmatmul.mubr.msk.f32.gmra.mxu0 %vm292_vm0, %v9282_v40  ;;  %7782 = vmatpush3.msra.mxu1 %v9760_v34 }
 0x436   :  { %7965 = vmatprep.mubr.msk.f32.mxu0 %vm292_vm0, %v9287_v45  ;;  %7783 = vmatprep.subr.mxu1 %v8948_v6 }
 0x437   :  { %7784 = vmatpush3.msra.mxu1 %v9763_v36 }
 0x438   :  { %7785 = vmatprep.subr.mxu1 %v8948_v6 }
 0x439   :  { %7966 = vmatmul.mubr.msk.f32.gmra.mxu0 %vm292_vm0, %v9292_v50  ;;  %7786 = vmatpush3.msra.mxu1 %v9754_v62 }
 0x43a   :  { %7968 = vmatprep.mubr.msk.f32.mxu0 %vm292_vm0, %v9297_v55  ;;  %7787 = vmatprep.subr.mxu1 %v8948_v6 }
 0x43b   :  { %7788 = vmatpush3.msra.mxu1 %v9757_v33 }
 0x43c   :  { %7789 = vmatprep.subr.mxu1 %v8948_v6 }
 0x43d   :  { %7969 = vmatmul.mubr.msk.f32.gmra.mxu0 %vm292_vm0, %v9302_v60  ;;  %7790 = vmatpush3.msra.mxu1 %v9748_v32 }
 0x43e   :  { %7971 = vmatprep.mubr.msk.f32.mxu0 %vm292_vm0, %v9307_v1  ;;  %7791 = vmatprep.subr.mxu1 %v8948_v6 }
 0x43f   :  { %7792 = vmatpush3.msra.mxu1 %v9751_v56 }
 0x440   :  { %7794 = vmatmul.mubr.f32.vlgmr.msra.gmra.mxu1 %v6224_v61  ;;  %7875 = vmatprep.subr.mxu1 %v1750_v63 }
 0x441   :  { %7972 = vmatmul.mubr.msk.f32.gmra.mxu0 %vm292_vm0, %v9312_v7  ;;  %7796 = vmatprep.mubr.msk.f32.mxu1 %vm8949_vm1, %v8948_v6 }
 0x442   :  { %7974 = vmatprep.mubr.msk.f32.mxu0 %vm292_vm0, %v9317_v13  ;;  %7876 = vmatpush3.msra.mxu1 %v1750_v63 }
 0x443   :  { %7877 = vmatprep.subr.mxu1 %v1749_v0 }
 0x444   :  { %7797 = vmatmul.mubr.f32.gmra.mxu1 %v6225_v2 }
 0x445   :  { %7975 = vmatmul.mubr.msk.f32.gmra.mxu0 %vm292_vm0, %v9322_v19  ;;  %7799 = vmatprep.mubr.msk.f32.mxu1 %vm8949_vm1, %v8948_v6 }
 0x446   :  { %7977 = vmatprep.mubr.msk.f32.mxu0 %vm292_vm0, %v9327_v25  ;;  %7878 = vmatpush3.msra.mxu1 %v1749_v0 }
 0x447   :  { %7879 = vmatprep.subr.mxu1 %v1748_v3 }
 0x448   :  { %7800 = vmatmul.mubr.f32.gmra.mxu1 %v6226_v4 }
 0x449   :  { %7978 = vmatmul.mubr.msk.f32.gmra.mxu0 %vm292_vm0, %v9332_v28  ;;  %7880 = vmatpush3.msra.mxu1 %v1748_v3 }
 0x44a   :  { %7883 = vmatprep.mubr.msk.f32.mxu1 %vm292_vm0, %v9248_v12  ;;  %7881 = vmatprep.subr.mxu1 %v1747_v5 }
 0x44b   :  { %7882 = vmatpush3.msra.mxu1 %v1747_v5  ;;  %8012 = vmatprep.mubr.msk.f32.mxu0 %vm8949_vm1, %v8948_v6 }
 0x44c   :  { %7884 = vmatmul.mubr.msk.f32.vlgmr.msra.gmra.mxu1 %vm292_vm0, %v9253_v17  ;;  %7907 = vmatprep.subr.mxu1 %v8948_v6 }
 0x44d   :  { %7886 = vmatprep.mubr.msk.f32.mxu1 %vm292_vm0, %v9264_v24 }
 0x450   :  { %7887 = vmatmul.mubr.msk.f32.gmra.mxu1 %vm292_vm0, %v9272_v30 }
 0x451   :  { %7889 = vmatprep.mubr.msk.f32.mxu1 %vm292_vm0, %v9277_v35 }
 0x454   :  { %7890 = vmatmul.mubr.msk.f32.gmra.mxu1 %vm292_vm0, %v9282_v40 }
 0x455   :  { %7892 = vmatprep.mubr.msk.f32.mxu1 %vm292_vm0, %v9287_v45 }
 0x458   :  { %7893 = vmatmul.mubr.msk.f32.gmra.mxu1 %vm292_vm0, %v9292_v50 }
 0x459   :  { %7895 = vmatprep.mubr.msk.f32.mxu1 %vm292_vm0, %v9297_v55 }
 0x45c   :  { %7896 = vmatmul.mubr.msk.f32.gmra.mxu1 %vm292_vm0, %v9302_v60 }
 0x45d   :  { %7898 = vmatprep.mubr.msk.f32.mxu1 %vm292_vm0, %v9307_v1 }
 0x460   :  { %7899 = vmatmul.mubr.msk.f32.gmra.mxu1 %vm292_vm0, %v9312_v7 }
 0x461   :  { %7901 = vmatprep.mubr.msk.f32.mxu1 %vm292_vm0, %v9317_v13 }
 0x464   :  { %7902 = vmatmul.mubr.msk.f32.gmra.mxu1 %vm292_vm0, %v9322_v19 }
 0x465   :  { %7904 = vmatprep.mubr.msk.f32.mxu1 %vm292_vm0, %v9327_v25 }
 0x468   :  { %7905 = vmatmul.mubr.msk.f32.gmra.mxu1 %vm292_vm0, %v9332_v28 }
 0x469   :  { %7939 = vmatprep.mubr.msk.f32.mxu1 %vm8949_vm1, %v8948_v6 }
 0x4e0   :  { %v1726_v8 = vpop.f32.mrf.mxu0 }
 0x4e2   :  { %v7868_v9 = vpop.f32.mrf.mxu0 }
 0x4e3   :  { %v6281_v9 = vld [vmem:[%s11644_s3 + $0xa8] sm:$0xff] }
 0x4e4   :  { %v1731_v10 = vpop.f32.mrf.mxu0 }
 0x4e6   :  { %v7871_v11 = vpop.f32.mrf.mxu0 }
 0x4e7   :  { %v2458_v11 = vld [vmem:[%s11642_s4 + $0x138] sm:$0xff] }
 0x4e8   :  { %v1736_v15 = vpop.f32.mrf.mxu0 }
 0x4ea   :  { %v7874_v16 = vpop.f32.mrf.mxu0 }
 0x4eb   :  { %v6282_v16 = vld [vmem:[%s11644_s3 + $0xb0] sm:$0xff] }
 0x4ed   :  { %v9923_v18 = vpop.f32.mrf.mxu0 }
 0x4ef   :  { %v9925_v20 = vpop.f32.mrf.mxu0 }
 0x4f1   :  { %v7961_v21 = vpop.f32.mrf.mxu0 }
 0x4f3   :  { %v2063_v23 = vpop.f32.mrf.mxu0 }
 0x4f5   :  { %v7964_v26 = vpop.f32.mrf.mxu0 }
 0x4f7   :  { %v2073_v27 = vpop.f32.mrf.mxu0 }
 0x4f9   :  { %v7967_v29 = vpop.f32.mrf.mxu0 }
 0x4fb   :  { %v2083_v49 = vpop.f32.mrf.mxu0 }
 0x4fd   :  { %v7970_v32 = vpop.f32.mrf.mxu0 }
 0x4ff   :  { %v2093_v56 = vpop.f32.mrf.mxu0 }
 0x500   :  { %v1490_v62 = vpop.f32.mrf.mxu1 }
 0x501   :  { %v1504_v33 = vadd.f32 %v1490_v62, %v9739_v14  ;;  %v7973_v34 = vpop.f32.mrf.mxu0  ;;  %v2219_v62 = vld [vmem:[%s11642_s4 + $0x100] sm:$0xff] }
 0x502   :  { %v7795_v36 = vpop.f32.mrf.mxu1 }
 0x503   :  { %v2103_v37 = vpop.f32.mrf.mxu0  ;;  %v9928_v38 = vadd.f32 %v1726_v8, %v1504_v33 }
 0x504   :  { %v1495_v39 = vpop.f32.mrf.mxu1 }
 0x505   :  { %v1505_v41 = vadd.f32 %v1495_v39, %v9742_v22  ;;  %v7976_v42 = vpop.f32.mrf.mxu0 }
 0x506   :  { %v7798_v43 = vpop.f32.mrf.mxu1 }
 0x507   :  { %v2113_v44 = vpop.f32.mrf.mxu0  ;;  %v9931_v46 = vadd.f32 %v1731_v10, %v1505_v41 }
 0x508   :  { %v1500_v47 = vpop.f32.mrf.mxu1 }
 0x509   :  { %v1506_v48 = vadd.f32 %v1500_v47, %v9746_v31  ;;  %v7979_v51 = vpop.f32.mrf.mxu0 }
 0x50a   :  { %7981 = vmatpush3.msra.mxu0 %v7979_v51  ;;  %v7801_v52 = vpop.f32.mrf.mxu1 }
 0x50b   :  { %v2123_v14 = vpop.f32.mrf.mxu0  ;;  %7982 = vmatprep.subr.mxu0 %v8948_v6  ;;  %v9935_v53 = vadd.f32 %v1736_v15, %v1506_v48 }
 0x50c   :  { %7983 = vmatpush3.msra.mxu0 %v2123_v14  ;;  %v9937_v54 = vpop.f32.mrf.mxu1 }
 0x50d   :  { %7984 = vmatprep.subr.mxu0 %v8948_v6 }
 0x50e   :  { %7985 = vmatpush3.msra.mxu0 %v7976_v42  ;;  %v9940_v22 = vpop.f32.mrf.mxu1 }
 0x50f   :  { %7986 = vmatprep.subr.mxu0 %v8948_v6 }
 0x510   :  { %7987 = vmatpush3.msra.mxu0 %v2113_v44  ;;  %v9943_v31 = vpop.f32.mrf.mxu1 }
 0x511   :  { %7988 = vmatprep.subr.mxu0 %v8948_v6 }
 0x512   :  { %7989 = vmatpush3.msra.mxu0 %v7973_v34  ;;  %v9946_v57 = vpop.f32.mrf.mxu1 }
 0x513   :  { %7990 = vmatprep.subr.mxu0 %v8948_v6 }
 0x514   :  { %7991 = vmatpush3.msra.mxu0 %v2103_v37  ;;  %v9949_v58 = vpop.f32.mrf.mxu1 }
 0x515   :  { %7992 = vmatprep.subr.mxu0 %v8948_v6 }
 0x516   :  { %7993 = vmatpush3.msra.mxu0 %v7970_v32  ;;  %v9952_v59 = vpop.f32.mrf.mxu1  ;;  %v2220_v32 = vld [vmem:[%s11642_s4 + $0x108] sm:$0xff] }
 0x517   :  { %7994 = vmatprep.subr.mxu0 %v8948_v6 }
 0x518   :  { %7995 = vmatpush3.msra.mxu0 %v2093_v56  ;;  %v9955_v61 = vpop.f32.mrf.mxu1  ;;  %v6264_v56 = vld [vmem:[%s11644_s3 + $0xa0] sm:$0x3] }
 0x519   :  { %7996 = vmatprep.subr.mxu0 %v8948_v6 }
 0x51a   :  { %7997 = vmatpush3.msra.mxu0 %v7967_v29  ;;  %v9958_v63 = vpop.f32.mrf.mxu1  ;;  %v2221_v29 = vld [vmem:[%s11642_s4 + $0x110] sm:$0xff] }
 0x51b   :  { %7998 = vmatprep.subr.mxu0 %v8948_v6 }
 0x51c   :  { %7999 = vmatpush3.msra.mxu0 %v2083_v49  ;;  %v7897_v0 = vpop.f32.mrf.mxu1  ;;  %v6263_v49 = vld [vmem:[%s11644_s3 + $0x98] sm:$0xff] }
 0x51d   :  { %8000 = vmatprep.subr.mxu0 %v8948_v6 }
 0x51e   :  { %8001 = vmatpush3.msra.mxu0 %v7964_v26  ;;  %v1857_v2 = vpop.f32.mrf.mxu1  ;;  %v6262_v26 = vld [vmem:[%s11644_s3 + $0x90] sm:$0xff] }
 0x51f   :  { %8002 = vmatprep.subr.mxu0 %v8948_v6 }
 0x520   :  { %8003 = vmatpush3.msra.mxu0 %v2073_v27  ;;  %v7900_v3 = vpop.f32.mrf.mxu1  ;;  %v2222_v27 = vld [vmem:[%s11642_s4 + $0x118] sm:$0xff] }
 0x521   :  { %8004 = vmatprep.subr.mxu0 %v8948_v6 }
 0x522   :  { %8005 = vmatpush3.msra.mxu0 %v7961_v21  ;;  %v1867_v4 = vpop.f32.mrf.mxu1  ;;  %v2456_v21 = vld [vmem:[%s11642_s4 + $0x128] sm:$0xff] }
 0x523   :  { %8006 = vmatprep.subr.mxu0 %v8948_v6 }
 0x524   :  { %8007 = vmatpush3.msra.mxu0 %v2063_v23  ;;  %v7903_v5 = vpop.f32.mrf.mxu1  ;;  %v2455_v23 = vld [vmem:[%s11642_s4 + $0x120] sm:$0xff] }
 0x525   :  { %8008 = vmatprep.subr.mxu0 %v8948_v6 }
 0x526   :  { %8009 = vmatpush3.msra.mxu0 %v9923_v18  ;;  %v1877_v8 = vpop.f32.mrf.mxu1  ;;  %v2457_v18 = vld [vmem:[%s11642_s4 + $0x130] sm:$0xff] }
 0x527   :  { %8010 = vmatprep.subr.mxu0 %v8948_v6 }
 0x528   :  { %8011 = vmatpush3.msra.mxu0 %v9925_v20  ;;  %v7906_v10 = vpop.f32.mrf.mxu1  ;;  %v6283_v20 = vld [vmem:[%s11644_s3 + $0xb8] sm:$0x3] }
 0x529   :  { %8013 = vmatmul.mubr.f32.vlgmr.msra.gmra.mxu0 %v6281_v9  ;;  %7908 = vmatpush3.msra.mxu1 %v7906_v10 }
 0x52a   :  { %v1887_v15 = vpop.f32.mrf.mxu1  ;;  %7909 = vmatprep.subr.mxu1 %v8948_v6  ;;  %8015 = vmatprep.mubr.msk.f32.mxu0 %vm8949_vm1, %v8948_v6 }
 0x52b   :  { %7910 = vmatpush3.msra.mxu1 %v1887_v15  ;;  %8094 = vmatprep.subr.mxu0 %v2458_v11 }
 0x52c   :  { %7911 = vmatprep.subr.mxu1 %v8948_v6  ;;  %8095 = vmatpush3.msra.mxu0 %v2458_v11 }
 0x52d   :  { %8016 = vmatmul.mubr.f32.gmra.mxu0 %v6282_v16  ;;  %7912 = vmatpush3.msra.mxu1 %v7903_v5 }
 0x52e   :  { %7913 = vmatprep.subr.mxu1 %v8948_v6  ;;  %8096 = vmatprep.subr.mxu0 %v2457_v18 }
 0x52f   :  { %7914 = vmatpush3.msra.mxu1 %v1877_v8  ;;  %8018 = vmatprep.mubr.msk.f32.mxu0 %vm8949_vm1, %v8948_v6 }
 0x530   :  { %8097 = vmatpush3.msra.mxu0 %v2457_v18  ;;  %7915 = vmatprep.subr.mxu1 %v8948_v6 }
 0x531   :  { %8019 = vmatmul.mubr.f32.gmra.mxu0 %v6283_v20  ;;  %8098 = vmatprep.subr.mxu0 %v2456_v21 }
 0x532   :  { %7916 = vmatpush3.msra.mxu1 %v7900_v3  ;;  %8099 = vmatpush3.msra.mxu0 %v2456_v21 }
 0x533   :  { %8102 = vmatprep.mubr.msk.f32.mxu0 %vm292_vm0, %v9248_v12  ;;  %7917 = vmatprep.subr.mxu1 %v8948_v6 }
 0x534   :  { %8100 = vmatprep.subr.mxu0 %v2455_v23  ;;  %7918 = vmatpush3.msra.mxu1 %v1867_v4 }
 0x535   :  { %8101 = vmatpush3.msra.mxu0 %v2455_v23  ;;  %7919 = vmatprep.subr.mxu1 %v8948_v6 }
 0x536   :  { %8103 = vmatmul.mubr.msk.f32.vlgmr.msra.gmra.mxu0 %vm292_vm0, %v9253_v17  ;;  %7920 = vmatpush3.msra.mxu1 %v7897_v0 }
 0x537   :  { %8105 = vmatprep.mubr.msk.f32.mxu0 %vm292_vm0, %v9264_v24  ;;  %7921 = vmatprep.subr.mxu1 %v8948_v6 }
 0x538   :  { %7922 = vmatpush3.msra.mxu1 %v1857_v2  ;;  %8126 = vmatprep.subr.mxu0 %v8948_v6 }
 0x539   :  { %7923 = vmatprep.subr.mxu1 %v8948_v6 }
 0x53a   :  { %8106 = vmatmul.mubr.msk.f32.gmra.mxu0 %vm292_vm0, %v9272_v30  ;;  %7924 = vmatpush3.msra.mxu1 %v9955_v61 }
 0x53b   :  { %8108 = vmatprep.mubr.msk.f32.mxu0 %vm292_vm0, %v9277_v35  ;;  %7925 = vmatprep.subr.mxu1 %v8948_v6 }
 0x53c   :  { %7926 = vmatpush3.msra.mxu1 %v9958_v63 }
 0x53d   :  { %7927 = vmatprep.subr.mxu1 %v8948_v6 }
 0x53e   :  { %8109 = vmatmul.mubr.msk.f32.gmra.mxu0 %vm292_vm0, %v9282_v40  ;;  %7928 = vmatpush3.msra.mxu1 %v9949_v58 }
 0x53f   :  { %8111 = vmatprep.mubr.msk.f32.mxu0 %vm292_vm0, %v9287_v45  ;;  %7929 = vmatprep.subr.mxu1 %v8948_v6 }
 0x540   :  { %7930 = vmatpush3.msra.mxu1 %v9952_v59 }
 0x541   :  { %7931 = vmatprep.subr.mxu1 %v8948_v6 }
 0x542   :  { %8112 = vmatmul.mubr.msk.f32.gmra.mxu0 %vm292_vm0, %v9292_v50  ;;  %7932 = vmatpush3.msra.mxu1 %v9943_v31 }
 0x543   :  { %8114 = vmatprep.mubr.msk.f32.mxu0 %vm292_vm0, %v9297_v55  ;;  %7933 = vmatprep.subr.mxu1 %v8948_v6 }
 0x544   :  { %7934 = vmatpush3.msra.mxu1 %v9946_v57 }
 0x545   :  { %7935 = vmatprep.subr.mxu1 %v8948_v6 }
 0x546   :  { %8115 = vmatmul.mubr.msk.f32.gmra.mxu0 %vm292_vm0, %v9302_v60  ;;  %7936 = vmatpush3.msra.mxu1 %v9937_v54 }
 0x547   :  { %8117 = vmatprep.mubr.msk.f32.mxu0 %vm292_vm0, %v9307_v1  ;;  %7937 = vmatprep.subr.mxu1 %v8948_v6 }
 0x548   :  { %7938 = vmatpush3.msra.mxu1 %v9940_v22 }
 0x549   :  { %7940 = vmatmul.mubr.f32.vlgmr.msra.gmra.mxu1 %v6262_v26  ;;  %8021 = vmatprep.subr.mxu1 %v2222_v27 }
 0x54a   :  { %8118 = vmatmul.mubr.msk.f32.gmra.mxu0 %vm292_vm0, %v9312_v7  ;;  %7942 = vmatprep.mubr.msk.f32.mxu1 %vm8949_vm1, %v8948_v6 }
 0x54b   :  { %8120 = vmatprep.mubr.msk.f32.mxu0 %vm292_vm0, %v9317_v13  ;;  %8022 = vmatpush3.msra.mxu1 %v2222_v27 }
 0x54c   :  { %8023 = vmatprep.subr.mxu1 %v2221_v29 }
 0x54d   :  { %7943 = vmatmul.mubr.f32.gmra.mxu1 %v6263_v49 }
 0x54e   :  { %8121 = vmatmul.mubr.msk.f32.gmra.mxu0 %vm292_vm0, %v9322_v19  ;;  %7945 = vmatprep.mubr.msk.f32.mxu1 %vm8949_vm1, %v8948_v6 }
 0x54f   :  { %8123 = vmatprep.mubr.msk.f32.mxu0 %vm292_vm0, %v9327_v25  ;;  %8024 = vmatpush3.msra.mxu1 %v2221_v29 }
 0x550   :  { %8025 = vmatprep.subr.mxu1 %v2220_v32 }
 0x551   :  { %7946 = vmatmul.mubr.f32.gmra.mxu1 %v6264_v56 }
 0x552   :  { %8124 = vmatmul.mubr.msk.f32.gmra.mxu0 %vm292_vm0, %v9332_v28  ;;  %8026 = vmatpush3.msra.mxu1 %v2220_v32 }
 0x553   :  { %8029 = vmatprep.mubr.msk.f32.mxu1 %vm292_vm0, %v9248_v12  ;;  %8027 = vmatprep.subr.mxu1 %v2219_v62 }
 0x554   :  { %8028 = vmatpush3.msra.mxu1 %v2219_v62  ;;  %8158 = vmatprep.mubr.msk.f32.mxu0 %vm8949_vm1, %v8948_v6 }
 0x555   :  { %8030 = vmatmul.mubr.msk.f32.vlgmr.msra.gmra.mxu1 %vm292_vm0, %v9253_v17  ;;  %8053 = vmatprep.subr.mxu1 %v8948_v6 }
 0x556   :  { %8032 = vmatprep.mubr.msk.f32.mxu1 %vm292_vm0, %v9264_v24 }
 0x559   :  { %8033 = vmatmul.mubr.msk.f32.gmra.mxu1 %vm292_vm0, %v9272_v30 }
 0x55a   :  { %8035 = vmatprep.mubr.msk.f32.mxu1 %vm292_vm0, %v9277_v35 }
 0x55d   :  { %8036 = vmatmul.mubr.msk.f32.gmra.mxu1 %vm292_vm0, %v9282_v40 }
 0x55e   :  { %8038 = vmatprep.mubr.msk.f32.mxu1 %vm292_vm0, %v9287_v45 }
 0x561   :  { %8039 = vmatmul.mubr.msk.f32.gmra.mxu1 %vm292_vm0, %v9292_v50 }
 0x562   :  { %8041 = vmatprep.mubr.msk.f32.mxu1 %vm292_vm0, %v9297_v55 }
 0x565   :  { %8042 = vmatmul.mubr.msk.f32.gmra.mxu1 %vm292_vm0, %v9302_v60 }
 0x566   :  { %8044 = vmatprep.mubr.msk.f32.mxu1 %vm292_vm0, %v9307_v1 }
 0x569   :  { %8045 = vmatmul.mubr.msk.f32.gmra.mxu1 %vm292_vm0, %v9312_v7 }
 0x56a   :  { %8047 = vmatprep.mubr.msk.f32.mxu1 %vm292_vm0, %v9317_v13 }
 0x56d   :  { %8048 = vmatmul.mubr.msk.f32.gmra.mxu1 %vm292_vm0, %v9322_v19 }
 0x56e   :  { %8050 = vmatprep.mubr.msk.f32.mxu1 %vm292_vm0, %v9327_v25 }
 0x571   :  { %8051 = vmatmul.mubr.msk.f32.gmra.mxu1 %vm292_vm0, %v9332_v28 }
 0x572   :  { %8085 = vmatprep.mubr.msk.f32.mxu1 %vm8949_vm1, %v8948_v6 }
 0x5e9   :  { %v2198_v33 = vpop.f32.mrf.mxu0 }
 0x5eb   :  { %v8014_v34 = vpop.f32.mrf.mxu0 }
 0x5ec   :  { %v6319_v34 = vld [vmem:[%s11644_s3 + $0xd8] sm:$0xff] }
 0x5ed   :  { %v2203_v36 = vpop.f32.mrf.mxu0 }
 0x5ef   :  { %v8017_v37 = vpop.f32.mrf.mxu0 }
 0x5f0   :  { %v2930_v37 = vld [vmem:[%s11642_s4 + $0x178] sm:$0xff] }
 0x5f1   :  { %v2208_v39 = vpop.f32.mrf.mxu0 }
 0x5f3   :  { %v8020_v41 = vpop.f32.mrf.mxu0 }
 0x5f4   :  { %v6320_v41 = vld [vmem:[%s11644_s3 + $0xe0] sm:$0xff] }
 0x5f6   :  { %v10112_v42 = vpop.f32.mrf.mxu0 }
 0x5f8   :  { %v10114_v43 = vpop.f32.mrf.mxu0 }
 0x5fa   :  { %v8107_v44 = vpop.f32.mrf.mxu0 }
 0x5fc   :  { %v2535_v47 = vpop.f32.mrf.mxu0 }
 0x5fe   :  { %v8110_v48 = vpop.f32.mrf.mxu0 }
 0x600   :  { %v2545_v51 = vpop.f32.mrf.mxu0 }
 0x602   :  { %v8113_v52 = vpop.f32.mrf.mxu0 }
 0x604   :  { %v2555_v14 = vpop.f32.mrf.mxu0 }
 0x606   :  { %v8116_v54 = vpop.f32.mrf.mxu0 }
 0x608   :  { %v2565_v22 = vpop.f32.mrf.mxu0 }
 0x609   :  { %v1962_v31 = vpop.f32.mrf.mxu1 }
 0x60a   :  { %v1976_v57 = vadd.f32 %v1962_v31, %v9928_v38  ;;  %v8119_v58 = vpop.f32.mrf.mxu0  ;;  %v2691_v31 = vld [vmem:[%s11642_s4 + $0x140] sm:$0xff] }
 0x60b   :  { %v7941_v59 = vpop.f32.mrf.mxu1 }
 0x60c   :  { %v2575_v61 = vpop.f32.mrf.mxu0  ;;  %v10117_v63 = vadd.f32 %v2198_v33, %v1976_v57 }
 0x60d   :  { %v1967_v0 = vpop.f32.mrf.mxu1 }
 0x60e   :  { %v1977_v2 = vadd.f32 %v1967_v0, %v9931_v46  ;;  %v8122_v3 = vpop.f32.mrf.mxu0 }
 0x60f   :  { %v7944_v4 = vpop.f32.mrf.mxu1 }
 0x610   :  { %v2585_v5 = vpop.f32.mrf.mxu0  ;;  %v10120_v8 = vadd.f32 %v2203_v36, %v1977_v2 }
 0x611   :  { %v1972_v9 = vpop.f32.mrf.mxu1 }
 0x612   :  { %v1978_v10 = vadd.f32 %v1972_v9, %v9935_v53  ;;  %v8125_v11 = vpop.f32.mrf.mxu0 }
 0x613   :  { %8127 = vmatpush3.msra.mxu0 %v8125_v11  ;;  %v7947_v15 = vpop.f32.mrf.mxu1 }
 0x614   :  { %v2595_v38 = vpop.f32.mrf.mxu0  ;;  %8128 = vmatprep.subr.mxu0 %v8948_v6  ;;  %v10124_v16 = vadd.f32 %v2208_v39, %v1978_v10 }
 0x615   :  { %8129 = vmatpush3.msra.mxu0 %v2595_v38  ;;  %v10126_v18 = vpop.f32.mrf.mxu1 }
 0x616   :  { %8130 = vmatprep.subr.mxu0 %v8948_v6 }
 0x617   :  { %8131 = vmatpush3.msra.mxu0 %v8122_v3  ;;  %v10129_v46 = vpop.f32.mrf.mxu1 }
 0x618   :  { %8132 = vmatprep.subr.mxu0 %v8948_v6 }
 0x619   :  { %8133 = vmatpush3.msra.mxu0 %v2585_v5  ;;  %v10132_v53 = vpop.f32.mrf.mxu1 }
 0x61a   :  { %8134 = vmatprep.subr.mxu0 %v8948_v6 }
 0x61b   :  { %8135 = vmatpush3.msra.mxu0 %v8119_v58  ;;  %v10135_v20 = vpop.f32.mrf.mxu1 }
 0x61c   :  { %8136 = vmatprep.subr.mxu0 %v8948_v6 }
 0x61d   :  { %8137 = vmatpush3.msra.mxu0 %v2575_v61  ;;  %v10138_v21 = vpop.f32.mrf.mxu1 }
 0x61e   :  { %8138 = vmatprep.subr.mxu0 %v8948_v6 }
 0x61f   :  { %8139 = vmatpush3.msra.mxu0 %v8116_v54  ;;  %v10141_v23 = vpop.f32.mrf.mxu1  ;;  %v2692_v54 = vld [vmem:[%s11642_s4 + $0x148] sm:$0xff] }
 0x620   :  { %8140 = vmatprep.subr.mxu0 %v8948_v6 }
 0x621   :  { %8141 = vmatpush3.msra.mxu0 %v2565_v22  ;;  %v10144_v26 = vpop.f32.mrf.mxu1  ;;  %v6302_v22 = vld [vmem:[%s11644_s3 + $0xd0] sm:$0x3] }
 0x622   :  { %8142 = vmatprep.subr.mxu0 %v8948_v6 }
 0x623   :  { %8143 = vmatpush3.msra.mxu0 %v8113_v52  ;;  %v10147_v27 = vpop.f32.mrf.mxu1  ;;  %v2693_v52 = vld [vmem:[%s11642_s4 + $0x150] sm:$0xff] }
 0x624   :  { %8144 = vmatprep.subr.mxu0 %v8948_v6 }
 0x625   :  { %8145 = vmatpush3.msra.mxu0 %v2555_v14  ;;  %v8043_v29 = vpop.f32.mrf.mxu1  ;;  %v6301_v14 = vld [vmem:[%s11644_s3 + $0xc8] sm:$0xff] }
 0x626   :  { %8146 = vmatprep.subr.mxu0 %v8948_v6 }
 0x627   :  { %8147 = vmatpush3.msra.mxu0 %v8110_v48  ;;  %v2329_v49 = vpop.f32.mrf.mxu1  ;;  %v6300_v48 = vld [vmem:[%s11644_s3 + $0xc0] sm:$0xff] }
 0x628   :  { %8148 = vmatprep.subr.mxu0 %v8948_v6 }
 0x629   :  { %8149 = vmatpush3.msra.mxu0 %v2545_v51  ;;  %v8046_v32 = vpop.f32.mrf.mxu1  ;;  %v2694_v51 = vld [vmem:[%s11642_s4 + $0x158] sm:$0xff] }
 0x62a   :  { %8150 = vmatprep.subr.mxu0 %v8948_v6 }
 0x62b   :  { %8151 = vmatpush3.msra.mxu0 %v8107_v44  ;;  %v2339_v56 = vpop.f32.mrf.mxu1  ;;  %v2928_v44 = vld [vmem:[%s11642_s4 + $0x168] sm:$0xff] }
 0x62c   :  { %8152 = vmatprep.subr.mxu0 %v8948_v6 }
 0x62d   :  { %8153 = vmatpush3.msra.mxu0 %v2535_v47  ;;  %v8049_v62 = vpop.f32.mrf.mxu1  ;;  %v2927_v47 = vld [vmem:[%s11642_s4 + $0x160] sm:$0xff] }
 0x62e   :  { %8154 = vmatprep.subr.mxu0 %v8948_v6 }
 0x62f   :  { %8155 = vmatpush3.msra.mxu0 %v10112_v42  ;;  %v2349_v33 = vpop.f32.mrf.mxu1  ;;  %v2929_v42 = vld [vmem:[%s11642_s4 + $0x170] sm:$0xff] }
 0x630   :  { %8156 = vmatprep.subr.mxu0 %v8948_v6 }
 0x631   :  { %8157 = vmatpush3.msra.mxu0 %v10114_v43  ;;  %v8052_v36 = vpop.f32.mrf.mxu1  ;;  %v6321_v43 = vld [vmem:[%s11644_s3 + $0xe8] sm:$0x3] }
 0x632   :  { %8159 = vmatmul.mubr.f32.vlgmr.msra.gmra.mxu0 %v6319_v34  ;;  %8054 = vmatpush3.msra.mxu1 %v8052_v36 }
 0x633   :  { %v2359_v39 = vpop.f32.mrf.mxu1  ;;  %8055 = vmatprep.subr.mxu1 %v8948_v6  ;;  %8161 = vmatprep.mubr.msk.f32.mxu0 %vm8949_vm1, %v8948_v6 }
 0x634   :  { %8056 = vmatpush3.msra.mxu1 %v2359_v39  ;;  %8240 = vmatprep.subr.mxu0 %v2930_v37 }
 0x635   :  { %8057 = vmatprep.subr.mxu1 %v8948_v6  ;;  %8241 = vmatpush3.msra.mxu0 %v2930_v37 }
 0x636   :  { %8162 = vmatmul.mubr.f32.gmra.mxu0 %v6320_v41  ;;  %8058 = vmatpush3.msra.mxu1 %v8049_v62 }
 0x637   :  { %8059 = vmatprep.subr.mxu1 %v8948_v6  ;;  %8242 = vmatprep.subr.mxu0 %v2929_v42 }
 0x638   :  { %8060 = vmatpush3.msra.mxu1 %v2349_v33  ;;  %8164 = vmatprep.mubr.msk.f32.mxu0 %vm8949_vm1, %v8948_v6 }
 0x639   :  { %8243 = vmatpush3.msra.mxu0 %v2929_v42  ;;  %8061 = vmatprep.subr.mxu1 %v8948_v6 }
 0x63a   :  { %8165 = vmatmul.mubr.f32.gmra.mxu0 %v6321_v43  ;;  %8244 = vmatprep.subr.mxu0 %v2928_v44 }
 0x63b   :  { %8062 = vmatpush3.msra.mxu1 %v8046_v32  ;;  %8245 = vmatpush3.msra.mxu0 %v2928_v44 }
 0x63c   :  { %8248 = vmatprep.mubr.msk.f32.mxu0 %vm292_vm0, %v9248_v12  ;;  %8063 = vmatprep.subr.mxu1 %v8948_v6 }
 0x63d   :  { %8246 = vmatprep.subr.mxu0 %v2927_v47  ;;  %8064 = vmatpush3.msra.mxu1 %v2339_v56 }
 0x63e   :  { %8247 = vmatpush3.msra.mxu0 %v2927_v47  ;;  %8065 = vmatprep.subr.mxu1 %v8948_v6 }
 0x63f   :  { %8249 = vmatmul.mubr.msk.f32.vlgmr.msra.gmra.mxu0 %vm292_vm0, %v9253_v17  ;;  %8066 = vmatpush3.msra.mxu1 %v8043_v29 }
 0x640   :  { %8251 = vmatprep.mubr.msk.f32.mxu0 %vm292_vm0, %v9264_v24  ;;  %8067 = vmatprep.subr.mxu1 %v8948_v6 }
 0x641   :  { %8068 = vmatpush3.msra.mxu1 %v2329_v49  ;;  %8272 = vmatprep.subr.mxu0 %v8948_v6 }
 0x642   :  { %8069 = vmatprep.subr.mxu1 %v8948_v6 }
 0x643   :  { %8252 = vmatmul.mubr.msk.f32.gmra.mxu0 %vm292_vm0, %v9272_v30  ;;  %8070 = vmatpush3.msra.mxu1 %v10144_v26 }
 0x644   :  { %8254 = vmatprep.mubr.msk.f32.mxu0 %vm292_vm0, %v9277_v35  ;;  %8071 = vmatprep.subr.mxu1 %v8948_v6 }
 0x645   :  { %8072 = vmatpush3.msra.mxu1 %v10147_v27 }
 0x646   :  { %8073 = vmatprep.subr.mxu1 %v8948_v6 }
 0x647   :  { %8255 = vmatmul.mubr.msk.f32.gmra.mxu0 %vm292_vm0, %v9282_v40  ;;  %8074 = vmatpush3.msra.mxu1 %v10138_v21 }
 0x648   :  { %8257 = vmatprep.mubr.msk.f32.mxu0 %vm292_vm0, %v9287_v45  ;;  %8075 = vmatprep.subr.mxu1 %v8948_v6 }
 0x649   :  { %8076 = vmatpush3.msra.mxu1 %v10141_v23 }
 0x64a   :  { %8077 = vmatprep.subr.mxu1 %v8948_v6 }
 0x64b   :  { %8258 = vmatmul.mubr.msk.f32.gmra.mxu0 %vm292_vm0, %v9292_v50  ;;  %8078 = vmatpush3.msra.mxu1 %v10132_v53 }
 0x64c   :  { %8260 = vmatprep.mubr.msk.f32.mxu0 %vm292_vm0, %v9297_v55  ;;  %8079 = vmatprep.subr.mxu1 %v8948_v6 }
 0x64d   :  { %8080 = vmatpush3.msra.mxu1 %v10135_v20 }
 0x64e   :  { %8081 = vmatprep.subr.mxu1 %v8948_v6 }
 0x64f   :  { %8261 = vmatmul.mubr.msk.f32.gmra.mxu0 %vm292_vm0, %v9302_v60  ;;  %8082 = vmatpush3.msra.mxu1 %v10126_v18 }
 0x650   :  { %8263 = vmatprep.mubr.msk.f32.mxu0 %vm292_vm0, %v9307_v1  ;;  %8083 = vmatprep.subr.mxu1 %v8948_v6 }
 0x651   :  { %8084 = vmatpush3.msra.mxu1 %v10129_v46 }
 0x652   :  { %8086 = vmatmul.mubr.f32.vlgmr.msra.gmra.mxu1 %v6300_v48  ;;  %8167 = vmatprep.subr.mxu1 %v2694_v51 }
 0x653   :  { %8264 = vmatmul.mubr.msk.f32.gmra.mxu0 %vm292_vm0, %v9312_v7  ;;  %8088 = vmatprep.mubr.msk.f32.mxu1 %vm8949_vm1, %v8948_v6 }
 0x654   :  { %8266 = vmatprep.mubr.msk.f32.mxu0 %vm292_vm0, %v9317_v13  ;;  %8168 = vmatpush3.msra.mxu1 %v2694_v51 }
 0x655   :  { %8169 = vmatprep.subr.mxu1 %v2693_v52 }
 0x656   :  { %8089 = vmatmul.mubr.f32.gmra.mxu1 %v6301_v14 }
 0x657   :  { %8267 = vmatmul.mubr.msk.f32.gmra.mxu0 %vm292_vm0, %v9322_v19  ;;  %8091 = vmatprep.mubr.msk.f32.mxu1 %vm8949_vm1, %v8948_v6 }
 0x658   :  { %8269 = vmatprep.mubr.msk.f32.mxu0 %vm292_vm0, %v9327_v25  ;;  %8170 = vmatpush3.msra.mxu1 %v2693_v52 }
 0x659   :  { %8171 = vmatprep.subr.mxu1 %v2692_v54 }
 0x65a   :  { %8092 = vmatmul.mubr.f32.gmra.mxu1 %v6302_v22 }
 0x65b   :  { %8270 = vmatmul.mubr.msk.f32.gmra.mxu0 %vm292_vm0, %v9332_v28  ;;  %8172 = vmatpush3.msra.mxu1 %v2692_v54 }
 0x65c   :  { %8175 = vmatprep.mubr.msk.f32.mxu1 %vm292_vm0, %v9248_v12  ;;  %8173 = vmatprep.subr.mxu1 %v2691_v31 }
 0x65d   :  { %8174 = vmatpush3.msra.mxu1 %v2691_v31  ;;  %8304 = vmatprep.mubr.msk.f32.mxu0 %vm8949_vm1, %v8948_v6 }
 0x65e   :  { %8176 = vmatmul.mubr.msk.f32.vlgmr.msra.gmra.mxu1 %vm292_vm0, %v9253_v17  ;;  %8199 = vmatprep.subr.mxu1 %v8948_v6 }
 0x65f   :  { %8178 = vmatprep.mubr.msk.f32.mxu1 %vm292_vm0, %v9264_v24 }
 0x662   :  { %8179 = vmatmul.mubr.msk.f32.gmra.mxu1 %vm292_vm0, %v9272_v30 }
 0x663   :  { %8181 = vmatprep.mubr.msk.f32.mxu1 %vm292_vm0, %v9277_v35 }
 0x666   :  { %8182 = vmatmul.mubr.msk.f32.gmra.mxu1 %vm292_vm0, %v9282_v40 }
 0x667   :  { %8184 = vmatprep.mubr.msk.f32.mxu1 %vm292_vm0, %v9287_v45 }
 0x66a   :  { %8185 = vmatmul.mubr.msk.f32.gmra.mxu1 %vm292_vm0, %v9292_v50 }
 0x66b   :  { %8187 = vmatprep.mubr.msk.f32.mxu1 %vm292_vm0, %v9297_v55 }
 0x66e   :  { %8188 = vmatmul.mubr.msk.f32.gmra.mxu1 %vm292_vm0, %v9302_v60 }
 0x66f   :  { %8190 = vmatprep.mubr.msk.f32.mxu1 %vm292_vm0, %v9307_v1 }
 0x672   :  { %8191 = vmatmul.mubr.msk.f32.gmra.mxu1 %vm292_vm0, %v9312_v7 }
 0x673   :  { %8193 = vmatprep.mubr.msk.f32.mxu1 %vm292_vm0, %v9317_v13 }
 0x676   :  { %8194 = vmatmul.mubr.msk.f32.gmra.mxu1 %vm292_vm0, %v9322_v19 }
 0x677   :  { %8196 = vmatprep.mubr.msk.f32.mxu1 %vm292_vm0, %v9327_v25 }
 0x67a   :  { %8197 = vmatmul.mubr.msk.f32.gmra.mxu1 %vm292_vm0, %v9332_v28 }
 0x67b   :  { %8231 = vmatprep.mubr.msk.f32.mxu1 %vm8949_vm1, %v8948_v6 }
 0x6f2   :  { %v2670_v57 = vpop.f32.mrf.mxu0 }
 0x6f4   :  { %v8160_v58 = vpop.f32.mrf.mxu0 }
 0x6f5   :  { %v6357_v58 = vld [vmem:[%s11644_s3 + $0x108] sm:$0xff] }
 0x6f6   :  { %v2675_v59 = vpop.f32.mrf.mxu0 }
 0x6f8   :  { %v8163_v61 = vpop.f32.mrf.mxu0 }
 0x6f9   :  { %v3402_v61 = vld [vmem:[%s11642_s4 + $0x1b8] sm:$0xff] }
 0x6fa   :  { %v2680_v0 = vpop.f32.mrf.mxu0 }
 0x6fc   :  { %v8166_v2 = vpop.f32.mrf.mxu0 }
 0x6fd   :  { %v6358_v2 = vld [vmem:[%s11644_s3 + $0x110] sm:$0xff] }
 0x6ff   :  { %v10301_v3 = vpop.f32.mrf.mxu0 }
 0x701   :  { %v10303_v4 = vpop.f32.mrf.mxu0 }
 0x703   :  { %v8253_v5 = vpop.f32.mrf.mxu0 }
 0x705   :  { %v3007_v9 = vpop.f32.mrf.mxu0 }
 0x707   :  { %v8256_v10 = vpop.f32.mrf.mxu0 }
 0x709   :  { %v3017_v11 = vpop.f32.mrf.mxu0 }
 0x70b   :  { %v8259_v15 = vpop.f32.mrf.mxu0 }
 0x70d   :  { %v3027_v38 = vpop.f32.mrf.mxu0 }
 0x70f   :  { %v8262_v18 = vpop.f32.mrf.mxu0 }
 0x711   :  { %v3037_v46 = vpop.f32.mrf.mxu0 }
 0x712   :  { %v2434_v53 = vpop.f32.mrf.mxu1 }
 0x713   :  { %v2448_v20 = vadd.f32 %v2434_v53, %v10117_v63  ;;  %v8265_v21 = vpop.f32.mrf.mxu0  ;;  %v3163_v53 = vld [vmem:[%s11642_s4 + $0x180] sm:$0xff] }
 0x714   :  { %v8087_v23 = vpop.f32.mrf.mxu1 }
 0x715   :  { %v3047_v26 = vpop.f32.mrf.mxu0  ;;  %v10306_v27 = vadd.f32 %v2670_v57, %v2448_v20 }
 0x716   :  { %v2439_v29 = vpop.f32.mrf.mxu1 }
 0x717   :  { %v2449_v49 = vadd.f32 %v2439_v29, %v10120_v8  ;;  %v8268_v32 = vpop.f32.mrf.mxu0 }
 0x718   :  { %v8090_v56 = vpop.f32.mrf.mxu1 }
 0x719   :  { %v3057_v62 = vpop.f32.mrf.mxu0  ;;  %v10309_v33 = vadd.f32 %v2675_v59, %v2449_v49 }
 0x71a   :  { %v2444_v34 = vpop.f32.mrf.mxu1 }
 0x71b   :  { %v2450_v36 = vadd.f32 %v2444_v34, %v10124_v16  ;;  %v8271_v37 = vpop.f32.mrf.mxu0 }
 0x71c   :  { %8273 = vmatpush3.msra.mxu0 %v8271_v37  ;;  %v8093_v39 = vpop.f32.mrf.mxu1 }
 0x71d   :  { %v3067_v63 = vpop.f32.mrf.mxu0  ;;  %8274 = vmatprep.subr.mxu0 %v8948_v6  ;;  %v10313_v41 = vadd.f32 %v2680_v0, %v2450_v36 }
 0x71e   :  { %8275 = vmatpush3.msra.mxu0 %v3067_v63  ;;  %v10315_v42 = vpop.f32.mrf.mxu1 }
 0x71f   :  { %8276 = vmatprep.subr.mxu0 %v8948_v6 }
 0x720   :  { %8277 = vmatpush3.msra.mxu0 %v8268_v32  ;;  %v10318_v8 = vpop.f32.mrf.mxu1 }
 0x721   :  { %8278 = vmatprep.subr.mxu0 %v8948_v6 }
 0x722   :  { %8279 = vmatpush3.msra.mxu0 %v3057_v62  ;;  %v10321_v16 = vpop.f32.mrf.mxu1 }
 0x723   :  { %8280 = vmatprep.subr.mxu0 %v8948_v6 }
 0x724   :  { %8281 = vmatpush3.msra.mxu0 %v8265_v21  ;;  %v10324_v43 = vpop.f32.mrf.mxu1 }
 0x725   :  { %8282 = vmatprep.subr.mxu0 %v8948_v6 }
 0x726   :  { %8283 = vmatpush3.msra.mxu0 %v3047_v26  ;;  %v10327_v44 = vpop.f32.mrf.mxu1 }
 0x727   :  { %8284 = vmatprep.subr.mxu0 %v8948_v6 }
 0x728   :  { %8285 = vmatpush3.msra.mxu0 %v8262_v18  ;;  %v10330_v47 = vpop.f32.mrf.mxu1  ;;  %v3164_v18 = vld [vmem:[%s11642_s4 + $0x188] sm:$0xff] }
 0x729   :  { %8286 = vmatprep.subr.mxu0 %v8948_v6 }
 0x72a   :  { %8287 = vmatpush3.msra.mxu0 %v3037_v46  ;;  %v10333_v48 = vpop.f32.mrf.mxu1  ;;  %v6340_v46 = vld [vmem:[%s11644_s3 + $0x100] sm:$0x3] }
 0x72b   :  { %8288 = vmatprep.subr.mxu0 %v8948_v6 }
 0x72c   :  { %8289 = vmatpush3.msra.mxu0 %v8259_v15  ;;  %v10336_v51 = vpop.f32.mrf.mxu1  ;;  %v3165_v15 = vld [vmem:[%s11642_s4 + $0x190] sm:$0xff] }
 0x72d   :  { %8290 = vmatprep.subr.mxu0 %v8948_v6 }
 0x72e   :  { %8291 = vmatpush3.msra.mxu0 %v3027_v38  ;;  %v8189_v52 = vpop.f32.mrf.mxu1  ;;  %v6339_v38 = vld [vmem:[%s11644_s3 + $0xf8] sm:$0xff] }
 0x72f   :  { %8292 = vmatprep.subr.mxu0 %v8948_v6 }
 0x730   :  { %8293 = vmatpush3.msra.mxu0 %v8256_v10  ;;  %v2801_v14 = vpop.f32.mrf.mxu1  ;;  %v6338_v10 = vld [vmem:[%s11644_s3 + $0xf0] sm:$0xff] }
 0x731   :  { %8294 = vmatprep.subr.mxu0 %v8948_v6 }
 0x732   :  { %8295 = vmatpush3.msra.mxu0 %v3017_v11  ;;  %v8192_v54 = vpop.f32.mrf.mxu1  ;;  %v3166_v11 = vld [vmem:[%s11642_s4 + $0x198] sm:$0xff] }
 0x733   :  { %8296 = vmatprep.subr.mxu0 %v8948_v6 }
 0x734   :  { %8297 = vmatpush3.msra.mxu0 %v8253_v5  ;;  %v2811_v22 = vpop.f32.mrf.mxu1  ;;  %v3400_v5 = vld [vmem:[%s11642_s4 + $0x1a8] sm:$0xff] }
 0x735   :  { %8298 = vmatprep.subr.mxu0 %v8948_v6 }
 0x736   :  { %8299 = vmatpush3.msra.mxu0 %v3007_v9  ;;  %v8195_v31 = vpop.f32.mrf.mxu1  ;;  %v3399_v9 = vld [vmem:[%s11642_s4 + $0x1a0] sm:$0xff] }
 0x737   :  { %8300 = vmatprep.subr.mxu0 %v8948_v6 }
 0x738   :  { %8301 = vmatpush3.msra.mxu0 %v10301_v3  ;;  %v2821_v57 = vpop.f32.mrf.mxu1  ;;  %v3401_v3 = vld [vmem:[%s11642_s4 + $0x1b0] sm:$0xff] }
 0x739   :  { %8302 = vmatprep.subr.mxu0 %v8948_v6 }
 0x73a   :  { %8303 = vmatpush3.msra.mxu0 %v10303_v4  ;;  %v8198_v59 = vpop.f32.mrf.mxu1  ;;  %v6359_v4 = vld [vmem:[%s11644_s3 + $0x118] sm:$0x3] }
 0x73b   :  { %8305 = vmatmul.mubr.f32.vlgmr.msra.gmra.mxu0 %v6357_v58  ;;  %8200 = vmatpush3.msra.mxu1 %v8198_v59 }
 0x73c   :  { %v2831_v0 = vpop.f32.mrf.mxu1  ;;  %8201 = vmatprep.subr.mxu1 %v8948_v6  ;;  %8307 = vmatprep.mubr.msk.f32.mxu0 %vm8949_vm1, %v8948_v6 }
 0x73d   :  { %8202 = vmatpush3.msra.mxu1 %v2831_v0  ;;  %8386 = vmatprep.subr.mxu0 %v3402_v61 }
 0x73e   :  { %8203 = vmatprep.subr.mxu1 %v8948_v6  ;;  %8387 = vmatpush3.msra.mxu0 %v3402_v61 }
 0x73f   :  { %8308 = vmatmul.mubr.f32.gmra.mxu0 %v6358_v2  ;;  %8204 = vmatpush3.msra.mxu1 %v8195_v31 }
 0x740   :  { %8205 = vmatprep.subr.mxu1 %v8948_v6  ;;  %8388 = vmatprep.subr.mxu0 %v3401_v3 }
 0x741   :  { %8206 = vmatpush3.msra.mxu1 %v2821_v57  ;;  %8310 = vmatprep.mubr.msk.f32.mxu0 %vm8949_vm1, %v8948_v6 }
 0x742   :  { %8389 = vmatpush3.msra.mxu0 %v3401_v3  ;;  %8207 = vmatprep.subr.mxu1 %v8948_v6 }
 0x743   :  { %8311 = vmatmul.mubr.f32.gmra.mxu0 %v6359_v4  ;;  %8390 = vmatprep.subr.mxu0 %v3400_v5 }
 0x744   :  { %8208 = vmatpush3.msra.mxu1 %v8192_v54  ;;  %8391 = vmatpush3.msra.mxu0 %v3400_v5 }
 0x745   :  { %8394 = vmatprep.mubr.msk.f32.mxu0 %vm292_vm0, %v9248_v12  ;;  %8209 = vmatprep.subr.mxu1 %v8948_v6 }
 0x746   :  { %8392 = vmatprep.subr.mxu0 %v3399_v9  ;;  %8210 = vmatpush3.msra.mxu1 %v2811_v22 }
 0x747   :  { %8393 = vmatpush3.msra.mxu0 %v3399_v9  ;;  %8211 = vmatprep.subr.mxu1 %v8948_v6 }
 0x748   :  { %8395 = vmatmul.mubr.msk.f32.vlgmr.msra.gmra.mxu0 %vm292_vm0, %v9253_v17  ;;  %8212 = vmatpush3.msra.mxu1 %v8189_v52 }
 0x749   :  { %8397 = vmatprep.mubr.msk.f32.mxu0 %vm292_vm0, %v9264_v24  ;;  %8213 = vmatprep.subr.mxu1 %v8948_v6 }
 0x74a   :  { %8214 = vmatpush3.msra.mxu1 %v2801_v14  ;;  %8418 = vmatprep.subr.mxu0 %v8948_v6 }
 0x74b   :  { %8215 = vmatprep.subr.mxu1 %v8948_v6 }
 0x74c   :  { %8398 = vmatmul.mubr.msk.f32.gmra.mxu0 %vm292_vm0, %v9272_v30  ;;  %8216 = vmatpush3.msra.mxu1 %v10333_v48 }
 0x74d   :  { %8400 = vmatprep.mubr.msk.f32.mxu0 %vm292_vm0, %v9277_v35  ;;  %8217 = vmatprep.subr.mxu1 %v8948_v6 }
 0x74e   :  { %8218 = vmatpush3.msra.mxu1 %v10336_v51 }
 0x74f   :  { %8219 = vmatprep.subr.mxu1 %v8948_v6 }
 0x750   :  { %8401 = vmatmul.mubr.msk.f32.gmra.mxu0 %vm292_vm0, %v9282_v40  ;;  %8220 = vmatpush3.msra.mxu1 %v10327_v44 }
 0x751   :  { %8403 = vmatprep.mubr.msk.f32.mxu0 %vm292_vm0, %v9287_v45  ;;  %8221 = vmatprep.subr.mxu1 %v8948_v6 }
 0x752   :  { %8222 = vmatpush3.msra.mxu1 %v10330_v47 }
 0x753   :  { %8223 = vmatprep.subr.mxu1 %v8948_v6 }
 0x754   :  { %8404 = vmatmul.mubr.msk.f32.gmra.mxu0 %vm292_vm0, %v9292_v50  ;;  %8224 = vmatpush3.msra.mxu1 %v10321_v16 }
 0x755   :  { %8406 = vmatprep.mubr.msk.f32.mxu0 %vm292_vm0, %v9297_v55  ;;  %8225 = vmatprep.subr.mxu1 %v8948_v6 }
 0x756   :  { %8226 = vmatpush3.msra.mxu1 %v10324_v43 }
 0x757   :  { %8227 = vmatprep.subr.mxu1 %v8948_v6 }
 0x758   :  { %8407 = vmatmul.mubr.msk.f32.gmra.mxu0 %vm292_vm0, %v9302_v60  ;;  %8228 = vmatpush3.msra.mxu1 %v10315_v42 }
 0x759   :  { %8409 = vmatprep.mubr.msk.f32.mxu0 %vm292_vm0, %v9307_v1  ;;  %8229 = vmatprep.subr.mxu1 %v8948_v6 }
 0x75a   :  { %8230 = vmatpush3.msra.mxu1 %v10318_v8 }
 0x75b   :  { %8232 = vmatmul.mubr.f32.vlgmr.msra.gmra.mxu1 %v6338_v10  ;;  %8313 = vmatprep.subr.mxu1 %v3166_v11 }
 0x75c   :  { %8410 = vmatmul.mubr.msk.f32.gmra.mxu0 %vm292_vm0, %v9312_v7  ;;  %8234 = vmatprep.mubr.msk.f32.mxu1 %vm8949_vm1, %v8948_v6 }
 0x75d   :  { %8412 = vmatprep.mubr.msk.f32.mxu0 %vm292_vm0, %v9317_v13  ;;  %8314 = vmatpush3.msra.mxu1 %v3166_v11 }
 0x75e   :  { %8315 = vmatprep.subr.mxu1 %v3165_v15 }
 0x75f   :  { %8235 = vmatmul.mubr.f32.gmra.mxu1 %v6339_v38 }
 0x760   :  { %8413 = vmatmul.mubr.msk.f32.gmra.mxu0 %vm292_vm0, %v9322_v19  ;;  %8237 = vmatprep.mubr.msk.f32.mxu1 %vm8949_vm1, %v8948_v6 }
 0x761   :  { %8415 = vmatprep.mubr.msk.f32.mxu0 %vm292_vm0, %v9327_v25  ;;  %8316 = vmatpush3.msra.mxu1 %v3165_v15 }
 0x762   :  { %8317 = vmatprep.subr.mxu1 %v3164_v18 }
 0x763   :  { %8238 = vmatmul.mubr.f32.gmra.mxu1 %v6340_v46 }
 0x764   :  { %8416 = vmatmul.mubr.msk.f32.gmra.mxu0 %vm292_vm0, %v9332_v28  ;;  %8318 = vmatpush3.msra.mxu1 %v3164_v18 }
 0x765   :  { %8321 = vmatprep.mubr.msk.f32.mxu1 %vm292_vm0, %v9248_v12  ;;  %8319 = vmatprep.subr.mxu1 %v3163_v53 }
 0x766   :  { %8320 = vmatpush3.msra.mxu1 %v3163_v53  ;;  %8450 = vmatprep.mubr.msk.f32.mxu0 %vm8949_vm1, %v8948_v6 }
 0x767   :  { %8322 = vmatmul.mubr.msk.f32.vlgmr.msra.gmra.mxu1 %vm292_vm0, %v9253_v17  ;;  %8345 = vmatprep.subr.mxu1 %v8948_v6 }
 0x768   :  { %8324 = vmatprep.mubr.msk.f32.mxu1 %vm292_vm0, %v9264_v24 }
 0x76b   :  { %8325 = vmatmul.mubr.msk.f32.gmra.mxu1 %vm292_vm0, %v9272_v30 }
 0x76c   :  { %8327 = vmatprep.mubr.msk.f32.mxu1 %vm292_vm0, %v9277_v35 }
 0x76f   :  { %8328 = vmatmul.mubr.msk.f32.gmra.mxu1 %vm292_vm0, %v9282_v40 }
 0x770   :  { %8330 = vmatprep.mubr.msk.f32.mxu1 %vm292_vm0, %v9287_v45 }
 0x773   :  { %8331 = vmatmul.mubr.msk.f32.gmra.mxu1 %vm292_vm0, %v9292_v50 }
 0x774   :  { %8333 = vmatprep.mubr.msk.f32.mxu1 %vm292_vm0, %v9297_v55 }
 0x777   :  { %8334 = vmatmul.mubr.msk.f32.gmra.mxu1 %vm292_vm0, %v9302_v60 }
 0x778   :  { %8336 = vmatprep.mubr.msk.f32.mxu1 %vm292_vm0, %v9307_v1 }
 0x77b   :  { %8337 = vmatmul.mubr.msk.f32.gmra.mxu1 %vm292_vm0, %v9312_v7 }
 0x77c   :  { %8339 = vmatprep.mubr.msk.f32.mxu1 %vm292_vm0, %v9317_v13 }
 0x77f   :  { %8340 = vmatmul.mubr.msk.f32.gmra.mxu1 %vm292_vm0, %v9322_v19 }
 0x780   :  { %8342 = vmatprep.mubr.msk.f32.mxu1 %vm292_vm0, %v9327_v25 }
 0x783   :  { %8343 = vmatmul.mubr.msk.f32.gmra.mxu1 %vm292_vm0, %v9332_v28 }
 0x784   :  { %8377 = vmatprep.mubr.msk.f32.mxu1 %vm8949_vm1, %v8948_v6 }
 0x7fb   :  { %v3142_v20 = vpop.f32.mrf.mxu0 }
 0x7fd   :  { %v8306_v21 = vpop.f32.mrf.mxu0 }
 0x7fe   :  { %v6395_v21 = vld [vmem:[%s11644_s3 + $0x138] sm:$0xff] }
 0x7ff   :  { %v3147_v23 = vpop.f32.mrf.mxu0 }
 0x801   :  { %v8309_v26 = vpop.f32.mrf.mxu0 }
 0x802   :  { %v3874_v26 = vld [vmem:[%s11642_s4 + $0x1f8] sm:$0xff] }
 0x803   :  { %v3152_v29 = vpop.f32.mrf.mxu0 }
 0x805   :  { %v8312_v49 = vpop.f32.mrf.mxu0 }
 0x806   :  { %v6396_v49 = vld [vmem:[%s11644_s3 + $0x140] sm:$0xff] }
 0x808   :  { %v10490_v32 = vpop.f32.mrf.mxu0 }
 0x80a   :  { %v10492_v56 = vpop.f32.mrf.mxu0 }
 0x80c   :  { %v8399_v62 = vpop.f32.mrf.mxu0 }
 0x80e   :  { %v3479_v34 = vpop.f32.mrf.mxu0 }
 0x810   :  { %v8402_v36 = vpop.f32.mrf.mxu0 }
 0x812   :  { %v3489_v37 = vpop.f32.mrf.mxu0 }
 0x814   :  { %v8405_v39 = vpop.f32.mrf.mxu0 }
 0x816   :  { %v3499_v63 = vpop.f32.mrf.mxu0 }
 0x818   :  { %v8408_v42 = vpop.f32.mrf.mxu0 }
 0x81a   :  { %v3509_v8 = vpop.f32.mrf.mxu0 }
 0x81b   :  { %v2906_v16 = vpop.f32.mrf.mxu1 }
 0x81c   :  { %v2920_v43 = vadd.f32 %v2906_v16, %v10306_v27  ;;  %v8411_v44 = vpop.f32.mrf.mxu0  ;;  %v3635_v16 = vld [vmem:[%s11642_s4 + $0x1c0] sm:$0xff] }
 0x81d   :  { %v8233_v47 = vpop.f32.mrf.mxu1 }
 0x81e   :  { %v3519_v48 = vpop.f32.mrf.mxu0  ;;  %v10495_v51 = vadd.f32 %v3142_v20, %v2920_v43 }
 0x81f   :  { %v2911_v52 = vpop.f32.mrf.mxu1 }
 0x820   :  { %v2921_v14 = vadd.f32 %v2911_v52, %v10309_v33  ;;  %v8414_v54 = vpop.f32.mrf.mxu0 }
 0x821   :  { %v8236_v22 = vpop.f32.mrf.mxu1 }
 0x822   :  { %v3529_v31 = vpop.f32.mrf.mxu0  ;;  %v10498_v57 = vadd.f32 %v3147_v23, %v2921_v14 }
 0x823   :  { %v2916_v58 = vpop.f32.mrf.mxu1 }
 0x824   :  { %v2922_v59 = vadd.f32 %v2916_v58, %v10313_v41  ;;  %v8417_v61 = vpop.f32.mrf.mxu0 }
 0x825   :  { %8419 = vmatpush3.msra.mxu0 %v8417_v61  ;;  %v8239_v0 = vpop.f32.mrf.mxu1 }
 0x826   :  { %v3539_v27 = vpop.f32.mrf.mxu0  ;;  %8420 = vmatprep.subr.mxu0 %v8948_v6  ;;  %v10502_v2 = vadd.f32 %v3152_v29, %v2922_v59 }
 0x827   :  { %8421 = vmatpush3.msra.mxu0 %v3539_v27  ;;  %v10504_v3 = vpop.f32.mrf.mxu1 }
 0x828   :  { %8422 = vmatprep.subr.mxu0 %v8948_v6 }
 0x829   :  { %8423 = vmatpush3.msra.mxu0 %v8414_v54  ;;  %v10507_v33 = vpop.f32.mrf.mxu1 }
 0x82a   :  { %8424 = vmatprep.subr.mxu0 %v8948_v6 }
 0x82b   :  { %8425 = vmatpush3.msra.mxu0 %v3529_v31  ;;  %v10510_v41 = vpop.f32.mrf.mxu1 }
 0x82c   :  { %8426 = vmatprep.subr.mxu0 %v8948_v6 }
 0x82d   :  { %8427 = vmatpush3.msra.mxu0 %v8411_v44  ;;  %v10513_v4 = vpop.f32.mrf.mxu1 }
 0x82e   :  { %8428 = vmatprep.subr.mxu0 %v8948_v6 }
 0x82f   :  { %8429 = vmatpush3.msra.mxu0 %v3519_v48  ;;  %v10516_v5 = vpop.f32.mrf.mxu1 }
 0x830   :  { %8430 = vmatprep.subr.mxu0 %v8948_v6 }
 0x831   :  { %8431 = vmatpush3.msra.mxu0 %v8408_v42  ;;  %v10519_v9 = vpop.f32.mrf.mxu1  ;;  %v3636_v42 = vld [vmem:[%s11642_s4 + $0x1c8] sm:$0xff] }
 0x832   :  { %8432 = vmatprep.subr.mxu0 %v8948_v6 }
 0x833   :  { %8433 = vmatpush3.msra.mxu0 %v3509_v8  ;;  %v10522_v10 = vpop.f32.mrf.mxu1  ;;  %v6378_v8 = vld [vmem:[%s11644_s3 + $0x130] sm:$0x3] }
 0x834   :  { %8434 = vmatprep.subr.mxu0 %v8948_v6 }
 0x835   :  { %8435 = vmatpush3.msra.mxu0 %v8405_v39  ;;  %v10525_v11 = vpop.f32.mrf.mxu1  ;;  %v3637_v39 = vld [vmem:[%s11642_s4 + $0x1d0] sm:$0xff] }
 0x836   :  { %8436 = vmatprep.subr.mxu0 %v8948_v6 }
 0x837   :  { %8437 = vmatpush3.msra.mxu0 %v3499_v63  ;;  %v8335_v15 = vpop.f32.mrf.mxu1  ;;  %v6377_v63 = vld [vmem:[%s11644_s3 + $0x128] sm:$0xff] }
 0x838   :  { %8438 = vmatprep.subr.mxu0 %v8948_v6 }
 0x839   :  { %8439 = vmatpush3.msra.mxu0 %v8402_v36  ;;  %v3273_v38 = vpop.f32.mrf.mxu1  ;;  %v6376_v36 = vld [vmem:[%s11644_s3 + $0x120] sm:$0xff] }
 0x83a   :  { %8440 = vmatprep.subr.mxu0 %v8948_v6 }
 0x83b   :  { %8441 = vmatpush3.msra.mxu0 %v3489_v37  ;;  %v8338_v18 = vpop.f32.mrf.mxu1  ;;  %v3638_v37 = vld [vmem:[%s11642_s4 + $0x1d8] sm:$0xff] }
 0x83c   :  { %8442 = vmatprep.subr.mxu0 %v8948_v6 }
 0x83d   :  { %8443 = vmatpush3.msra.mxu0 %v8399_v62  ;;  %v3283_v46 = vpop.f32.mrf.mxu1  ;;  %v3872_v62 = vld [vmem:[%s11642_s4 + $0x1e8] sm:$0xff] }
 0x83e   :  { %8444 = vmatprep.subr.mxu0 %v8948_v6 }
 0x83f   :  { %8445 = vmatpush3.msra.mxu0 %v3479_v34  ;;  %v8341_v53 = vpop.f32.mrf.mxu1  ;;  %v3871_v34 = vld [vmem:[%s11642_s4 + $0x1e0] sm:$0xff] }
 0x840   :  { %8446 = vmatprep.subr.mxu0 %v8948_v6 }
 0x841   :  { %8447 = vmatpush3.msra.mxu0 %v10490_v32  ;;  %v3293_v20 = vpop.f32.mrf.mxu1  ;;  %v3873_v32 = vld [vmem:[%s11642_s4 + $0x1f0] sm:$0xff] }
 0x842   :  { %8448 = vmatprep.subr.mxu0 %v8948_v6 }
 0x843   :  { %8449 = vmatpush3.msra.mxu0 %v10492_v56  ;;  %v8344_v23 = vpop.f32.mrf.mxu1  ;;  %v6397_v56 = vld [vmem:[%s11644_s3 + $0x148] sm:$0x3] }
 0x844   :  { %8451 = vmatmul.mubr.f32.vlgmr.msra.gmra.mxu0 %v6395_v21  ;;  %8346 = vmatpush3.msra.mxu1 %v8344_v23  ;;  %v6433_v23 = vld [vmem:[%s11644_s3 + $0x168] sm:$0xff] }
 0x845   :  { %v3303_v29 = vpop.f32.mrf.mxu1  ;;  %8347 = vmatprep.subr.mxu1 %v8948_v6  ;;  %8453 = vmatprep.mubr.msk.f32.mxu0 %vm8949_vm1, %v8948_v6 }
 0x846   :  { %8348 = vmatpush3.msra.mxu1 %v3303_v29  ;;  %8532 = vmatprep.subr.mxu0 %v3874_v26 }
 0x847   :  { %8349 = vmatprep.subr.mxu1 %v8948_v6  ;;  %8533 = vmatpush3.msra.mxu0 %v3874_v26 }
 0x848   :  { %8454 = vmatmul.mubr.f32.gmra.mxu0 %v6396_v49  ;;  %8350 = vmatpush3.msra.mxu1 %v8341_v53  ;;  %v6434_v49 = vld [vmem:[%s11644_s3 + $0x170] sm:$0xff] }
 0x849   :  { %8351 = vmatprep.subr.mxu1 %v8948_v6  ;;  %8534 = vmatprep.subr.mxu0 %v3873_v32 }
 0x84a   :  { %8352 = vmatpush3.msra.mxu1 %v3293_v20  ;;  %8456 = vmatprep.mubr.msk.f32.mxu0 %vm8949_vm1, %v8948_v6 }
 0x84b   :  { %8535 = vmatpush3.msra.mxu0 %v3873_v32  ;;  %8353 = vmatprep.subr.mxu1 %v8948_v6  ;;  %v6435_v32 = vld [vmem:[%s11644_s3 + $0x178] sm:$0x3] }
 0x84c   :  { %8457 = vmatmul.mubr.f32.gmra.mxu0 %v6397_v56  ;;  %8536 = vmatprep.subr.mxu0 %v3872_v62  ;;  %v6414_v56 = vld [vmem:[%s11644_s3 + $0x150] sm:$0xff] }
 0x84d   :  { %8354 = vmatpush3.msra.mxu1 %v8338_v18  ;;  %8537 = vmatpush3.msra.mxu0 %v3872_v62  ;;  %v4124_v62 = vld [vmem:[%s11645_s7 + $0x38] sm:$0xff] }
 0x84e   :  { %8540 = vmatprep.mubr.msk.f32.mxu0 %vm292_vm0, %v9248_v12  ;;  %8355 = vmatprep.subr.mxu1 %v8948_v6 }
 0x84f   :  { %8538 = vmatprep.subr.mxu0 %v3871_v34  ;;  %8356 = vmatpush3.msra.mxu1 %v3283_v46 }
 0x850   :  { %8539 = vmatpush3.msra.mxu0 %v3871_v34  ;;  %8357 = vmatprep.subr.mxu1 %v8948_v6  ;;  %v4123_v34 = vld [vmem:[%s11645_s7 + $0x30] sm:$0xff] }
 0x851   :  { %8541 = vmatmul.mubr.msk.f32.vlgmr.msra.gmra.mxu0 %vm292_vm0, %v9253_v17  ;;  %8358 = vmatpush3.msra.mxu1 %v8335_v15 }
 0x852   :  { %8543 = vmatprep.mubr.msk.f32.mxu0 %vm292_vm0, %v9264_v24  ;;  %8359 = vmatprep.subr.mxu1 %v8948_v6 }
 0x853   :  { %8360 = vmatpush3.msra.mxu1 %v3273_v38  ;;  %8564 = vmatprep.subr.mxu0 %v8948_v6 }
 0x854   :  { %8361 = vmatprep.subr.mxu1 %v8948_v6 }
 0x855   :  { %8544 = vmatmul.mubr.msk.f32.gmra.mxu0 %vm292_vm0, %v9272_v30  ;;  %8362 = vmatpush3.msra.mxu1 %v10522_v10 }
 0x856   :  { %8546 = vmatprep.mubr.msk.f32.mxu0 %vm292_vm0, %v9277_v35  ;;  %8363 = vmatprep.subr.mxu1 %v8948_v6 }
 0x857   :  { %8364 = vmatpush3.msra.mxu1 %v10525_v11 }
 0x858   :  { %8365 = vmatprep.subr.mxu1 %v8948_v6 }
 0x859   :  { %8547 = vmatmul.mubr.msk.f32.gmra.mxu0 %vm292_vm0, %v9282_v40  ;;  %8366 = vmatpush3.msra.mxu1 %v10516_v5 }
 0x85a   :  { %8549 = vmatprep.mubr.msk.f32.mxu0 %vm292_vm0, %v9287_v45  ;;  %8367 = vmatprep.subr.mxu1 %v8948_v6 }
 0x85b   :  { %8368 = vmatpush3.msra.mxu1 %v10519_v9 }
 0x85c   :  { %8369 = vmatprep.subr.mxu1 %v8948_v6 }
 0x85d   :  { %8550 = vmatmul.mubr.msk.f32.gmra.mxu0 %vm292_vm0, %v9292_v50  ;;  %8370 = vmatpush3.msra.mxu1 %v10510_v41 }
 0x85e   :  { %8552 = vmatprep.mubr.msk.f32.mxu0 %vm292_vm0, %v9297_v55  ;;  %8371 = vmatprep.subr.mxu1 %v8948_v6 }
 0x85f   :  { %8372 = vmatpush3.msra.mxu1 %v10513_v4 }
 0x860   :  { %8373 = vmatprep.subr.mxu1 %v8948_v6 }
 0x861   :  { %8553 = vmatmul.mubr.msk.f32.gmra.mxu0 %vm292_vm0, %v9302_v60  ;;  %8374 = vmatpush3.msra.mxu1 %v10504_v3 }
 0x862   :  { %8555 = vmatprep.mubr.msk.f32.mxu0 %vm292_vm0, %v9307_v1  ;;  %8375 = vmatprep.subr.mxu1 %v8948_v6 }
 0x863   :  { %8376 = vmatpush3.msra.mxu1 %v10507_v33 }
 0x864   :  { %8378 = vmatmul.mubr.f32.vlgmr.msra.gmra.mxu1 %v6376_v36  ;;  %8459 = vmatprep.subr.mxu1 %v3638_v37  ;;  %v6415_v36 = vld [vmem:[%s11644_s3 + $0x158] sm:$0xff] }
 0x865   :  { %8556 = vmatmul.mubr.msk.f32.gmra.mxu0 %vm292_vm0, %v9312_v7  ;;  %8380 = vmatprep.mubr.msk.f32.mxu1 %vm8949_vm1, %v8948_v6 }
 0x866   :  { %8558 = vmatprep.mubr.msk.f32.mxu0 %vm292_vm0, %v9317_v13  ;;  %8460 = vmatpush3.msra.mxu1 %v3638_v37  ;;  %v4122_v37 = vld [vmem:[%s11645_s7 + $0x28] sm:$0xff] }
 0x867   :  { %8461 = vmatprep.subr.mxu1 %v3637_v39 }
 0x868   :  { %8381 = vmatmul.mubr.f32.gmra.mxu1 %v6377_v63  ;;  %v6416_v63 = vld [vmem:[%s11644_s3 + $0x160] sm:$0x3] }
 0x869   :  { %8559 = vmatmul.mubr.msk.f32.gmra.mxu0 %vm292_vm0, %v9322_v19  ;;  %8383 = vmatprep.mubr.msk.f32.mxu1 %vm8949_vm1, %v8948_v6 }
 0x86a   :  { %8561 = vmatprep.mubr.msk.f32.mxu0 %vm292_vm0, %v9327_v25  ;;  %8462 = vmatpush3.msra.mxu1 %v3637_v39  ;;  %v4121_v39 = vld [vmem:[%s11645_s7 + $0x20] sm:$0xff] }
 0x86b   :  { %8463 = vmatprep.subr.mxu1 %v3636_v42 }
 0x86c   :  { %8384 = vmatmul.mubr.f32.gmra.mxu1 %v6378_v8  ;;  %v4119_v8 = vld [vmem:[%s11645_s7 + $0x10] sm:$0xff] }
 0x86d   :  { %8562 = vmatmul.mubr.msk.f32.gmra.mxu0 %vm292_vm0, %v9332_v28  ;;  %8464 = vmatpush3.msra.mxu1 %v3636_v42  ;;  %v4120_v42 = vld [vmem:[%s11645_s7 + $0x18] sm:$0xff] }
 0x86e   :  { %8467 = vmatprep.mubr.msk.f32.mxu1 %vm292_vm0, %v9248_v12  ;;  %8465 = vmatprep.subr.mxu1 %v3635_v16 }
 0x86f   :  { %8466 = vmatpush3.msra.mxu1 %v3635_v16  ;;  %8596 = vmatprep.mubr.msk.f32.mxu0 %vm8949_vm1, %v8948_v6  ;;  %v4118_v16 = vld [vmem:[%s11645_s7 + $0x8] sm:$0xff] }
 0x870   :  { %8468 = vmatmul.mubr.msk.f32.vlgmr.msra.gmra.mxu1 %vm292_vm0, %v9253_v17  ;;  %8491 = vmatprep.subr.mxu1 %v8948_v6 }
 0x871   :  { %8470 = vmatprep.mubr.msk.f32.mxu1 %vm292_vm0, %v9264_v24 }
 0x874   :  { %8471 = vmatmul.mubr.msk.f32.gmra.mxu1 %vm292_vm0, %v9272_v30 }
 0x875   :  { %8473 = vmatprep.mubr.msk.f32.mxu1 %vm292_vm0, %v9277_v35 }
 0x878   :  { %8474 = vmatmul.mubr.msk.f32.gmra.mxu1 %vm292_vm0, %v9282_v40 }
 0x879   :  { %8476 = vmatprep.mubr.msk.f32.mxu1 %vm292_vm0, %v9287_v45 }
 0x87c   :  { %8477 = vmatmul.mubr.msk.f32.gmra.mxu1 %vm292_vm0, %v9292_v50 }
 0x87d   :  { %8479 = vmatprep.mubr.msk.f32.mxu1 %vm292_vm0, %v9297_v55 }
 0x880   :  { %8480 = vmatmul.mubr.msk.f32.gmra.mxu1 %vm292_vm0, %v9302_v60 }
 0x881   :  { %8482 = vmatprep.mubr.msk.f32.mxu1 %vm292_vm0, %v9307_v1 }
 0x884   :  { %8483 = vmatmul.mubr.msk.f32.gmra.mxu1 %vm292_vm0, %v9312_v7 }
 0x885   :  { %8485 = vmatprep.mubr.msk.f32.mxu1 %vm292_vm0, %v9317_v13 }
 0x888   :  { %8486 = vmatmul.mubr.msk.f32.gmra.mxu1 %vm292_vm0, %v9322_v19 }
 0x889   :  { %8488 = vmatprep.mubr.msk.f32.mxu1 %vm292_vm0, %v9327_v25 }
 0x88c   :  { %8489 = vmatmul.mubr.msk.f32.gmra.mxu1 %vm292_vm0, %v9332_v28 }
 0x88d   :  { %8523 = vmatprep.mubr.msk.f32.mxu1 %vm8949_vm1, %v8948_v6 }
 0x904   :  { %v3614_v12 = vpop.f32.mrf.mxu0 }
 0x906   :  { %v8452_v17 = vpop.f32.mrf.mxu0 }
 0x908   :  { %v3619_v24 = vpop.f32.mrf.mxu0 }
 0x90a   :  { %v8455_v30 = vpop.f32.mrf.mxu0 }
 0x90c   :  { %v3624_v35 = vpop.f32.mrf.mxu0 }
 0x90e   :  { %v8458_v40 = vpop.f32.mrf.mxu0 }
 0x911   :  { %v10679_v45 = vpop.f32.mrf.mxu0 }
 0x913   :  { %v10681_v50 = vpop.f32.mrf.mxu0 }
 0x915   :  { %v8545_v55 = vpop.f32.mrf.mxu0 }
 0x917   :  { %v3951_v60 = vpop.f32.mrf.mxu0 }
 0x919   :  { %v8548_v1 = vpop.f32.mrf.mxu0 }
 0x91b   :  { %v3961_v7 = vpop.f32.mrf.mxu0 }
 0x91d   :  { %v8551_v13 = vpop.f32.mrf.mxu0 }
 0x91f   :  { %v3971_v19 = vpop.f32.mrf.mxu0 }
 0x921   :  { %v8554_v25 = vpop.f32.mrf.mxu0 }
 0x923   :  { %v3981_v28 = vpop.f32.mrf.mxu0 }
 0x924   :  { %v3378_v43 = vpop.f32.mrf.mxu1 }
 0x925   :  { %v3392_v44 = vadd.f32 %v3378_v43, %v10495_v51  ;;  %v8557_v47 = vpop.f32.mrf.mxu0 }
 0x926   :  { %v8379_v48 = vpop.f32.mrf.mxu1 }
 0x927   :  { %v3991_v52 = vpop.f32.mrf.mxu0  ;;  %v10684_v14 = vadd.f32 %v3614_v12, %v3392_v44  ;;  %v4117_v12 = vld [vmem:[%s11645_s7] sm:$0xff] }
 0x928   :  { %v3383_v54 = vpop.f32.mrf.mxu1 }
 0x929   :  { %v3393_v22 = vadd.f32 %v3383_v54, %v10498_v57  ;;  %v8560_v31 = vpop.f32.mrf.mxu0  ;;  %v4223_v54 = vld [vmem:[%s11645_s7 + $0x70] sm:$0xff] }
 0x92a   :  { %v8382_v58 = vpop.f32.mrf.mxu1 }
 0x92b   :  { %v4001_v59 = vpop.f32.mrf.mxu0  ;;  %v10687_v61 = vadd.f32 %v3619_v24, %v3393_v22 }
 0x92c   :  { %v3388_v0 = vpop.f32.mrf.mxu1 }
 0x92d   :  { %v3394_v27 = vadd.f32 %v3388_v0, %v10502_v2  ;;  %v8563_v3 = vpop.f32.mrf.mxu0  ;;  %v4221_v0 = vld [vmem:[%s11645_s7 + $0x60] sm:$0xff] }
 0x92e   :  { %8565 = vmatpush3.msra.mxu0 %v8563_v3  ;;  %v8385_v33 = vpop.f32.mrf.mxu1  ;;  %v4220_v3 = vld [vmem:[%s11645_s7 + $0x58] sm:$0xff] }
 0x92f   :  { %v4011_v51 = vpop.f32.mrf.mxu0  ;;  %8566 = vmatprep.subr.mxu0 %v8948_v6  ;;  %v10691_v41 = vadd.f32 %v3624_v35, %v3394_v27  ;;  %v4219_v33 = vld [vmem:[%s11645_s7 + $0x50] sm:$0xff] }
 0x930   :  { %8567 = vmatpush3.msra.mxu0 %v4011_v51  ;;  %v10693_v4 = vpop.f32.mrf.mxu1  ;;  %v4218_v51 = vld [vmem:[%s11645_s7 + $0x48] sm:$0xff] }
 0x931   :  { %8568 = vmatprep.subr.mxu0 %v8948_v6 }
 0x932   :  { %8569 = vmatpush3.msra.mxu0 %v8560_v31  ;;  %v10696_v57 = vpop.f32.mrf.mxu1 }
 0x933   :  { %8570 = vmatprep.subr.mxu0 %v8948_v6 }
 0x934   :  { %8571 = vmatpush3.msra.mxu0 %v4001_v59  ;;  %v10699_v2 = vpop.f32.mrf.mxu1  ;;  %v4222_v59 = vld [vmem:[%s11645_s7 + $0x68] sm:$0xff] }
 0x935   :  { %8572 = vmatprep.subr.mxu0 %v8948_v6 }
 0x936   :  { %8573 = vmatpush3.msra.mxu0 %v8557_v47  ;;  %v10702_v5 = vpop.f32.mrf.mxu1  ;;  %v4224_v47 = vld [vmem:[%s11645_s7 + $0x78] sm:$0xff] }
 0x937   :  { %8574 = vmatprep.subr.mxu0 %v8948_v6 }
 0x938   :  { %8575 = vmatpush3.msra.mxu0 %v3991_v52  ;;  %v8475_v9 = vpop.f32.mrf.mxu1 }
 0x939   :  { %8576 = vmatprep.subr.mxu0 %v8948_v6 }
 0x93a   :  { %8577 = vmatpush3.msra.mxu0 %v8554_v25  ;;  %v3725_v10 = vpop.f32.mrf.mxu1 }
 0x93b   :  { %8578 = vmatprep.subr.mxu0 %v8948_v6 }
 0x93c   :  { %8579 = vmatpush3.msra.mxu0 %v3981_v28  ;;  %v8478_v11 = vpop.f32.mrf.mxu1 }
 0x93d   :  { %8580 = vmatprep.subr.mxu0 %v8948_v6 }
 0x93e   :  { %8581 = vmatpush3.msra.mxu0 %v8551_v13  ;;  %v3735_v15 = vpop.f32.mrf.mxu1 }
 0x93f   :  { %8582 = vmatprep.subr.mxu0 %v8948_v6 }
 0x940   :  { %8583 = vmatpush3.msra.mxu0 %v3971_v19  ;;  %v8481_v38 = vpop.f32.mrf.mxu1 }
 0x941   :  { %8584 = vmatprep.subr.mxu0 %v8948_v6 }
 0x942   :  { %8585 = vmatpush3.msra.mxu0 %v8548_v1  ;;  %v3745_v18 = vpop.f32.mrf.mxu1 }
 0x943   :  { %8586 = vmatprep.subr.mxu0 %v8948_v6 }
 0x944   :  { %8587 = vmatpush3.msra.mxu0 %v3961_v7  ;;  %v8484_v46 = vpop.f32.mrf.mxu1 }
 0x945   :  { %8588 = vmatprep.subr.mxu0 %v8948_v6 }
 0x946   :  { %8589 = vmatpush3.msra.mxu0 %v8545_v55  ;;  %v3755_v53 = vpop.f32.mrf.mxu1 }
 0x947   :  { %8590 = vmatprep.subr.mxu0 %v8948_v6 }
 0x948   :  { %8591 = vmatpush3.msra.mxu0 %v3951_v60  ;;  %v8487_v20 = vpop.f32.mrf.mxu1  ;;  %v6452_v60 = vld [vmem:[%s11646_s5] ss:$0 sm:$0xff] }
 0x949   :  { %8592 = vmatprep.subr.mxu0 %v8948_v6 }
 0x94a   :  { %8593 = vmatpush3.msra.mxu0 %v10679_v45  ;;  %v3765_v21 = vpop.f32.mrf.mxu1 }
 0x94b   :  { %8594 = vmatprep.subr.mxu0 %v8948_v6 }
 0x94c   :  { %8595 = vmatpush3.msra.mxu0 %v10681_v50  ;;  %v8490_v26 = vpop.f32.mrf.mxu1 }
 0x94d   :  { %8492 = vmatpush3.msra.mxu1 %v8490_v26  ;;  %8597 = vmatmul.mubr.f32.vlgmr.msra.gmra.mxu0 %v6433_v23  ;;  %v4629_v23 = vld [vmem:[%s11645_s7 + $0xc8] sm:$0xff]  ;;  %v4628_v26 = vld [vmem:[%s11645_s7 + $0xc0] sm:$0xff] }
 0x94e   :  { %v3775_v29 = vpop.f32.mrf.mxu1  ;;  %8493 = vmatprep.subr.mxu1 %v8948_v6  ;;  %8599 = vmatprep.mubr.msk.f32.mxu0 %vm8949_vm1, %v8948_v6 }
 0x94f   :  { %8494 = vmatpush3.msra.mxu1 %v3775_v29  ;;  %8655 = vmatprep.subr.mxu0 %v8948_v6 }
 0x950   :  { %8495 = vmatprep.subr.mxu1 %v8948_v6 }
 0x951   :  { %8496 = vmatpush3.msra.mxu1 %v8487_v20  ;;  %8600 = vmatmul.mubr.f32.gmra.mxu0 %v6434_v49  ;;  %v4631_v20 = vld [vmem:[%s11645_s7 + $0xd8] sm:$0xff] }
 0x952   :  { %8497 = vmatprep.subr.mxu1 %v8948_v6  ;;  %8602 = vmatprep.mubr.msk.f32.mxu0 %vm8949_vm1, %v8948_v6 }
 0x953   :  { %8498 = vmatpush3.msra.mxu1 %v3765_v21  ;;  %v4630_v21 = vld [vmem:[%s11645_s7 + $0xd0] sm:$0xff] }
 0x954   :  { %8499 = vmatprep.subr.mxu1 %v8948_v6 }
 0x955   :  { %8500 = vmatpush3.msra.mxu1 %v8484_v46  ;;  %8603 = vmatmul.mubr.f32.gmra.mxu0 %v6435_v32  ;;  %v4633_v46 = vld [vmem:[%s11645_s7 + $0xe8] sm:$0xff] }
 0x956   :  { %8501 = vmatprep.subr.mxu1 %v8948_v6  ;;  %8661 = vmatprep.mubr.msk.f32.mxu0 %vm8949_vm1, %v8948_v6 }
 0x957   :  { %8502 = vmatpush3.msra.mxu1 %v3755_v53  ;;  %v4632_v53 = vld [vmem:[%s11645_s7 + $0xe0] sm:$0xff] }
 0x958   :  { %8503 = vmatprep.subr.mxu1 %v8948_v6 }
 0x959   :  { %8504 = vmatpush3.msra.mxu1 %v8481_v38  ;;  %v4635_v38 = vld [vmem:[%s11645_s7 + $0xf8] sm:$0xff] }
 0x95a   :  { %8505 = vmatprep.subr.mxu1 %v8948_v6 }
 0x95b   :  { %8506 = vmatpush3.msra.mxu1 %v3745_v18  ;;  %v4634_v18 = vld [vmem:[%s11645_s7 + $0xf0] sm:$0xff] }
 0x95c   :  { %8507 = vmatprep.subr.mxu1 %v8948_v6 }
 0x95d   :  { %8508 = vmatpush3.msra.mxu1 %v8478_v11  ;;  %v4462_v11 = vld [vmem:[%s11645_s7 + $0x88] sm:$0xff] }
 0x95e   :  { %8509 = vmatprep.subr.mxu1 %v8948_v6 }
 0x95f   :  { %8510 = vmatpush3.msra.mxu1 %v3735_v15  ;;  %v4461_v15 = vld [vmem:[%s11645_s7 + $0x80] sm:$0xff] }
 0x960   :  { %8511 = vmatprep.subr.mxu1 %v8948_v6 }
 0x961   :  { %8512 = vmatpush3.msra.mxu1 %v8475_v9  ;;  %v4464_v9 = vld [vmem:[%s11645_s7 + $0x98] sm:$0xff] }
 0x962   :  { %8513 = vmatprep.subr.mxu1 %v8948_v6 }
 0x963   :  { %8514 = vmatpush3.msra.mxu1 %v3725_v10  ;;  %v4463_v10 = vld [vmem:[%s11645_s7 + $0x90] sm:$0xff] }
 0x964   :  { %8515 = vmatprep.subr.mxu1 %v8948_v6 }
 0x965   :  { %8516 = vmatpush3.msra.mxu1 %v10699_v2  ;;  %v4466_v2 = vld [vmem:[%s11645_s7 + $0xa8] sm:$0xff] }
 0x966   :  { %8517 = vmatprep.subr.mxu1 %v8948_v6 }
 0x967   :  { %8518 = vmatpush3.msra.mxu1 %v10702_v5  ;;  %v4465_v5 = vld [vmem:[%s11645_s7 + $0xa0] sm:$0xff] }
 0x968   :  { %8519 = vmatprep.subr.mxu1 %v8948_v6 }
 0x969   :  { %8520 = vmatpush3.msra.mxu1 %v10693_v4  ;;  %v4468_v4 = vld [vmem:[%s11645_s7 + $0xb8] sm:$0xff] }
 0x96a   :  { %8521 = vmatprep.subr.mxu1 %v8948_v6 }
 0x96b   :  { %8522 = vmatpush3.msra.mxu1 %v10696_v57  ;;  %v4467_v57 = vld [vmem:[%s11645_s7 + $0xb0] sm:$0xff] }
 0x96c   :  { %8524 = vmatmul.mubr.f32.vlgmr.msra.gmra.mxu1 %v6414_v56  ;;  %8605 = vmatprep.subr.mxu1 %v8948_v6 }
 0x96d   :  { %8526 = vmatprep.mubr.msk.f32.mxu1 %vm8949_vm1, %v8948_v6  ;;  %8606 = vmatpush3.msra.mxu1 %v4124_v62 }
 0x96e   :  { %8607 = vmatprep.subr.mxu1 %v8948_v6 }
 0x96f   :  { %8608 = vmatpush3.msra.mxu1 %v4123_v34 }
 0x970   :  { %8527 = vmatmul.mubr.f32.gmra.mxu1 %v6415_v36  ;;  %8609 = vmatprep.subr.mxu1 %v8948_v6 }
 0x971   :  { %8529 = vmatprep.mubr.msk.f32.mxu1 %vm8949_vm1, %v8948_v6  ;;  %8610 = vmatpush3.msra.mxu1 %v4122_v37 }
 0x972   :  { %8611 = vmatprep.subr.mxu1 %v8948_v6 }
 0x973   :  { %8612 = vmatpush3.msra.mxu1 %v4121_v39 }
 0x974   :  { %8530 = vmatmul.mubr.f32.gmra.mxu1 %v6416_v63  ;;  %8613 = vmatprep.subr.mxu1 %v8948_v6 }
 0x975   :  { %8621 = vmatprep.mubr.msk.f32.mxu1 %vm8949_vm1, %v8948_v6  ;;  %8614 = vmatpush3.msra.mxu1 %v4120_v42 }
 0x976   :  { %8615 = vmatprep.subr.mxu1 %v8948_v6 }
 0x977   :  { %8616 = vmatpush3.msra.mxu1 %v4119_v8 }
 0x978   :  { %8617 = vmatprep.subr.mxu1 %v8948_v6 }
 0x979   :  { %8618 = vmatpush3.msra.mxu1 %v4118_v16  ;;  %v6456_v16 = vld [vmem:[%s11647_s6 + $0x2] sm:$0x3] }
 0x97a   :  { %8619 = vmatprep.subr.mxu1 %v8948_v6 }
 0x97b   :  { %8620 = vmatpush3.msra.mxu1 %v4117_v12 }
 0x97c   :  { %8630 = vmatprep.subr.mxu1 %v8948_v6 }
 0xa0d   :  { %v4086_v17 = vpop.f32.mrf.mxu0 }
 0xa0f   :  { %v8598_v24 = vpop.f32.mrf.mxu0 }
 0xa11   :  { %v4091_v30 = vpop.f32.mrf.mxu0 }
 0xa13   :  { %v8601_v35 = vpop.f32.mrf.mxu0 }
 0xa15   :  { %v4096_v40 = vpop.f32.mrf.mxu0 }
 0xa17   :  { %v8604_v45 = vpop.f32.mrf.mxu0 }
 0xa2c   :  { %v3850_v50 = vpop.f32.mrf.mxu1 }
 0xa2d   :  { %v3864_v55 = vadd.f32 %v3850_v50, %v10684_v14  ;;  %v6464_v50 = vld [vmem:[%s11647_s6 + $0x4] sm:$0x3] }
 0xa2e   :  { %v8525_v1 = vpop.f32.mrf.mxu1 }
 0xa2f   :  { %v4100_v7 = vadd.f32 %v4086_v17, %v3864_v55  ;;  %v4116_v17 = vld [vmem:[%s11647_s6] sm:$0x3] }
 0xa30   :  { %v3855_v13 = vpop.f32.mrf.mxu1 }
 0xa31   :  { %v4110_v19 = vadd.f32 %v6452_v60, %v4100_v7  ;;  %v3865_v25 = vadd.f32 %v3855_v13, %v10687_v61 }
 0xa32   :  { %v8528_v28 = vpop.f32.mrf.mxu1 }
 0xa33   :  { %v10805_v43 = vmax.f32 %v4110_v19, 0.0  ;;  %v4101_v44 = vadd.f32 %v4091_v30, %v3865_v25  ;;  %v6470_v25 = vld [vmem:[%s11647_s6 + $0x6] sm:$0x3]  ;;  %v4802_v28 = vld [vmem:[%s11645_s7 + $0x138] sm:$0xff] }
 0xa34   :  { %v3860_v48 = vpop.f32.mrf.mxu1 }
 0xa35   :  { %v4111_v52 = vadd.f32 %v6452_v60, %v4101_v44  ;;  %v3866_v14 = vadd.f32 %v3860_v48, %v10691_v41  ;;  %8622 = vmatmul.mubr.msk.f32.vlgmr.msra.gmra.mxu1 %vm4125_vm2, %v10805_v43  ;;  %v4217_v41 = vld [vmem:[%s11645_s7 + $0x40] sm:$0xff]  ;;  %v4801_v44 = vld [vmem:[%s11645_s7 + $0x130] sm:$0xff] }
 0xa36   :  { %8631 = vmatpush3.msra.mxu1 %v4224_v47  ;;  %v8531_v22 = vpop.f32.mrf.mxu1  ;;  %8624 = vmatprep.mubr.msk.f32.mxu1 %vm8949_vm1, %v8948_v6  ;;  %v4800_v47 = vld [vmem:[%s11645_s7 + $0x128] sm:$0xff]  ;;  %v4799_v48 = vld [vmem:[%s11645_s7 + $0x120] sm:$0xff] }
 0xa37   :  { %v10818_v31 = vmax.f32 %v4111_v52, 0.0  ;;  %v4102_v58 = vadd.f32 %v4096_v40, %v3866_v14  ;;  %8632 = vmatprep.subr.mxu1 %v8948_v6  ;;  %v4798_v52 = vld [vmem:[%s11645_s7 + $0x118] sm:$0xff]  ;;  %v4797_v14 = vld [vmem:[%s11645_s7 + $0x110] sm:$0xff]  ;;  %v4795_v22 = vld [vmem:[%s11645_s7 + $0x100] sm:$0xff] }
 0xa38   :  { %8633 = vmatpush3.msra.mxu1 %v4223_v54  ;;  %v4796_v54 = vld [vmem:[%s11645_s7 + $0x108] sm:$0xff] }
 0xa39   :  { %v4112_v61 = vadd.f32 %v6452_v60, %v4102_v58  ;;  %8634 = vmatprep.subr.mxu1 %v8948_v6  ;;  %8625 = vmatmul.mubr.msk.f32.gmra.mxu1 %vm4125_vm2, %v10818_v31 }
 0xa3a   :  { %8635 = vmatpush3.msra.mxu1 %v4222_v59  ;;  %8627 = vmatprep.mubr.msk.f32.mxu1 %vm8949_vm1, %v8948_v6 }
 0xa3b   :  { %v10832_v27 = vmax.f32 %v4112_v61, 0.0  ;;  %8636 = vmatprep.subr.mxu1 %v8948_v6 }
 0xa3c   :  { %8637 = vmatpush3.msra.mxu1 %v4221_v0 }
 0xa3d   :  { %8638 = vmatprep.subr.mxu1 %v8948_v6  ;;  %8628 = vmatmul.mubr.msk.f32.gmra.mxu1 %vm4125_vm2, %v10832_v27 }
 0xa3e   :  { %8639 = vmatpush3.msra.mxu1 %v4220_v3  ;;  %8646 = vmatprep.mubr.msk.f32.mxu1 %vm8949_vm1, %v8948_v6 }
 0xa3f   :  { %8640 = vmatprep.subr.mxu1 %v8948_v6 }
 0xa40   :  { %8641 = vmatpush3.msra.mxu1 %v4219_v33 }
 0xa41   :  { %8642 = vmatprep.subr.mxu1 %v8948_v6 }
 0xa42   :  { %8643 = vmatpush3.msra.mxu1 %v4218_v51 }
 0xa43   :  { %8644 = vmatprep.subr.mxu1 %v8948_v6 }
 0xa44   :  { %8645 = vmatpush3.msra.mxu1 %v4217_v41 }
 0xa45   :  { %8647 = vmatmul.mubr.msk.f32.vlgmr.msra.gmra.mxu1 %vm4125_vm2, %v10805_v43  ;;  %8673 = vmatprep.subr.mxu1 %v8948_v6 }
 0xa46   :  { %8674 = vmatpush3.msra.mxu1 %v4468_v4  ;;  %8649 = vmatprep.mubr.msk.f32.mxu1 %vm8949_vm1, %v8948_v6 }
 0xa47   :  { %8675 = vmatprep.subr.mxu1 %v8948_v6 }
 0xa48   :  { %8676 = vmatpush3.msra.mxu1 %v4467_v57 }
 0xa49   :  { %8650 = vmatmul.mubr.msk.f32.gmra.mxu1 %vm4125_vm2, %v10818_v31  ;;  %8677 = vmatprep.subr.mxu1 %v8948_v6 }
 0xa4a   :  { %8678 = vmatpush3.msra.mxu1 %v4466_v2  ;;  %8652 = vmatprep.mubr.msk.f32.mxu1 %vm8949_vm1, %v8948_v6 }
 0xa4b   :  { %8679 = vmatprep.subr.mxu1 %v8948_v6 }
 0xa4c   :  { %8680 = vmatpush3.msra.mxu1 %v4465_v5 }
 0xa4d   :  { %8653 = vmatmul.mubr.msk.f32.gmra.mxu1 %vm4125_vm2, %v10832_v27  ;;  %8681 = vmatprep.subr.mxu1 %v8948_v6 }
 0xa4e   :  { %8682 = vmatpush3.msra.mxu1 %v4464_v9  ;;  %8689 = vmatprep.mubr.msk.f32.mxu1 %vm8949_vm1, %v8948_v6 }
 0xa4f   :  { %8683 = vmatprep.subr.mxu1 %v8948_v6 }
 0xa50   :  { %8684 = vmatpush3.msra.mxu1 %v4463_v10 }
 0xa51   :  { %8685 = vmatprep.subr.mxu1 %v8948_v6 }
 0xa52   :  { %8686 = vmatpush3.msra.mxu1 %v4462_v11 }
 0xa53   :  { %8687 = vmatprep.subr.mxu1 %v8948_v6 }
 0xa54   :  { %8688 = vmatpush3.msra.mxu1 %v4461_v15 }
 0xa55   :  { %8690 = vmatmul.mubr.msk.f32.vlgmr.msra.gmra.mxu1 %vm4125_vm2, %v10805_v43  ;;  %8707 = vmatprep.subr.mxu1 %v8948_v6 }
 0xa56   :  { %8708 = vmatpush3.msra.mxu1 %v4635_v38  ;;  %8692 = vmatprep.mubr.msk.f32.mxu1 %vm8949_vm1, %v8948_v6 }
 0xa57   :  { %8709 = vmatprep.subr.mxu1 %v8948_v6 }
 0xa58   :  { %8710 = vmatpush3.msra.mxu1 %v4634_v18  ;;  %v6476_v18 = vld [vmem:[%s11647_s6 + $0x8] sm:$0x3] }
 0xa59   :  { %8693 = vmatmul.mubr.msk.f32.gmra.mxu1 %vm4125_vm2, %v10818_v31  ;;  %8711 = vmatprep.subr.mxu1 %v8948_v6 }
 0xa5a   :  { %8712 = vmatpush3.msra.mxu1 %v4633_v46  ;;  %8695 = vmatprep.mubr.msk.f32.mxu1 %vm8949_vm1, %v8948_v6  ;;  %v4969_v46 = vld [vmem:[%s11645_s7 + $0x178] sm:$0xff] }
 0xa5b   :  { %8713 = vmatprep.subr.mxu1 %v8948_v6 }
 0xa5c   :  { %8714 = vmatpush3.msra.mxu1 %v4632_v53  ;;  %v4968_v53 = vld [vmem:[%s11645_s7 + $0x170] sm:$0xff] }
 0xa5d   :  { %8696 = vmatmul.mubr.msk.f32.gmra.mxu1 %vm4125_vm2, %v10832_v27  ;;  %8715 = vmatprep.subr.mxu1 %v8948_v6 }
 0xa5e   :  { %8716 = vmatpush3.msra.mxu1 %v4631_v20  ;;  %8723 = vmatprep.mubr.msk.f32.mxu1 %vm8949_vm1, %v8948_v6  ;;  %v4967_v20 = vld [vmem:[%s11645_s7 + $0x168] sm:$0xff] }
 0xa5f   :  { %8717 = vmatprep.subr.mxu1 %v8948_v6 }
 0xa60   :  { %8718 = vmatpush3.msra.mxu1 %v4630_v21  ;;  %v4966_v21 = vld [vmem:[%s11645_s7 + $0x160] sm:$0xff] }
 0xa61   :  { %8719 = vmatprep.subr.mxu1 %v8948_v6 }
 0xa62   :  { %8720 = vmatpush3.msra.mxu1 %v4629_v23  ;;  %v4965_v23 = vld [vmem:[%s11645_s7 + $0x158] sm:$0xff] }
 0xa63   :  { %8721 = vmatprep.subr.mxu1 %v8948_v6 }
 0xa64   :  { %8722 = vmatpush3.msra.mxu1 %v4628_v26  ;;  %v4964_v26 = vld [vmem:[%s11645_s7 + $0x150] sm:$0xff] }
 0xa65   :  { %8724 = vmatmul.mubr.msk.f32.vlgmr.msra.gmra.mxu1 %vm4125_vm2, %v10805_v43  ;;  %8732 = vmatprep.subr.mxu1 %v8948_v6 }
 0xa66   :  { %8726 = vmatprep.mubr.msk.f32.mxu1 %vm8949_vm1, %v8948_v6 }
 0xa69   :  { %8727 = vmatmul.mubr.msk.f32.gmra.mxu1 %vm4125_vm2, %v10818_v31 }
 0xa6a   :  { %8729 = vmatprep.mubr.msk.f32.mxu1 %vm8949_vm1, %v8948_v6 }
 0xa6d   :  { %8730 = vmatmul.mubr.msk.f32.gmra.mxu1 %vm4125_vm2, %v10832_v27 }
 0xa6e   :  { %8738 = vmatprep.mubr.msk.f32.mxu1 %vm8949_vm1, %v8948_v6 }
 0xaf5   :  { %v4201_v29 = vpop.f32.mrf.mxu1 }
 0xaf7   :  { %v8623_v49 = vpop.f32.mrf.mxu1 }
 0xaf8   :  { %v4962_v49 = vld [vmem:[%s11645_s7 + $0x140] sm:$0xff] }
 0xaf9   :  { %v4206_v32 = vpop.f32.mrf.mxu1 }
 0xafb   :  { %v8626_v56 = vpop.f32.mrf.mxu1 }
 0xafd   :  { %v4211_v62 = vpop.f32.mrf.mxu1 }
 0xaff   :  { %v8629_v34 = vpop.f32.mrf.mxu1 }
 0xb05   :  { %v4291_v36 = vpop.f32.mrf.mxu1 }
 0xb07   :  { %v8648_v37 = vpop.f32.mrf.mxu1 }
 0xb09   :  { %v4296_v39 = vpop.f32.mrf.mxu1 }
 0xb0b   :  { %v8651_v63 = vpop.f32.mrf.mxu1 }
 0xb0d   :  { %v4301_v42 = vpop.f32.mrf.mxu1 }
 0xb0e   :  { %8656 = vmatpush3.msk.msra.mxu0 %vm4309_vm3, %v4301_v42 }
 0xb0f   :  { %v8654_v8 = vpop.f32.mrf.mxu1  ;;  %8657 = vmatprep.subr.mxu0 %v8948_v6 }
 0xb10   :  { %8658 = vmatpush3.msra.mxu0 %v4296_v39  ;;  %v6482_v8 = vld [vmem:[%s11647_s6 + $0xa] sm:$0x3] }
 0xb11   :  { %8659 = vmatprep.subr.mxu0 %v8948_v6 }
 0xb12   :  { %8660 = vmatpush3.msra.mxu0 %v4291_v36 }
 0xb13   :  { %8664 = vmatprep.subr.mxu0 %v8948_v6  ;;  %8662 = vmatmul.mubr.msk.f32.vlgmr.msra.gmra.mxu0 %vm4305_vm4, %v6456_v16  ;;  %v5136_v16 = vld [vmem:[%s11645_s7 + $0x1b8] sm:$0xff] }
 0xb14   :  { %8665 = vmatpush3.msk.msra.mxu0 %vm4309_vm3, %v4211_v62  ;;  %8670 = vmatprep.mubr.msk.f32.mxu0 %vm8949_vm1, %v8948_v6 }
 0xb15   :  { %8666 = vmatprep.subr.mxu0 %v8948_v6  ;;  %v4535_v12 = vpop.f32.mrf.mxu1 }
 0xb16   :  { %8667 = vmatpush3.msra.mxu0 %v4206_v32 }
 0xb17   :  { %8668 = vmatprep.subr.mxu0 %v8948_v6  ;;  %v8691_v24 = vpop.f32.mrf.mxu1 }
 0xb18   :  { %8669 = vmatpush3.msra.mxu0 %v4201_v29  ;;  %v4963_v29 = vld [vmem:[%s11645_s7 + $0x148] sm:$0xff]  ;;  %v5133_v24 = vld [vmem:[%s11645_s7 + $0x1a0] sm:$0xff] }
 0xb19   :  { %v4540_v30 = vpop.f32.mrf.mxu1  ;;  %8698 = vmatprep.subr.mxu0 %v8948_v6  ;;  %8671 = vmatmul.mubr.msk.f32.vlgmr.msra.gmra.mxu0 %vm4305_vm4, %v4116_v17  ;;  %v5134_v17 = vld [vmem:[%s11645_s7 + $0x1a8] sm:$0xff] }
 0xb1a   :  { %8704 = vmatprep.mubr.msk.f32.mxu0 %vm8949_vm1, %v8948_v6 }
 0xb1b   :  { %v8694_v35 = vpop.f32.mrf.mxu1 }
 0xb1c   :  { %v5131_v35 = vld [vmem:[%s11645_s7 + $0x190] sm:$0xff] }
 0xb1d   :  { %v4545_v40 = vpop.f32.mrf.mxu1 }
 0xb1e   :  { %8699 = vmatpush3.msk.msra.mxu0 %vm4309_vm3, %v4545_v40  ;;  %v5130_v40 = vld [vmem:[%s11645_s7 + $0x188] sm:$0xff] }
 0xb1f   :  { %v8697_v45 = vpop.f32.mrf.mxu1  ;;  %8700 = vmatprep.subr.mxu0 %v8948_v6 }
 0xb20   :  { %8701 = vmatpush3.msra.mxu0 %v4540_v30  ;;  %v5132_v30 = vld [vmem:[%s11645_s7 + $0x198] sm:$0xff]  ;;  %v5129_v45 = vld [vmem:[%s11645_s7 + $0x180] sm:$0xff] }
 0xb21   :  { %8702 = vmatprep.subr.mxu0 %v8948_v6 }
 0xb22   :  { %8703 = vmatpush3.msra.mxu0 %v4535_v12  ;;  %v5135_v12 = vld [vmem:[%s11645_s7 + $0x1b0] sm:$0xff] }
 0xb23   :  { %8705 = vmatmul.mubr.msk.f32.vlgmr.msra.gmra.mxu0 %vm4305_vm4, %v6464_v50  ;;  %8766 = vmatprep.subr.mxu0 %v8948_v6 }
 0xb24   :  { %8772 = vmatprep.mubr.msk.f32.mxu0 %vm8949_vm1, %v8948_v6 }
 0xb25   :  { %v4702_v55 = vpop.f32.mrf.mxu1 }
 0xb27   :  { %v8725_v60 = vpop.f32.mrf.mxu1 }
 0xb29   :  { %v4707_v1 = vpop.f32.mrf.mxu1 }
 0xb2b   :  { %v8728_v7 = vpop.f32.mrf.mxu1 }
 0xb2d   :  { %v4712_v13 = vpop.f32.mrf.mxu1 }
 0xb2e   :  { %8733 = vmatpush3.msk.msra.mxu1 %vm4309_vm3, %v4712_v13 }
 0xb2f   :  { %v8731_v19 = vpop.f32.mrf.mxu1  ;;  %8734 = vmatprep.subr.mxu1 %v8948_v6 }
 0xb30   :  { %8735 = vmatpush3.msra.mxu1 %v4707_v1 }
 0xb31   :  { %8736 = vmatprep.subr.mxu1 %v8948_v6 }
 0xb32   :  { %8737 = vmatpush3.msra.mxu1 %v4702_v55 }
 0xb33   :  { %8739 = vmatmul.mubr.msk.f32.vlgmr.msra.gmra.mxu1 %vm4305_vm4, %v6470_v25  ;;  %8741 = vmatprep.subr.mxu1 %v8948_v6 }
 0xb34   :  { %8742 = vmatpush3.msra.mxu1 %v4802_v28  ;;  %8757 = vmatprep.mubr.msk.f32.mxu1 %vm8949_vm1, %v8948_v6 }
 0xb35   :  { %8743 = vmatprep.subr.mxu1 %v8948_v6 }
 0xb36   :  { %8744 = vmatpush3.msra.mxu1 %v4801_v44  ;;  %v6488_v44 = vld [vmem:[%s11647_s6 + $0xc] sm:$0x3] }
 0xb37   :  { %8745 = vmatprep.subr.mxu1 %v8948_v6 }
 0xb38   :  { %8746 = vmatpush3.msra.mxu1 %v4800_v47  ;;  %v5303_v47 = vld [vmem:[%s11645_s7 + $0x1f8] sm:$0xff] }
 0xb39   :  { %8747 = vmatprep.subr.mxu1 %v8948_v6 }
 0xb3a   :  { %8748 = vmatpush3.msra.mxu1 %v4799_v48  ;;  %v5302_v48 = vld [vmem:[%s11645_s7 + $0x1f0] sm:$0xff] }
 0xb3b   :  { %8749 = vmatprep.subr.mxu1 %v8948_v6 }
 0xb3c   :  { %8750 = vmatpush3.msra.mxu1 %v4798_v52  ;;  %v5301_v52 = vld [vmem:[%s11645_s7 + $0x1e8] sm:$0xff] }
 0xb3d   :  { %8751 = vmatprep.subr.mxu1 %v8948_v6 }
 0xb3e   :  { %8752 = vmatpush3.msra.mxu1 %v4797_v14  ;;  %v5300_v14 = vld [vmem:[%s11645_s7 + $0x1e0] sm:$0xff] }
 0xb3f   :  { %8753 = vmatprep.subr.mxu1 %v8948_v6 }
 0xb40   :  { %8754 = vmatpush3.msra.mxu1 %v4796_v54  ;;  %v5299_v54 = vld [vmem:[%s11645_s7 + $0x1d8] sm:$0xff] }
 0xb41   :  { %8755 = vmatprep.subr.mxu1 %v8948_v6 }
 0xb42   :  { %8756 = vmatpush3.msra.mxu1 %v4795_v22  ;;  %v5298_v22 = vld [vmem:[%s11645_s7 + $0x1d0] sm:$0xff] }
 0xb43   :  { %8758 = vmatmul.mubr.msk.f32.vlgmr.msra.gmra.mxu1 %vm4125_vm2, %v10805_v43  ;;  %8800 = vmatprep.subr.mxu1 %v8948_v6 }
 0xb44   :  { %8760 = vmatprep.mubr.msk.f32.mxu1 %vm8949_vm1, %v8948_v6 }
 0xb47   :  { %8761 = vmatmul.mubr.msk.f32.gmra.mxu1 %vm4125_vm2, %v10818_v31 }
 0xb48   :  { %8763 = vmatprep.mubr.msk.f32.mxu1 %vm8949_vm1, %v8948_v6 }
 0xb4b   :  { %8764 = vmatmul.mubr.msk.f32.gmra.mxu1 %vm4125_vm2, %v10832_v27 }
 0xb4c   :  { %8806 = vmatprep.mubr.msk.f32.mxu1 %vm8949_vm1, %v8948_v6 }
 0xbd3   :  { %v4379_v58 = vpop.f32.mrf.mxu0 }
 0xbd5   :  { %v8663_v59 = vpop.f32.mrf.mxu0 }
 0xbd6   :  { %v5296_v59 = vld [vmem:[%s11645_s7 + $0x1c0] sm:$0xff] }
 0xbd9   :  { %v4455_v61 = vpop.f32.mrf.mxu0 }
 0xbda   :  { %v4456_v0 = vadd.f32 %v4455_v61, %v4379_v58  ;;  %v5297_v58 = vld [vmem:[%s11645_s7 + $0x1c8] sm:$0xff] }
 0xbdb   :  { %v8672_v3 = vpop.f32.mrf.mxu0 }
 0xbe3   :  { %v4621_v33 = vpop.f32.mrf.mxu0 }
 0xbe4   :  { %v4625_v51 = vadd.f32 %v4621_v33, %v4456_v0 }
 0xbe5   :  { %v8706_v41 = vpop.f32.mrf.mxu0 }
 0xbf3   :  { %v4788_v4 = vpop.f32.mrf.mxu1 }
 0xbf4   :  { %v4792_v57 = vadd.f32 %v4788_v4, %v4625_v51 }
 0xbf5   :  { %v8740_v2 = vpop.f32.mrf.mxu1 }
 0xc03   :  { %v4869_v5 = vpop.f32.mrf.mxu1 }
 0xc05   :  { %v8759_v9 = vpop.f32.mrf.mxu1 }
 0xc06   :  { %v5470_v9 = vld [vmem:[%s11645_s7 + $0x238] sm:$0xff] }
 0xc07   :  { %v4874_v10 = vpop.f32.mrf.mxu1 }
 0xc09   :  { %v8762_v11 = vpop.f32.mrf.mxu1 }
 0xc0a   :  { %v5468_v11 = vld [vmem:[%s11645_s7 + $0x228] sm:$0xff] }
 0xc0b   :  { %v4879_v15 = vpop.f32.mrf.mxu1 }
 0xc0c   :  { %8767 = vmatpush3.msk.msra.mxu0 %vm4309_vm3, %v4879_v15  ;;  %v5467_v15 = vld [vmem:[%s11645_s7 + $0x220] sm:$0xff] }
 0xc0d   :  { %v8765_v38 = vpop.f32.mrf.mxu1  ;;  %8768 = vmatprep.subr.mxu0 %v8948_v6 }
 0xc0e   :  { %8769 = vmatpush3.msra.mxu0 %v4874_v10  ;;  %v5469_v10 = vld [vmem:[%s11645_s7 + $0x230] sm:$0xff]  ;;  %v5466_v38 = vld [vmem:[%s11645_s7 + $0x218] sm:$0xff] }
 0xc0f   :  { %8770 = vmatprep.subr.mxu0 %v8948_v6 }
 0xc10   :  { %8771 = vmatpush3.msra.mxu0 %v4869_v5  ;;  %v6494_v5 = vld [vmem:[%s11647_s6 + $0xe] sm:$0x3] }
 0xc11   :  { %8773 = vmatmul.mubr.msk.f32.vlgmr.msra.gmra.mxu0 %vm4305_vm4, %v6476_v18  ;;  %8775 = vmatprep.subr.mxu0 %v8948_v6  ;;  %v5465_v18 = vld [vmem:[%s11645_s7 + $0x210] sm:$0xff] }
 0xc12   :  { %8776 = vmatpush3.msra.mxu0 %v4969_v46  ;;  %8791 = vmatprep.mubr.msk.f32.mxu0 %vm8949_vm1, %v8948_v6  ;;  %v5464_v46 = vld [vmem:[%s11645_s7 + $0x208] sm:$0xff] }
 0xc13   :  { %8777 = vmatprep.subr.mxu0 %v8948_v6 }
 0xc14   :  { %8778 = vmatpush3.msra.mxu0 %v4968_v53  ;;  %v5463_v53 = vld [vmem:[%s11645_s7 + $0x200] sm:$0xff] }
 0xc15   :  { %8779 = vmatprep.subr.mxu0 %v8948_v6 }
 0xc16   :  { %8780 = vmatpush3.msra.mxu0 %v4967_v20  ;;  %v5668_v20 = vld [vmem:[%s11648_s10 + $0xf8] sm:$0xff] }
 0xc17   :  { %8781 = vmatprep.subr.mxu0 %v8948_v6 }
 0xc18   :  { %8782 = vmatpush3.msra.mxu0 %v4966_v21  ;;  %v5660_v21 = vld [vmem:[%s11648_s10 + $0xb8] sm:$0xff] }
 0xc19   :  { %8783 = vmatprep.subr.mxu0 %v8948_v6 }
 0xc1a   :  { %8784 = vmatpush3.msra.mxu0 %v4965_v23  ;;  %v5659_v23 = vld [vmem:[%s11648_s10 + $0xb0] sm:$0xff] }
 0xc1b   :  { %8785 = vmatprep.subr.mxu0 %v8948_v6 }
 0xc1c   :  { %8786 = vmatpush3.msra.mxu0 %v4964_v26  ;;  %v5656_v26 = vld [vmem:[%s11648_s10 + $0x98] sm:$0xff] }
 0xc1d   :  { %8787 = vmatprep.subr.mxu0 %v8948_v6 }
 0xc1e   :  { %8788 = vmatpush3.msra.mxu0 %v4963_v29  ;;  %v5655_v29 = vld [vmem:[%s11648_s10 + $0x90] sm:$0xff] }
 0xc1f   :  { %8789 = vmatprep.subr.mxu0 %v8948_v6 }
 0xc20   :  { %8790 = vmatpush3.msra.mxu0 %v4962_v49  ;;  %v5652_v49 = vld [vmem:[%s11648_s10 + $0x78] sm:$0xff] }
 0xc21   :  { %8792 = vmatmul.mubr.msk.f32.vlgmr.msra.gmra.mxu0 %vm4125_vm2, %v10805_v43  ;;  %8834 = vmatprep.subr.mxu0 %v8948_v6 }
 0xc22   :  { %8794 = vmatprep.mubr.msk.f32.mxu0 %vm8949_vm1, %v8948_v6 }
 0xc25   :  { %8795 = vmatmul.mubr.msk.f32.gmra.mxu0 %vm4125_vm2, %v10818_v31 }
 0xc26   :  { %8797 = vmatprep.mubr.msk.f32.mxu0 %vm8949_vm1, %v8948_v6 }
 0xc29   :  { %8798 = vmatmul.mubr.msk.f32.gmra.mxu0 %vm4125_vm2, %v10832_v27 }
 0xc2a   :  { %8840 = vmatprep.mubr.msk.f32.mxu0 %vm8949_vm1, %v8948_v6 }
 0xcd1   :  { %v4955_v32 = vpop.f32.mrf.mxu0 }
 0xcd2   :  { %v4959_v56 = vadd.f32 %v4955_v32, %v4792_v57 }
 0xcd3   :  { %v8774_v62 = vpop.f32.mrf.mxu0 }
 0xce1   :  { %v5036_v34 = vpop.f32.mrf.mxu0 }
 0xce3   :  { %v8793_v36 = vpop.f32.mrf.mxu0 }
 0xce5   :  { %v5041_v37 = vpop.f32.mrf.mxu0 }
 0xce7   :  { %v8796_v39 = vpop.f32.mrf.mxu0 }
 0xce9   :  { %v5046_v63 = vpop.f32.mrf.mxu0 }
 0xcea   :  { %8801 = vmatpush3.msk.msra.mxu1 %vm4309_vm3, %v5046_v63 }
 0xceb   :  { %v8799_v42 = vpop.f32.mrf.mxu0  ;;  %8802 = vmatprep.subr.mxu1 %v8948_v6 }
 0xcec   :  { %8803 = vmatpush3.msra.mxu1 %v5041_v37 }
 0xced   :  { %8804 = vmatprep.subr.mxu1 %v8948_v6 }
 0xcee   :  { %8805 = vmatpush3.msra.mxu1 %v5036_v34 }
 0xcef   :  { %8807 = vmatmul.mubr.msk.f32.vlgmr.msra.gmra.mxu1 %vm4305_vm4, %v6482_v8  ;;  %8809 = vmatprep.subr.mxu1 %v8948_v6  ;;  %v6500_v8 = vld [vmem:[%s11647_s6 + $0x10] sm:$0x3] }
 0xcf0   :  { %8810 = vmatpush3.msra.mxu1 %v5136_v16  ;;  %8825 = vmatprep.mubr.msk.f32.mxu1 %vm8949_vm1, %v8948_v6  ;;  %v5666_v16 = vld [vmem:[%s11648_s10 + $0xe8] sm:$0xff] }
 0xcf1   :  { %8811 = vmatprep.subr.mxu1 %v8948_v6 }
 0xcf2   :  { %8812 = vmatpush3.msra.mxu1 %v5135_v12  ;;  %v5665_v12 = vld [vmem:[%s11648_s10 + $0xe0] sm:$0xff] }
 0xcf3   :  { %8813 = vmatprep.subr.mxu1 %v8948_v6 }
 0xcf4   :  { %8814 = vmatpush3.msra.mxu1 %v5134_v17  ;;  %v5662_v17 = vld [vmem:[%s11648_s10 + $0xc8] sm:$0xff] }
 0xcf5   :  { %8815 = vmatprep.subr.mxu1 %v8948_v6 }
 0xcf6   :  { %8816 = vmatpush3.msra.mxu1 %v5133_v24  ;;  %v5661_v24 = vld [vmem:[%s11648_s10 + $0xc0] sm:$0xff] }
 0xcf7   :  { %8817 = vmatprep.subr.mxu1 %v8948_v6 }
 0xcf8   :  { %8818 = vmatpush3.msra.mxu1 %v5132_v30  ;;  %v5658_v30 = vld [vmem:[%s11648_s10 + $0xa8] sm:$0xff] }
 0xcf9   :  { %8819 = vmatprep.subr.mxu1 %v8948_v6 }
 0xcfa   :  { %8820 = vmatpush3.msra.mxu1 %v5131_v35  ;;  %v5657_v35 = vld [vmem:[%s11648_s10 + $0xa0] sm:$0xff] }
 0xcfb   :  { %8821 = vmatprep.subr.mxu1 %v8948_v6 }
 0xcfc   :  { %8822 = vmatpush3.msra.mxu1 %v5130_v40  ;;  %v5654_v40 = vld [vmem:[%s11648_s10 + $0x88] sm:$0xff] }
 0xcfd   :  { %8823 = vmatprep.subr.mxu1 %v8948_v6 }
 0xcfe   :  { %8824 = vmatpush3.msra.mxu1 %v5129_v45  ;;  %v5653_v45 = vld [vmem:[%s11648_s10 + $0x80] sm:$0xff] }
 0xcff   :  { %8826 = vmatmul.mubr.msk.f32.vlgmr.msra.gmra.mxu1 %vm4125_vm2, %v10805_v43  ;;  %8868 = vmatprep.subr.mxu1 %v8948_v6 }
 0xd00   :  { %8828 = vmatprep.mubr.msk.f32.mxu1 %vm8949_vm1, %v8948_v6 }
 0xd03   :  { %8829 = vmatmul.mubr.msk.f32.gmra.mxu1 %vm4125_vm2, %v10818_v31 }
 0xd04   :  { %8831 = vmatprep.mubr.msk.f32.mxu1 %vm8949_vm1, %v8948_v6 }
 0xd07   :  { %8832 = vmatmul.mubr.msk.f32.gmra.mxu1 %vm4125_vm2, %v10832_v27 }
 0xd08   :  { %8874 = vmatprep.mubr.msk.f32.mxu1 %vm8949_vm1, %v8948_v6 }
 0xdaf   :  { %v5122_v50 = vpop.f32.mrf.mxu1 }
 0xdb0   :  { %v5126_v55 = vadd.f32 %v5122_v50, %v4959_v56  ;;  %v5650_v50 = vld [vmem:[%s11648_s10 + $0x68] sm:$0xff] }
 0xdb1   :  { %v8808_v60 = vpop.f32.mrf.mxu1 }
 0xdb2   :  { %v5651_v60 = vld [vmem:[%s11648_s10 + $0x70] sm:$0xff] }
 0xdbf   :  { %v5203_v1 = vpop.f32.mrf.mxu1 }
 0xdc1   :  { %v8827_v7 = vpop.f32.mrf.mxu1 }
 0xdc2   :  { %v5648_v7 = vld [vmem:[%s11648_s10 + $0x58] sm:$0xff] }
 0xdc3   :  { %v5208_v13 = vpop.f32.mrf.mxu1 }
 0xdc5   :  { %v8830_v19 = vpop.f32.mrf.mxu1 }
 0xdc6   :  { %v5647_v19 = vld [vmem:[%s11648_s10 + $0x50] sm:$0xff] }
 0xdc7   :  { %v5213_v25 = vpop.f32.mrf.mxu1 }
 0xdc8   :  { %8835 = vmatpush3.msk.msra.mxu0 %vm4309_vm3, %v5213_v25  ;;  %v5642_v25 = vld [vmem:[%s11648_s10 + $0x28] sm:$0xff] }
 0xdc9   :  { %v8833_v28 = vpop.f32.mrf.mxu1  ;;  %8836 = vmatprep.subr.mxu0 %v8948_v6 }
 0xdca   :  { %8837 = vmatpush3.msra.mxu0 %v5208_v13  ;;  %v5645_v13 = vld [vmem:[%s11648_s10 + $0x40] sm:$0xff]  ;;  %v5644_v28 = vld [vmem:[%s11648_s10 + $0x38] sm:$0xff] }
 0xdcb   :  { %8838 = vmatprep.subr.mxu0 %v8948_v6 }
 0xdcc   :  { %8839 = vmatpush3.msra.mxu0 %v5203_v1  ;;  %v5646_v1 = vld [vmem:[%s11648_s10 + $0x48] sm:$0xff] }
 0xdcd   :  { %8841 = vmatmul.mubr.msk.f32.vlgmr.msra.gmra.mxu0 %vm4305_vm4, %v6488_v44  ;;  %8843 = vmatprep.subr.mxu0 %v8948_v6  ;;  %v5641_v44 = vld [vmem:[%s11648_s10 + $0x20] sm:$0xff] }
 0xdce   :  { %8844 = vmatpush3.msra.mxu0 %v5303_v47  ;;  %8859 = vmatprep.mubr.msk.f32.mxu0 %vm8949_vm1, %v8948_v6  ;;  %v5643_v47 = vld [vmem:[%s11648_s10 + $0x30] sm:$0xff] }
 0xdcf   :  { %8845 = vmatprep.subr.mxu0 %v8948_v6 }
 0xdd0   :  { %8846 = vmatpush3.msra.mxu0 %v5302_v48  ;;  %v5638_v48 = vld [vmem:[%s11648_s10 + $0x8] sm:$0xff] }
 0xdd1   :  { %8847 = vmatprep.subr.mxu0 %v8948_v6 }
 0xdd2   :  { %8848 = vmatpush3.msra.mxu0 %v5301_v52  ;;  %v5640_v52 = vld [vmem:[%s11648_s10 + $0x18] sm:$0xff] }
 0xdd3   :  { %8849 = vmatprep.subr.mxu0 %v8948_v6 }
 0xdd4   :  { %8850 = vmatpush3.msra.mxu0 %v5300_v14  ;;  %v5637_v14 = vld [vmem:[%s11648_s10] sm:$0xff] }
 0xdd5   :  { %8851 = vmatprep.subr.mxu0 %v8948_v6 }
 0xdd6   :  { %8852 = vmatpush3.msra.mxu0 %v5299_v54  ;;  %v5639_v54 = vld [vmem:[%s11648_s10 + $0x10] sm:$0xff] }
 0xdd7   :  { %8853 = vmatprep.subr.mxu0 %v8948_v6 }
 0xdd8   :  { %8854 = vmatpush3.msra.mxu0 %v5298_v22  ;;  %v5871_v22 = vld [vmem:[%s11649_s12 + $0xf8] sm:$0xff] }
 0xdd9   :  { %8855 = vmatprep.subr.mxu0 %v8948_v6 }
 0xdda   :  { %8856 = vmatpush3.msra.mxu0 %v5297_v58  ;;  %v5903_v58 = vld [vmem:[%s11649_s12 + $0x1f8] sm:$0xff] }
 0xddb   :  { %8857 = vmatprep.subr.mxu0 %v8948_v6 }
 0xddc   :  { %8858 = vmatpush3.msra.mxu0 %v5296_v59 }
 0xddd   :  { %8860 = vmatmul.mubr.msk.f32.vlgmr.msra.gmra.mxu0 %vm4125_vm2, %v10805_v43  ;;  %8902 = vmatprep.subr.mxu0 %v8948_v6 }
 0xdde   :  { %8862 = vmatprep.mubr.msk.f32.mxu0 %vm8949_vm1, %v8948_v6 }
 0xde1   :  { %8863 = vmatmul.mubr.msk.f32.gmra.mxu0 %vm4125_vm2, %v10818_v31 }
 0xde2   :  { %8865 = vmatprep.mubr.msk.f32.mxu0 %vm8949_vm1, %v8948_v6 }
 0xde5   :  { %8866 = vmatmul.mubr.msk.f32.gmra.mxu0 %vm4125_vm2, %v10832_v27 }
 0xde6   :  { %8908 = vmatprep.mubr.msk.f32.mxu0 %vm8949_vm1, %v8948_v6 }
 0xe8d   :  { %v5289_v61 = vpop.f32.mrf.mxu0 }
 0xe8e   :  { %v11202_v0 = vadd.f32 %v5289_v61, %v5126_v55  ;;  %v5649_v55 = vld [vmem:[%s11648_s10 + $0x60] sm:$0xff] }
 0xe8f   :  { %v8842_v3 = vpop.f32.mrf.mxu0  ;;  %v6506_v61 = vld [vmem:[%s11650_s8] ss:$0 sm:$0xff] }
 0xe9d   :  { %v5370_v33 = vpop.f32.mrf.mxu0 }
 0xe9f   :  { %v8861_v51 = vpop.f32.mrf.mxu0 }
 0xea1   :  { %v5375_v41 = vpop.f32.mrf.mxu0 }
 0xea3   :  { %v8864_v4 = vpop.f32.mrf.mxu0 }
 0xea4   :  { %v5887_v4 = vld [vmem:[%s11649_s12 + $0x178] sm:$0xff] }
 0xea5   :  { %v5380_v57 = vpop.f32.mrf.mxu0 }
 0xea6   :  { %8869 = vmatpush3.msk.msra.mxu1 %vm4309_vm3, %v5380_v57  ;;  %v5870_v57 = vld [vmem:[%s11649_s12 + $0xf0] sm:$0xff] }
 0xea7   :  { %v8867_v2 = vpop.f32.mrf.mxu0  ;;  %8870 = vmatprep.subr.mxu1 %v8948_v6 }
 0xea8   :  { %8871 = vmatpush3.msra.mxu1 %v5375_v41  ;;  %v5855_v41 = vld [vmem:[%s11649_s12 + $0x78] sm:$0xff]  ;;  %v5902_v2 = vld [vmem:[%s11649_s12 + $0x1f0] sm:$0xff] }
 0xea9   :  { %8872 = vmatprep.subr.mxu1 %v8948_v6 }
 0xeaa   :  { %8873 = vmatpush3.msra.mxu1 %v5370_v33 }
 0xeab   :  { %8875 = vmatmul.mubr.msk.f32.vlgmr.msra.gmra.mxu1 %vm4305_vm4, %v6494_v5  ;;  %8877 = vmatprep.subr.mxu1 %v8948_v6  ;;  %v5854_v5 = vld [vmem:[%s11649_s12 + $0x70] sm:$0xff] }
 0xeac   :  { %8878 = vmatpush3.msra.mxu1 %v5470_v9  ;;  %8893 = vmatprep.mubr.msk.f32.mxu1 %vm8949_vm1, %v8948_v6  ;;  %v5886_v9 = vld [vmem:[%s11649_s12 + $0x170] sm:$0xff] }
 0xead   :  { %8879 = vmatprep.subr.mxu1 %v8948_v6 }
 0xeae   :  { %8880 = vmatpush3.msra.mxu1 %v5469_v10  ;;  %v5869_v10 = vld [vmem:[%s11649_s12 + $0xe8] sm:$0xff] }
 0xeaf   :  { %8881 = vmatprep.subr.mxu1 %v8948_v6 }
 0xeb0   :  { %8882 = vmatpush3.msra.mxu1 %v5468_v11  ;;  %v5901_v11 = vld [vmem:[%s11649_s12 + $0x1e8] sm:$0xff] }
 0xeb1   :  { %8883 = vmatprep.subr.mxu1 %v8948_v6 }
 0xeb2   :  { %8884 = vmatpush3.msra.mxu1 %v5467_v15  ;;  %v5853_v15 = vld [vmem:[%s11649_s12 + $0x68] sm:$0xff] }
 0xeb3   :  { %8885 = vmatprep.subr.mxu1 %v8948_v6 }
 0xeb4   :  { %8886 = vmatpush3.msra.mxu1 %v5466_v38  ;;  %v5885_v38 = vld [vmem:[%s11649_s12 + $0x168] sm:$0xff] }
 0xeb5   :  { %8887 = vmatprep.subr.mxu1 %v8948_v6 }
 0xeb6   :  { %8888 = vmatpush3.msra.mxu1 %v5465_v18  ;;  %v5868_v18 = vld [vmem:[%s11649_s12 + $0xe0] sm:$0xff] }
 0xeb7   :  { %8889 = vmatprep.subr.mxu1 %v8948_v6 }
 0xeb8   :  { %8890 = vmatpush3.msra.mxu1 %v5464_v46  ;;  %v5900_v46 = vld [vmem:[%s11649_s12 + $0x1e0] sm:$0xff] }
 0xeb9   :  { %8891 = vmatprep.subr.mxu1 %v8948_v6 }
 0xeba   :  { %8892 = vmatpush3.msra.mxu1 %v5463_v53  ;;  %v5852_v53 = vld [vmem:[%s11649_s12 + $0x60] sm:$0xff] }
 0xebb   :  { %8894 = vmatmul.mubr.msk.f32.vlgmr.msra.gmra.mxu1 %vm4125_vm2, %v10805_v43  ;;  %5781 = vmatprep.subr.mxu1 %v5668_v20  ;;  %v5667_v43 = vld [vmem:[%s11648_s10 + $0xf0] sm:$0xff]  ;;  %v5884_v20 = vld [vmem:[%s11649_s12 + $0x160] sm:$0xff] }
 0xebc   :  { %8896 = vmatprep.mubr.msk.f32.mxu1 %vm8949_vm1, %v8948_v6  ;;  %5782 = vmatpush1.msra.mxu1 %v5667_v43  ;;  %v5867_v43 = vld [vmem:[%s11649_s12 + $0xd8] sm:$0xff] }
 0xebf   :  { %8897 = vmatmul.mubr.msk.f32.gmra.mxu1 %vm4125_vm2, %v10818_v31  ;;  %v5664_v31 = vld [vmem:[%s11648_s10 + $0xd8] sm:$0xff] }
 0xec0   :  { %8899 = vmatprep.mubr.msk.f32.mxu1 %vm8949_vm1, %v8948_v6  ;;  %5783 = vmatprep.subr.mxu1 %v5664_v31  ;;  %v5899_v31 = vld [vmem:[%s11649_s12 + $0x1d8] sm:$0xff] }
 0xec3   :  { %8900 = vmatmul.mubr.msk.f32.gmra.mxu1 %vm4125_vm2, %v10832_v27  ;;  %v5663_v27 = vld [vmem:[%s11648_s10 + $0xd0] sm:$0xff] }
 0xec4   :  { %5829 = vmatprep.mubr.f32.mxu1 %v8948_v6  ;;  %5784 = vmatpush1.msra.mxu1 %v5663_v27  ;;  %v5851_v27 = vld [vmem:[%s11649_s12 + $0x58] sm:$0xff] }
 0xec5   :  { %5785 = vmatprep.subr.mxu1 %v5660_v21  ;;  %v5883_v21 = vld [vmem:[%s11649_s12 + $0x158] sm:$0xff] }
 0xec6   :  { %5786 = vmatpush1.msra.mxu1 %v5659_v23  ;;  %v5866_v23 = vld [vmem:[%s11649_s12 + $0xd0] sm:$0xff] }
 0xec7   :  { %5787 = vmatprep.subr.mxu1 %v5656_v26  ;;  %v5898_v26 = vld [vmem:[%s11649_s12 + $0x1d0] sm:$0xff] }
 0xec8   :  { %5788 = vmatpush1.msra.mxu1 %v5655_v29  ;;  %v5850_v29 = vld [vmem:[%s11649_s12 + $0x50] sm:$0xff] }
 0xec9   :  { %5789 = vmatprep.subr.mxu1 %v5652_v49  ;;  %v5882_v49 = vld [vmem:[%s11649_s12 + $0x150] sm:$0xff] }
 0xeca   :  { %5790 = vmatpush1.msra.mxu1 %v5651_v60  ;;  %v5860_v60 = vld [vmem:[%s11649_s12 + $0xa0] sm:$0xff] }
 0xecb   :  { %5791 = vmatprep.subr.mxu1 %v5648_v7  ;;  %v5844_v7 = vld [vmem:[%s11649_s12 + $0x20] sm:$0xff] }
 0xecc   :  { %5792 = vmatpush1.msra.mxu1 %v5647_v19  ;;  %v5859_v19 = vld [vmem:[%s11649_s12 + $0x98] sm:$0xff] }
 0xecd   :  { %5793 = vmatprep.subr.mxu1 %v5644_v28  ;;  %v5843_v28 = vld [vmem:[%s11649_s12 + $0x18] sm:$0xff] }
 0xece   :  { %5794 = vmatpush1.msra.mxu1 %v5643_v47  ;;  %v5858_v47 = vld [vmem:[%s11649_s12 + $0x90] sm:$0xff] }
 0xecf   :  { %5795 = vmatprep.subr.mxu1 %v5640_v52  ;;  %v5842_v52 = vld [vmem:[%s11649_s12 + $0x10] sm:$0xff] }
 0xed0   :  { %5796 = vmatpush1.msra.mxu1 %v5639_v54  ;;  %v5857_v54 = vld [vmem:[%s11649_s12 + $0x88] sm:$0xff] }
 0xed1   :  { %7385 = vmatprep.subr.mxu1 %v5903_v58  ;;  %v5841_v58 = vld [vmem:[%s11649_s12 + $0x8] sm:$0xff] }
 0xf6b   :  { %v5456_v32 = vpop.f32.mrf.mxu1 }
 0xf6c   :  { %v11284_v56 = vadd.f32 %v5456_v32, %v11202_v0  ;;  %v5865_v32 = vld [vmem:[%s11649_s12 + $0xc8] sm:$0xff] }
 0xf6d   :  { %v8876_v62 = vpop.f32.mrf.mxu1 }
 0xf6e   :  { %v5849_v62 = vld [vmem:[%s11649_s12 + $0x48] sm:$0xff] }
 0xf7b   :  { %v5537_v34 = vpop.f32.mrf.mxu1 }
 0xf7d   :  { %v8895_v36 = vpop.f32.mrf.mxu1 }
 0xf7e   :  { %v5864_v36 = vld [vmem:[%s11649_s12 + $0xc0] sm:$0xff] }
 0xf7f   :  { %v5542_v37 = vpop.f32.mrf.mxu1 }
 0xf81   :  { %v8898_v39 = vpop.f32.mrf.mxu1 }
 0xf82   :  { %v5848_v39 = vld [vmem:[%s11649_s12 + $0x40] sm:$0xff] }
 0xf83   :  { %v5547_v63 = vpop.f32.mrf.mxu1 }
 0xf84   :  { %8903 = vmatpush3.msk.msra.mxu0 %vm4309_vm3, %v5547_v63  ;;  %v5880_v63 = vld [vmem:[%s11649_s12 + $0x140] sm:$0xff] }
 0xf85   :  { %v8901_v42 = vpop.f32.mrf.mxu1  ;;  %8904 = vmatprep.subr.mxu0 %v8948_v6 }
 0xf86   :  { %8905 = vmatpush3.msra.mxu0 %v5542_v37  ;;  %v5896_v37 = vld [vmem:[%s11649_s12 + $0x1c0] sm:$0xff]  ;;  %v5863_v42 = vld [vmem:[%s11649_s12 + $0xb8] sm:$0xff] }
 0xf87   :  { %8906 = vmatprep.subr.mxu0 %v8948_v6 }
 0xf88   :  { %8907 = vmatpush3.msra.mxu0 %v5537_v34  ;;  %v5881_v34 = vld [vmem:[%s11649_s12 + $0x148] sm:$0xff] }
 0xf89   :  { %8909 = vmatmul.mubr.msk.f32.vlgmr.msra.gmra.mxu0 %vm4305_vm4, %v6500_v8  ;;  %5710 = vmatprep.subr.mxu0 %v5666_v16  ;;  %v5895_v8 = vld [vmem:[%s11649_s12 + $0x1b8] sm:$0xff] }
 0xf8a   :  { %5711 = vmatpush1.msra.mxu0 %v5665_v12  ;;  %5758 = vmatprep.mubr.f32.mxu0 %v8948_v6  ;;  %v5847_v16 = vld [vmem:[%s11649_s12 + $0x38] sm:$0xff] }
 0xf8b   :  { %5712 = vmatprep.subr.mxu0 %v5662_v17  ;;  %v5879_v12 = vld [vmem:[%s11649_s12 + $0x138] sm:$0xff]  ;;  %v5862_v17 = vld [vmem:[%s11649_s12 + $0xb0] sm:$0xff] }
 0xf8c   :  { %5713 = vmatpush1.msra.mxu0 %v5661_v24  ;;  %v5894_v24 = vld [vmem:[%s11649_s12 + $0x1b0] sm:$0xff] }
 0xf8d   :  { %5714 = vmatprep.subr.mxu0 %v5658_v30  ;;  %v5846_v30 = vld [vmem:[%s11649_s12 + $0x30] sm:$0xff] }
 0xf8e   :  { %5715 = vmatpush1.msra.mxu0 %v5657_v35  ;;  %v5878_v35 = vld [vmem:[%s11649_s12 + $0x130] sm:$0xff] }
 0xf8f   :  { %5716 = vmatprep.subr.mxu0 %v5654_v40  ;;  %v5861_v40 = vld [vmem:[%s11649_s12 + $0xa8] sm:$0xff] }
 0xf90   :  { %5717 = vmatpush1.msra.mxu0 %v5653_v45  ;;  %v5893_v45 = vld [vmem:[%s11649_s12 + $0x1a8] sm:$0xff] }
 0xf91   :  { %5718 = vmatprep.subr.mxu0 %v5650_v50  ;;  %v5845_v50 = vld [vmem:[%s11649_s12 + $0x28] sm:$0xff] }
 0xf92   :  { %5719 = vmatpush1.msra.mxu0 %v5649_v55  ;;  %v5877_v55 = vld [vmem:[%s11649_s12 + $0x128] sm:$0xff] }
 0xf93   :  { %5720 = vmatprep.subr.mxu0 %v5646_v1  ;;  %v5892_v1 = vld [vmem:[%s11649_s12 + $0x1a0] sm:$0xff] }
 0xf94   :  { %5721 = vmatpush1.msra.mxu0 %v5645_v13  ;;  %v5876_v13 = vld [vmem:[%s11649_s12 + $0x120] sm:$0xff] }
 0xf95   :  { %5722 = vmatprep.subr.mxu0 %v5642_v25  ;;  %v5891_v25 = vld [vmem:[%s11649_s12 + $0x198] sm:$0xff] }
 0xf96   :  { %5723 = vmatpush1.msra.mxu0 %v5641_v44  ;;  %v5875_v44 = vld [vmem:[%s11649_s12 + $0x118] sm:$0xff] }
 0xf97   :  { %5724 = vmatprep.subr.mxu0 %v5638_v48  ;;  %v5890_v48 = vld [vmem:[%s11649_s12 + $0x190] sm:$0xff] }
 0xf98   :  { %5725 = vmatpush1.msra.mxu0 %v5637_v14  ;;  %v5874_v14 = vld [vmem:[%s11649_s12 + $0x110] sm:$0xff] }
 0xf99   :  { %7350 = vmatprep.subr.mxu0 %v5871_v22  ;;  %v5889_v22 = vld [vmem:[%s11649_s12 + $0x188] sm:$0xff] }
0x1049   :  { %v5623_v59 = vpop.f32.mrf.mxu0 }
0x104a   :  { %v5627_v0 = vadd.f32 %v5623_v59, %v11284_v56  ;;  %v5897_v56 = vld [vmem:[%s11649_s12 + $0x1c8] sm:$0xff] }
0x104b   :  { %v8910_v3 = vpop.f32.mrf.mxu0  ;;  %v5873_v59 = vld [vmem:[%s11649_s12 + $0x108] sm:$0xff] }
0x104c   :  { %v5635_v33 = vadd.f32 %v6506_v61, %v5627_v0  ;;  %v5856_v61 = vld [vmem:[%s11649_s12 + $0x80] sm:$0xff] }
0x104d   :  { %v5888_v0 = vld [vmem:[%s11649_s12 + $0x180] sm:$0xff] }
0x104e   :  { %v5636_v51 = vmax.f32 %v5635_v33, 0.0  ;;  %v5840_v3 = vld [vmem:[%s11649_s12] sm:$0xff] }
0x104f   :  { %v5872_v33 = vld [vmem:[%s11649_s12 + $0x100] sm:$0xff] }
0x1050   :  { %6507 = vmatmul.mubr.msk.f32.vlgmr.msra.gmra.mxu0 %vm4125_vm2, %v5636_v51  ;;  %6508 = vmatmul.mubr.msk.f32.vlgmr.msra.gmra.mxu1 %vm4125_vm2, %v5636_v51  ;;  %v5671_v51 = vlaneseq }
0x1051   :  { %7351 = vmatpush3.msra.mxu0 %v5855_v41  ;;  %7386 = vmatpush3.msra.mxu1 %v5887_v4 }
0x1052   :  { %7352 = vmatprep.subr.mxu0 %v5870_v57  ;;  %7387 = vmatprep.subr.mxu1 %v5902_v2  ;;  %v5672_v41 = vshrl.u32 %v5671_v51, 7  ;;  %v5669_v2 = vld [vmem:[%s11651_s11] sm:$0xf] }
0x1053   :  { %7353 = vmatpush3.msra.mxu0 %v5854_v5  ;;  %7388 = vmatpush3.msra.mxu1 %v5886_v9 }
0x1054   :  { %7354 = vmatprep.subr.mxu0 %v5869_v10  ;;  %7389 = vmatprep.subr.mxu1 %v5901_v11  ;;  %v5673_v4 = vsub.s32 0, %v5672_v41  ;;  %v5681_v57 = vsub.s32 2, %v5672_v41  ;;  %v5677_v5 = vsub.s32 1, %v5672_v41  ;;  %v5685_v9 = vsub.s32 3, %v5672_v41 }
0x1055   :  { %7355 = vmatpush3.msra.mxu0 %v5853_v15  ;;  %7390 = vmatpush3.msra.mxu1 %v5885_v38 }
0x1056   :  { %7356 = vmatprep.subr.mxu0 %v5868_v18  ;;  %7391 = vmatprep.subr.mxu1 %v5900_v46  ;;  %v5674_v10 = vrot.slane %v5669_v2, %v5673_v4  ;;  %v5682_v11 = vrot.slane %v5669_v2, %v5681_v57  ;;  %v5678_v15 = vrot.slane %v5669_v2, %v5677_v5 }
0x1057   :  { %7357 = vmatpush3.msra.mxu0 %v5852_v53  ;;  %7392 = vmatpush3.msra.mxu1 %v5884_v20  ;;  %v5686_v38 = vrot.slane %v5669_v2, %v5685_v9 }
0x1058   :  { %7358 = vmatprep.subr.mxu0 %v5867_v43  ;;  %7393 = vmatprep.subr.mxu1 %v5899_v31 }
0x1059   :  { %7359 = vmatpush3.msra.mxu0 %v5851_v27  ;;  %7394 = vmatpush3.msra.mxu1 %v5883_v21 }
0x105a   :  { %7360 = vmatprep.subr.mxu0 %v5866_v23  ;;  %7395 = vmatprep.subr.mxu1 %v5898_v26 }
0x105b   :  { %7361 = vmatpush3.msra.mxu0 %v5850_v29  ;;  %7396 = vmatpush3.msra.mxu1 %v5882_v49 }
0x105c   :  { %7362 = vmatprep.subr.mxu0 %v5865_v32  ;;  %7397 = vmatprep.subr.mxu1 %v5897_v56  ;;  %v6067_v32 = vld [vmem:[%s11652_s14 + $0x78] sm:$0xff]  ;;  %v6066_v56 = vld [vmem:[%s11652_s14 + $0x70] sm:$0xff] }
0x105d   :  { %7363 = vmatpush3.msra.mxu0 %v5849_v62  ;;  %7398 = vmatpush3.msra.mxu1 %v5881_v34  ;;  %v6065_v62 = vld [vmem:[%s11652_s14 + $0x68] sm:$0xff]  ;;  %v6064_v34 = vld [vmem:[%s11652_s14 + $0x60] sm:$0xff] }
0x105e   :  { %7364 = vmatprep.subr.mxu0 %v5864_v36  ;;  %7399 = vmatprep.subr.mxu1 %v5896_v37  ;;  %v6063_v36 = vld [vmem:[%s11652_s14 + $0x58] sm:$0xff]  ;;  %v6062_v37 = vld [vmem:[%s11652_s14 + $0x50] sm:$0xff] }
0x105f   :  { %7365 = vmatpush3.msra.mxu0 %v5848_v39  ;;  %7400 = vmatpush3.msra.mxu1 %v5880_v63  ;;  %v6061_v39 = vld [vmem:[%s11652_s14 + $0x48] sm:$0xff]  ;;  %v6060_v63 = vld [vmem:[%s11652_s14 + $0x40] sm:$0xff] }
0x1060   :  { %7366 = vmatprep.subr.mxu0 %v5863_v42  ;;  %7401 = vmatprep.subr.mxu1 %v5895_v8  ;;  %v6059_v42 = vld [vmem:[%s11652_s14 + $0x38] sm:$0xff]  ;;  %v6058_v8 = vld [vmem:[%s11652_s14 + $0x30] sm:$0xff] }
0x1061   :  { %7367 = vmatpush3.msra.mxu0 %v5847_v16  ;;  %7402 = vmatpush3.msra.mxu1 %v5879_v12  ;;  %v6057_v16 = vld [vmem:[%s11652_s14 + $0x28] sm:$0xff]  ;;  %v6056_v12 = vld [vmem:[%s11652_s14 + $0x20] sm:$0xff] }
0x1062   :  { %7368 = vmatprep.subr.mxu0 %v5862_v17  ;;  %7403 = vmatprep.subr.mxu1 %v5894_v24  ;;  %v6055_v17 = vld [vmem:[%s11652_s14 + $0x18] sm:$0xff]  ;;  %v6054_v24 = vld [vmem:[%s11652_s14 + $0x10] sm:$0xff] }
0x1063   :  { %7369 = vmatpush3.msra.mxu0 %v5846_v30  ;;  %7404 = vmatpush3.msra.mxu1 %v5878_v35  ;;  %v6053_v30 = vld [vmem:[%s11652_s14 + $0x8] sm:$0xff]  ;;  %v6052_v35 = vld [vmem:[%s11652_s14] sm:$0xff] }
0x1064   :  { %7370 = vmatprep.subr.mxu0 %v5861_v40  ;;  %7405 = vmatprep.subr.mxu1 %v5893_v45 }
0x1065   :  { %7371 = vmatpush3.msra.mxu0 %v5845_v50  ;;  %7406 = vmatpush3.msra.mxu1 %v5877_v55  ;;  %v6509_v50 = vld [vmem:[%s11653_s13] ss:$0 sm:$0xff] }
0x1066   :  { %7372 = vmatprep.subr.mxu0 %v5860_v60  ;;  %7407 = vmatprep.subr.mxu1 %v5892_v1 }
0x1067   :  { %7373 = vmatpush3.msra.mxu0 %v5844_v7  ;;  %7408 = vmatpush3.msra.mxu1 %v5876_v13 }
0x1068   :  { %7374 = vmatprep.subr.mxu0 %v5859_v19  ;;  %7409 = vmatprep.subr.mxu1 %v5891_v25 }
0x1069   :  { %7375 = vmatpush3.msra.mxu0 %v5843_v28  ;;  %7410 = vmatpush3.msra.mxu1 %v5875_v44 }
0x106a   :  { %7376 = vmatprep.subr.mxu0 %v5858_v47  ;;  %7411 = vmatprep.subr.mxu1 %v5890_v48 }
0x106b   :  { %7377 = vmatpush3.msra.mxu0 %v5842_v52  ;;  %7412 = vmatpush3.msra.mxu1 %v5874_v14 }
0x106c   :  { %7378 = vmatprep.subr.mxu0 %v5857_v54  ;;  %7413 = vmatprep.subr.mxu1 %v5889_v22 }
0x106d   :  { %7379 = vmatpush3.msra.mxu0 %v5841_v58  ;;  %7414 = vmatpush3.msra.mxu1 %v5873_v59 }
0x106e   :  { %7380 = vmatprep.subr.mxu0 %v5856_v61  ;;  %7415 = vmatprep.subr.mxu1 %v5888_v0 }
0x106f   :  { %7381 = vmatpush3.msra.mxu0 %v5840_v3  ;;  %7416 = vmatpush3.msra.mxu1 %v5872_v33 }
0x1070   :  { %8911 = vmatprep.subr.mxu0 %v8948_v6 }
0x1110   :  { %v5760_v18 = vpop.f32.mrf.mxu0  ;;  %v5831_v46 = vpop.f32.mrf.mxu1 }
0x1111   :  { %v5761_v53 = vadd.f32 %v5760_v18, %v5674_v10  ;;  %v5832_v20 = vadd.f32 %v5831_v46, %v5682_v11 }
0x1112   :  { %v5762_v43 = vpop.f32.mrf.mxu0  ;;  %v5833_v31 = vpop.f32.mrf.mxu1 }
0x1113   :  { %v5763_v27 = vadd.f32 %v5762_v43, %v5678_v15  ;;  %v5834_v21 = vadd.f32 %v5833_v31, %v5686_v38  ;;  %v5836_v29 = vmax.f32 %v5761_v53, 0.0  ;;  %v5838_v49 = vmax.f32 %v5832_v20, 0.0 }
0x1115   :  { %v5837_v23 = vmax.f32 %v5763_v27, 0.0  ;;  %v5839_v26 = vmax.f32 %v5834_v21, 0.0 }
0x1117   :  { %5975 = vmatprep.mubr.f32.mxu0 %v5837_v23  ;;  %6045 = vmatprep.mubr.f32.mxu1 %v5839_v26 }
0x1118   :  { %5976 = vmatmul.mubr.f32.vlgmr.msra.gmra.mxu0 %v5836_v29  ;;  %6046 = vmatmul.mubr.f32.vlgmr.msra.gmra.mxu1 %v5838_v49 }
0x1119   :  { %8912 = vmatpush3.msra.mxu0 %v6067_v32  ;;  %8943 = vmatprep.mubr.msk.f32.mxu0 %vm8949_vm1, %v8948_v6 }
0x111a   :  { %8913 = vmatprep.subr.mxu0 %v8948_v6 }
0x111b   :  { %8914 = vmatpush3.msra.mxu0 %v6066_v56 }
0x111c   :  { %8915 = vmatprep.subr.mxu0 %v8948_v6 }
0x111d   :  { %8916 = vmatpush3.msra.mxu0 %v6065_v62 }
0x111e   :  { %8917 = vmatprep.subr.mxu0 %v8948_v6 }
0x111f   :  { %8918 = vmatpush3.msra.mxu0 %v6064_v34 }
0x1120   :  { %8919 = vmatprep.subr.mxu0 %v8948_v6 }
0x1121   :  { %8920 = vmatpush3.msra.mxu0 %v6063_v36 }
0x1122   :  { %8921 = vmatprep.subr.mxu0 %v8948_v6 }
0x1123   :  { %8922 = vmatpush3.msra.mxu0 %v6062_v37 }
0x1124   :  { %8923 = vmatprep.subr.mxu0 %v8948_v6 }
0x1125   :  { %8924 = vmatpush3.msra.mxu0 %v6061_v39 }
0x1126   :  { %8925 = vmatprep.subr.mxu0 %v8948_v6 }
0x1127   :  { %8926 = vmatpush3.msra.mxu0 %v6060_v63 }
0x1128   :  { %8927 = vmatprep.subr.mxu0 %v8948_v6 }
0x1129   :  { %8928 = vmatpush3.msra.mxu0 %v6059_v42 }
0x112a   :  { %8929 = vmatprep.subr.mxu0 %v8948_v6 }
0x112b   :  { %8930 = vmatpush3.msra.mxu0 %v6058_v8 }
0x112c   :  { %8931 = vmatprep.subr.mxu0 %v8948_v6 }
0x112d   :  { %8932 = vmatpush3.msra.mxu0 %v6057_v16 }
0x112e   :  { %8933 = vmatprep.subr.mxu0 %v8948_v6 }
0x112f   :  { %8934 = vmatpush3.msra.mxu0 %v6056_v12 }
0x1130   :  { %8935 = vmatprep.subr.mxu0 %v8948_v6 }
0x1131   :  { %8936 = vmatpush3.msra.mxu0 %v6055_v17 }
0x1132   :  { %8937 = vmatprep.subr.mxu0 %v8948_v6 }
0x1133   :  { %8938 = vmatpush3.msra.mxu0 %v6054_v24 }
0x1134   :  { %8939 = vmatprep.subr.mxu0 %v8948_v6 }
0x1135   :  { %8940 = vmatpush3.msra.mxu0 %v6053_v30 }
0x1136   :  { %8941 = vmatprep.subr.mxu0 %v8948_v6  ;;  %v6510_v6 = vld [vmem:[%s11654_s15] ss:$0 sm:$0xff] }
0x1137   :  { %8942 = vmatpush3.msra.mxu0 %v6052_v35 }
0x11d8   :  { %v7382_v40 = vpop.f32.mrf.mxu0  ;;  %v7417_v45 = vpop.f32.mrf.mxu1 }
0x11da   :  { %v7383_v55 = vpop.f32.mrf.mxu0  ;;  %v7418_v60 = vpop.f32.mrf.mxu1 }
0x11db   :  { %v7384_v1 = vadd.f32 %v7383_v55, %v7382_v40  ;;  %v7419_v13 = vadd.f32 %v7418_v60, %v7417_v45 }
0x11dd   :  { %v5978_v7 = vadd.f32 %v7384_v1, %v6509_v50 }
0x11df   :  { %v6048_v19 = vadd.f32 %v7419_v13, %v5978_v7 }
0x11e1   :  { %v6051_v25 = vmax.f32 %v6048_v19, 0.0 }
0x11e3   :  { %8944 = vmatmul.mubr.f32.vlgmr.msra.gmra.mxu0 %v6051_v25 }
0x12a3   :  { %v6141_v28 = vpop.f32.mrf.mxu0 }
0x12a4   :  { %v6142_v44 = vadd.f32 %v6510_v6, %v6141_v28 }
0x12a5   :  { %v8945_v47 = vpop.f32.mrf.mxu0 }
0x12a6   :  { %6145 = vst [vmem:[%s11655_s16] sm:$0x3] %v6142_v44 }

</bundles_post_ra>
